<compile_context>
chip_gen: v5e
topology: v5e:2x2
jax: 0.10.0
libtpu: 0.0.40
codegen_flags: <defaults>
</compile_context>

<pallas_src>
import functools

import jax
import jax.numpy as jnp
from jax.experimental import pallas as pl
from jax.experimental.pallas import tpu as pltpu


# ---------------------------------------------------------------------------
# helpers
# ---------------------------------------------------------------------------
def _round_up(v, m):
    return (v + m - 1) // m * m


# ---------------------------------------------------------------------------
# Pallas kernels
# ---------------------------------------------------------------------------
def _gemm_kernel(a_ref, b_ref, bias_ref, o_ref, acc_ref, *, act_in, act_out):
    """Tiled GEMM with fused input-activation prologue and bias(+tanh) epilogue.

    a_ref   : (tm, tk) bf16 im2col patch tile
    b_ref   : (tk, tn) bf16 weight tile
    bias_ref: (1,  tn) f32
    o_ref   : (tm, tn) out tile
    acc_ref : (tm, tn) f32 VMEM accumulator (persists across the K grid axis)
    """
    k = pl.program_id(2)

    @pl.when(k == 0)
    def _():
        acc_ref[...] = jnp.zeros_like(acc_ref)

    a = a_ref[...]
    # Activation that precedes the conv in nn.Sequential, fused as an A-operand prologue
    # (elementwise, commutes with patch extraction; zero padding maps to zero).
    if act_in == "lrelu":        # nn.LeakyReLU(0.2)
        a = jnp.where(a > 0, a, a * 0.2)
    elif act_in == "relu":       # nn.ReLU
        a = jnp.maximum(a, 0)

    acc_ref[...] += jnp.dot(a, b_ref[...], preferred_element_type=jnp.float32)

    @pl.when(k == pl.num_programs(2) - 1)
    def _():
        y = acc_ref[...] + bias_ref[...]
        if act_out == "tanh":    # nn.Tanh (outermost)
            y = jnp.tanh(y)
        o_ref[...] = y.astype(o_ref.dtype)


def _bn_stats_kernel(x_ref, s_ref, q_ref):
    """Per-channel sum / sum-of-squares, accumulated across the row-tile grid axis."""
    @pl.when(pl.program_id(0) == 0)
    def _():
        s_ref[...] = jnp.zeros_like(s_ref)
        q_ref[...] = jnp.zeros_like(q_ref)

    x = x_ref[...]
    s_ref[...] += jnp.sum(x, axis=0, keepdims=True)
    q_ref[...] += jnp.sum(x * x, axis=0, keepdims=True)


def _scale_shift_kernel(x_ref, scale_ref, shift_ref, o_ref):
    o_ref[...] = x_ref[...] * scale_ref[...] + shift_ref[...]


# ---------------------------------------------------------------------------
# GEMM wrapper (tiling / padding / pallas_call)
# ---------------------------------------------------------------------------
def gemm_bias_act(a, b, bias, act_in="none", act_out="none"):
    """out = act_out(act_in(a) @ b + bias).  a:(M,K) f32, b:(K,N) f32, bias:(N,) f32."""
    M, K = a.shape
    K2, N = b.shape
    assert K == K2

    tm = min(256, _round_up(M, 128))
    tn = min(256, _round_up(N, 128))          # lane-dense output tile (multiple of 128)
    tk = min(1024, _round_up(K, 128))
    Mp, Kp, Np = _round_up(M, tm), _round_up(K, tk), _round_up(N, tn)

    a_p = jnp.zeros((Mp, Kp), jnp.bfloat16).at[:M, :K].set(a.astype(jnp.bfloat16))
    b_p = jnp.zeros((Kp, Np), jnp.bfloat16).at[:K, :N].set(b.astype(jnp.bfloat16))
    bias_p = jnp.zeros((1, Np), jnp.float32).at[0, :N].set(bias.astype(jnp.float32))

    grid = (Mp // tm, Np // tn, Kp // tk)
    kernel = functools.partial(_gemm_kernel, act_in=act_in, act_out=act_out)

    out = pl.pallas_call(
        kernel,
        out_shape=jax.ShapeDtypeStruct((Mp, Np), jnp.float32),
        grid_spec=pltpu.PrefetchScalarGridSpec(
            num_scalar_prefetch=0,
            grid=grid,
            in_specs=[
                pl.BlockSpec((tm, tk), lambda i, j, k: (i, k)),
                pl.BlockSpec((tk, tn), lambda i, j, k: (k, j)),
                pl.BlockSpec((1, tn), lambda i, j, k: (0, j)),
            ],
            out_specs=pl.BlockSpec((tm, tn), lambda i, j, k: (i, j)),
            scratch_shapes=[pltpu.VMEM((tm, tn), jnp.float32)],
        ),
        compiler_params=pltpu.CompilerParams(
            dimension_semantics=("parallel", "parallel", "arbitrary")),
    )(a_p, b_p, bias_p)
    return out[:M, :N]


# ---------------------------------------------------------------------------
# Conv / ConvTranspose / BatchNorm wrappers
# ---------------------------------------------------------------------------
def conv4x4_s2(x, w_hwio, bias, act_in="none"):
    """nn.Conv2d(kernel_size=4, stride=2, padding=1).  x: (N,H,W,Cin), w: (4,4,Cin,Cout)."""
    N, H, W, Cin = x.shape
    assert H % 2 == 0 and W % 2 == 0
    Cout = w_hwio.shape[-1]
    Ho, Wo = H // 2, W // 2

    xp = jnp.pad(x, ((0, 0), (1, 1), (1, 1), (0, 0)))
    cols = [xp[:, dy:dy + H:2, dx:dx + W:2, :] for dy in range(4) for dx in range(4)]
    a = jnp.concatenate(cols, axis=-1).reshape(N * Ho * Wo, 16 * Cin)   # K = 16*Cin
    b = w_hwio.reshape(16 * Cin, Cout)
    out = gemm_bias_act(a, b, bias, act_in=act_in)
    return out.reshape(N, Ho, Wo, Cout)


def _convT_weight_to_gemm(w_t):
    """PyTorch ConvTranspose2d weight (Cin, Cout, 4, 4) -> GEMM matrix (9*Cin, 4*Cout).

    ConvTranspose2d(k=4, s=2, p=1) decomposes exactly into 4 sub-pixel phases:
      out[n, 2t+py, 2u+px, co] =
        sum_{oy,ox,ci} xpad[n, t+oy, u+ox, ci] * w[ci, co, 3+py-2*oy, 3+px-2*ox]
    (terms with a kernel index outside [0,4) are zero), xpad = 1-pixel zero pad of x.
    """
    cin, cout = w_t.shape[0], w_t.shape[1]
    wc = jnp.zeros((3, 3, cin, 2, 2, cout), w_t.dtype)
    for oy in range(3):
        for py in range(2):
            dy = 3 + py - 2 * oy
            if not 0 <= dy < 4:
                continue
            for ox in range(3):
                for px in range(2):
                    dx = 3 + px - 2 * ox
                    if not 0 <= dx < 4:
                        continue
                    wc = wc.at[oy, ox, :, py, px, :].set(w_t[:, :, dy, dx])
    return wc.reshape(9 * cin, 4 * cout)


def convtranspose4x4_s2(x, w_tconv, bias, act_in="none", act_out="none"):
    """nn.ConvTranspose2d(kernel_size=4, stride=2, padding=1).  x: (N,H,W,Cin)."""
    N, H, W, Cin = x.shape
    Cout = w_tconv.shape[1]

    xp = jnp.pad(x, ((0, 0), (1, 1), (1, 1), (0, 0)))
    cols = [xp[:, oy:oy + H, ox:ox + W, :] for oy in range(3) for ox in range(3)]
    a = jnp.concatenate(cols, axis=-1).reshape(N * H * W, 9 * Cin)      # K = 9*Cin
    b = _convT_weight_to_gemm(w_tconv)                                  # (9*Cin, 4*Cout)
    bias4 = jnp.tile(bias, 4)                                           # per-phase bias

    out = gemm_bias_act(a, b, bias4, act_in=act_in, act_out=act_out)    # (M, 4*Cout)
    out = out.reshape(N, H, W, 2, 2, Cout)
    out = jnp.transpose(out, (0, 1, 3, 2, 4, 5)).reshape(N, 2 * H, 2 * W, Cout)
    return out


def batchnorm2d(x, eps=1e-5):
    """nn.BatchNorm2d in training mode: batch statistics, gamma=1, beta=0 (default init)."""
    N, H, W, C = x.shape
    M = N * H * W
    x2 = x.reshape(M, C)

    tm = min(512, _round_up(M, 8))
    Mp = _round_up(M, tm)
    x_p = jnp.zeros((Mp, C), jnp.float32).at[:M].set(x2)

    s, q = pl.pallas_call(
        _bn_stats_kernel,
        out_shape=(jax.ShapeDtypeStruct((1, C), jnp.float32),
                   jax.ShapeDtypeStruct((1, C), jnp.float32)),
        grid_spec=pltpu.PrefetchScalarGridSpec(
            num_scalar_prefetch=0,
            grid=(Mp // tm,),
            in_specs=[pl.BlockSpec((tm, C), lambda i: (i, 0))],
            out_specs=[pl.BlockSpec((1, C), lambda i: (0, 0)),
                       pl.BlockSpec((1, C), lambda i: (0, 0))],
        ),
        compiler_params=pltpu.CompilerParams(dimension_semantics=("arbitrary",)),
    )(x_p)

    mean = s[0] / M
    var = q[0] / M - mean * mean            # biased variance (PyTorch BN normalization)
    rstd = jax.lax.rsqrt(var + eps)
    scale = rstd.reshape(1, C)              # gamma = 1
    shift = (-mean * rstd).reshape(1, C)    # beta  = 0

    out = pl.pallas_call(
        _scale_shift_kernel,
        out_shape=jax.ShapeDtypeStruct((Mp, C), jnp.float32),
        grid_spec=pltpu.PrefetchScalarGridSpec(
            num_scalar_prefetch=0,
            grid=(Mp // tm,),
            in_specs=[pl.BlockSpec((tm, C), lambda i: (i, 0)),
                      pl.BlockSpec((1, C), lambda i: (0, 0)),
                      pl.BlockSpec((1, C), lambda i: (0, 0))],
            out_specs=pl.BlockSpec((tm, C), lambda i: (i, 0)),
        ),
        compiler_params=pltpu.CompilerParams(dimension_semantics=("parallel",)),
    )(x_p, scale, shift)
    return out[:M].reshape(N, H, W, C)


# ---------------------------------------------------------------------------
# UnetSkipConnectionBlock (recursive: outermost -> ... -> innermost)
# ---------------------------------------------------------------------------
def init_unet_params(key, input_nc, output_nc, inner_channels):
    """inner_channels[0] = outermost inner_nc, ..., inner_channels[-1] = bottleneck width.

    Weight layouts: downconv HWIO (4,4,Cin,Cout); upconv PyTorch ConvTranspose (Cin,Cout,4,4).
    He-style deterministic init (the reference uses PyTorch's default init; values differ,
    shapes/semantics match).
    """
    n = len(inner_channels)
    params = []
    for lvl in range(n):
        key, kd, ku, kb = jax.random.split(key, 4)
        outermost = lvl == 0
        innermost = lvl == n - 1
        inner_nc = inner_channels[lvl]
        outer_nc = output_nc if outermost else inner_channels[lvl - 1]
        in_nc = input_nc if outermost else inner_channels[lvl - 1]
        up_in = inner_nc if innermost else inner_nc * 2     # skip concat doubles channels
        down_std = (2.0 / (16.0 * in_nc)) ** 0.5
        up_std = (2.0 / (16.0 * up_in)) ** 0.5
        params.append({
            "down_w": jax.random.normal(kd, (4, 4, in_nc, inner_nc), jnp.float32) * down_std,
            "down_b": jnp.zeros((inner_nc,), jnp.float32),          # bias=False (BatchNorm)
            "up_w": jax.random.normal(ku, (up_in, outer_nc, 4, 4), jnp.float32) * up_std,
            "up_b": (jax.random.normal(kb, (outer_nc,), jnp.float32) * 0.01)
                    if outermost else jnp.zeros((outer_nc,), jnp.float32),
        })
    return params


def unet_block_forward(params, level, x):
    n = len(params)
    p = params[level]
    outermost = level == 0
    innermost = level == n - 1

    if outermost:
        # model = [downconv, submodule, uprelu, upconv, tanh]; forward = model(x)
        d = conv4x4_s2(x, p["down_w"], p["down_b"], act_in="none")
        s = unet_block_forward(params, level + 1, d)
        return convtranspose4x4_s2(s, p["up_w"], p["up_b"], act_in="relu", act_out="tanh")

    if innermost:
        # model = [downrelu, downconv, uprelu, upconv, upnorm]; forward = cat([x, model(x)])
        d = conv4x4_s2(x, p["down_w"], p["down_b"], act_in="lrelu")
        u = convtranspose4x4_s2(d, p["up_w"], p["up_b"], act_in="relu")
        u = batchnorm2d(u)
        return jnp.concatenate([x, u], axis=-1)

    # middle: model = [downrelu, downconv, downnorm, submodule, uprelu, upconv, upnorm]
    d = batchnorm2d(conv4x4_s2(x, p["down_w"], p["down_b"], act_in="lrelu"))
    s = unet_block_forward(params, level + 1, d)
    u = batchnorm2d(convtranspose4x4_s2(s, p["up_w"], p["up_b"], act_in="relu"))
    return jnp.concatenate([x, u], axis=-1)


def unet_forward(params, x_nchw):
    x = jnp.transpose(x_nchw, (0, 2, 3, 1))       # NCHW (PyTorch) -> NHWC
    y = unet_block_forward(params, 0, x)
    return jnp.transpose(y, (0, 3, 1, 2))         # NHWC -> NCHW


# ---------------------------------------------------------------------------
if __name__ == "__main__":
    key = jax.random.PRNGKey(0)
    kp, kx = jax.random.split(key)

    # Small shapes implied by the module: batch=2, input_nc=4, 16x16 image,
    # 3 nested blocks (outermost -> middle -> innermost), bottleneck at 2x2.
    N, input_nc, H, W = 2, 4, 16, 16
    output_nc = 4
    inner_channels = [16, 32, 64]

    params = init_unet_params(kp, input_nc, output_nc, inner_channels)
    x = jax.random.normal(kx, (N, input_nc, H, W), jnp.float32)

    fwd = jax.jit(unet_forward)
    out = fwd(params, x)
    jax.block_until_ready(out)

    assert out.shape == (N, output_nc, H, W), out.shape
    assert bool(jnp.all(jnp.isfinite(out)))
    assert bool(jnp.all(jnp.abs(out) <= 1.0 + 1e-5))   # outermost output passes through tanh
    print("KERNEL_OK")
</pallas_src>

<mosaic_0001>
module attributes {stable_mosaic.version = 11 : i64} {
  func.func @_gemm_kernel(%arg0: i32, %arg1: i32, %arg2: i32, %arg3: memref<128x128xbf16, #tpu.memory_space<vmem>>, %arg4: memref<128x128xbf16, #tpu.memory_space<vmem>>, %arg5: memref<1x128xf32, #tpu.memory_space<vmem>>, %arg6: memref<128x128xf32, #tpu.memory_space<vmem>>, %arg7: memref<128x128xf32, #tpu.memory_space<vmem>>) attributes {dimension_semantics = [#tpu.dimension_semantics<parallel>, #tpu.dimension_semantics<parallel>, #tpu.dimension_semantics<arbitrary>], iteration_bounds = array<i64: 1, 1, 1>, scalar_prefetch = 0 : i64, scratch_operands = 1 : i64, tpu.core_type = #tpu.core_type<tc>, window_params = [{transform_indices = @transform_0, window_bounds = array<i64: 128, 128>}, {transform_indices = @transform_1, window_bounds = array<i64: 128, 128>}, {transform_indices = @transform_2, window_bounds = array<i64: 1, 128>}, {transform_indices = @transform_3, window_bounds = array<i64: 128, 128>}]} {
    %c0_i32 = arith.constant 0 : i32
    %0 = arith.cmpi eq, %arg2, %c0_i32 : i32
    %1 = arith.extui %0 : i1 to i32
    %c0_i32_0 = arith.constant 0 : i32
    %2 = arith.cmpi ne, %1, %c0_i32_0 : i32
    scf.if %2 {
      %cst_10 = arith.constant 0.000000e+00 : f32
      %12 = vector.broadcast %cst_10 : f32 to vector<128x128xf32>
      %c0_11 = arith.constant 0 : index
      %c0_12 = arith.constant 0 : index
      %13 = vector.load %arg7[%c0_11, %c0_12] : memref<128x128xf32, #tpu.memory_space<vmem>>, vector<128x128xf32>
      tpu.vector_store %arg7[%c0_11, %c0_12], %12 {strides = array<i32>} : memref<128x128xf32, #tpu.memory_space<vmem>>, vector<128x128xf32>,
    } else {
    }
    %c0 = arith.constant 0 : index
    %c0_1 = arith.constant 0 : index
    %3 = vector.load %arg3[%c0, %c0_1] : memref<128x128xbf16, #tpu.memory_space<vmem>>, vector<128x128xbf16>
    %c0_2 = arith.constant 0 : index
    %c0_3 = arith.constant 0 : index
    %4 = vector.load %arg7[%c0_2, %c0_3] : memref<128x128xf32, #tpu.memory_space<vmem>>, vector<128x128xf32>
    %c0_4 = arith.constant 0 : index
    %c0_5 = arith.constant 0 : index
    %5 = vector.load %arg4[%c0_4, %c0_5] : memref<128x128xbf16, #tpu.memory_space<vmem>>, vector<128x128xbf16>
    %cst = arith.constant dense<0.000000e+00> : vector<128x128xf32>
    %6 = tpu.matmul %3, %5, %cst {dimension_numbers = #tpu.dot_dimension_numbers<[1], [0], [0], [1], [0, 0, 1, 1], [], []>} : vector<128x128xbf16>, vector<128x128xbf16>, vector<128x128xf32> -> vector<128x128xf32>
    %7 = arith.addf %4, %6 : vector<128x128xf32>
    %c0_6 = arith.constant 0 : index
    %c0_7 = arith.constant 0 : index
    %8 = vector.load %arg7[%c0_6, %c0_7] : memref<128x128xf32, #tpu.memory_space<vmem>>, vector<128x128xf32>
    tpu.vector_store %arg7[%c0_6, %c0_7], %7 {strides = array<i32>} : memref<128x128xf32, #tpu.memory_space<vmem>>, vector<128x128xf32>,
    %c0_i32_8 = arith.constant 0 : i32
    %9 = arith.cmpi eq, %arg2, %c0_i32_8 : i32
    %10 = arith.extui %9 : i1 to i32
    %c0_i32_9 = arith.constant 0 : i32
    %11 = arith.cmpi ne, %10, %c0_i32_9 : i32
    scf.if %11 {
      %c0_10 = arith.constant 0 : index
      %c0_11 = arith.constant 0 : index
      %12 = vector.load %arg7[%c0_10, %c0_11] : memref<128x128xf32, #tpu.memory_space<vmem>>, vector<128x128xf32>
      %c0_12 = arith.constant 0 : index
      %c0_13 = arith.constant 0 : index
      %13 = vector.load %arg5[%c0_12, %c0_13] : memref<1x128xf32, #tpu.memory_space<vmem>>, vector<1x128xf32>
      %14 = vector.broadcast %13 : vector<1x128xf32> to vector<128x128xf32>
      %15 = arith.addf %12, %14 : vector<128x128xf32>
      %c0_14 = arith.constant 0 : index
      %c0_15 = arith.constant 0 : index
      %16 = vector.load %arg6[%c0_14, %c0_15] : memref<128x128xf32, #tpu.memory_space<vmem>>, vector<128x128xf32>
      tpu.vector_store %arg6[%c0_14, %c0_15], %15 {strides = array<i32>} : memref<128x128xf32, #tpu.memory_space<vmem>>, vector<128x128xf32>,
    } else {
    }
    return
  }
  func.func @transform_0(%arg0: i32, %arg1: i32, %arg2: i32) -> (i32, i32) {
    %c0_i32 = arith.constant 0 : i32
    return %arg0, %arg2 : i32, i32
  }
  func.func @transform_1(%arg0: i32, %arg1: i32, %arg2: i32) -> (i32, i32) {
    %c0_i32 = arith.constant 0 : i32
    return %arg2, %arg1 : i32, i32
  }
  func.func @transform_2(%arg0: i32, %arg1: i32, %arg2: i32) -> (i32, i32) {
    %c0_i32 = arith.constant 0 : i32
    %c0_i32_0 = arith.constant 0 : i32
    return %c0_i32, %arg1 : i32, i32
  }
  func.func @transform_3(%arg0: i32, %arg1: i32, %arg2: i32) -> (i32, i32) {
    %c0_i32 = arith.constant 0 : i32
    return %arg0, %arg1 : i32, i32
  }
}

module attributes {stable_mosaic.version = 11 : i64} {
  func.func @_gemm_kernel(%arg0: i32, %arg1: i32, %arg2: i32, %arg3: memref<128x256xbf16, #tpu.memory_space<vmem>>, %arg4: memref<256x128xbf16, #tpu.memory_space<vmem>>, %arg5: memref<1x128xf32, #tpu.memory_space<vmem>>, %arg6: memref<128x128xf32, #tpu.memory_space<vmem>>, %arg7: memref<128x128xf32, #tpu.memory_space<vmem>>) attributes {dimension_semantics = [#tpu.dimension_semantics<parallel>, #tpu.dimension_semantics<parallel>, #tpu.dimension_semantics<arbitrary>], iteration_bounds = array<i64: 1, 1, 1>, scalar_prefetch = 0 : i64, scratch_operands = 1 : i64, tpu.core_type = #tpu.core_type<tc>, window_params = [{transform_indices = @transform_0, window_bounds = array<i64: 128, 256>}, {transform_indices = @transform_1, window_bounds = array<i64: 256, 128>}, {transform_indices = @transform_2, window_bounds = array<i64: 1, 128>}, {transform_indices = @transform_3, window_bounds = array<i64: 128, 128>}]} {
    %c0_i32 = arith.constant 0 : i32
    %0 = arith.cmpi eq, %arg2, %c0_i32 : i32
    %1 = arith.extui %0 : i1 to i32
    %c0_i32_0 = arith.constant 0 : i32
    %2 = arith.cmpi ne, %1, %c0_i32_0 : i32
    scf.if %2 {
      %cst_12 = arith.constant 0.000000e+00 : f32
      %17 = vector.broadcast %cst_12 : f32 to vector<128x128xf32>
      %c0_13 = arith.constant 0 : index
      %c0_14 = arith.constant 0 : index
      %18 = vector.load %arg7[%c0_13, %c0_14] : memref<128x128xf32, #tpu.memory_space<vmem>>, vector<128x128xf32>
      tpu.vector_store %arg7[%c0_13, %c0_14], %17 {strides = array<i32>} : memref<128x128xf32, #tpu.memory_space<vmem>>, vector<128x128xf32>,
    } else {
    }
    %c0 = arith.constant 0 : index
    %c0_1 = arith.constant 0 : index
    %3 = vector.load %arg3[%c0, %c0_1] : memref<128x256xbf16, #tpu.memory_space<vmem>>, vector<128x256xbf16>
    %cst = arith.constant 0.000000e+00 : bf16
    %4 = vector.broadcast %cst : bf16 to vector<128x256xbf16>
    %5 = arith.cmpf ogt, %3, %4 : vector<128x256xbf16>
    %cst_2 = arith.constant 2.001950e-01 : bf16
    %6 = vector.broadcast %cst_2 : bf16 to vector<128x256xbf16>
    %7 = arith.mulf %3, %6 : vector<128x256xbf16>
    %8 = arith.select %5, %3, %7 : vector<128x256xi1>, vector<128x256xbf16>
    %c0_3 = arith.constant 0 : index
    %c0_4 = arith.constant 0 : index
    %9 = vector.load %arg7[%c0_3, %c0_4] : memref<128x128xf32, #tpu.memory_space<vmem>>, vector<128x128xf32>
    %c0_5 = arith.constant 0 : index
    %c0_6 = arith.constant 0 : index
    %10 = vector.load %arg4[%c0_5, %c0_6] : memref<256x128xbf16, #tpu.memory_space<vmem>>, vector<256x128xbf16>
    %cst_7 = arith.constant dense<0.000000e+00> : vector<128x128xf32>
    %11 = tpu.matmul %8, %10, %cst_7 {dimension_numbers = #tpu.dot_dimension_numbers<[1], [0], [0], [1], [0, 0, 1, 1], [], []>} : vector<128x256xbf16>, vector<256x128xbf16>, vector<128x128xf32> -> vector<128x128xf32>
    %12 = arith.addf %9, %11 : vector<128x128xf32>
    %c0_8 = arith.constant 0 : index
    %c0_9 = arith.constant 0 : index
    %13 = vector.load %arg7[%c0_8, %c0_9] : memref<128x128xf32, #tpu.memory_space<vmem>>, vector<128x128xf32>
    tpu.vector_store %arg7[%c0_8, %c0_9], %12 {strides = array<i32>} : memref<128x128xf32, #tpu.memory_space<vmem>>, vector<128x128xf32>,
    %c0_i32_10 = arith.constant 0 : i32
    %14 = arith.cmpi eq, %arg2, %c0_i32_10 : i32
    %15 = arith.extui %14 : i1 to i32
    %c0_i32_11 = arith.constant 0 : i32
    %16 = arith.cmpi ne, %15, %c0_i32_11 : i32
    scf.if %16 {
      %c0_12 = arith.constant 0 : index
      %c0_13 = arith.constant 0 : index
      %17 = vector.load %arg7[%c0_12, %c0_13] : memref<128x128xf32, #tpu.memory_space<vmem>>, vector<128x128xf32>
      %c0_14 = arith.constant 0 : index
      %c0_15 = arith.constant 0 : index
      %18 = vector.load %arg5[%c0_14, %c0_15] : memref<1x128xf32, #tpu.memory_space<vmem>>, vector<1x128xf32>
      %19 = vector.broadcast %18 : vector<1x128xf32> to vector<128x128xf32>
      %20 = arith.addf %17, %19 : vector<128x128xf32>
      %c0_16 = arith.constant 0 : index
      %c0_17 = arith.constant 0 : index
      %21 = vector.load %arg6[%c0_16, %c0_17] : memref<128x128xf32, #tpu.memory_space<vmem>>, vector<128x128xf32>
      tpu.vector_store %arg6[%c0_16, %c0_17], %20 {strides = array<i32>} : memref<128x128xf32, #tpu.memory_space<vmem>>, vector<128x128xf32>,
    } else {
    }
    return
  }
  func.func @transform_0(%arg0: i32, %arg1: i32, %arg2: i32) -> (i32, i32) {
    %c0_i32 = arith.constant 0 : i32
    return %arg0, %arg2 : i32, i32
  }
  func.func @transform_1(%arg0: i32, %arg1: i32, %arg2: i32) -> (i32, i32) {
    %c0_i32 = arith.constant 0 : i32
    return %arg2, %arg1 : i32, i32
  }
  func.func @transform_2(%arg0: i32, %arg1: i32, %arg2: i32) -> (i32, i32) {
    %c0_i32 = arith.constant 0 : i32
    %c0_i32_0 = arith.constant 0 : i32
    return %c0_i32, %arg1 : i32, i32
  }
  func.func @transform_3(%arg0: i32, %arg1: i32, %arg2: i32) -> (i32, i32) {
    %c0_i32 = arith.constant 0 : i32
    return %arg0, %arg1 : i32, i32
  }
}

module attributes {stable_mosaic.version = 11 : i64} {
  func.func @_bn_stats_kernel(%arg0: i32, %arg1: memref<32x32xf32, #tpu.memory_space<vmem>>, %arg2: memref<1x32xf32, #tpu.memory_space<vmem>>, %arg3: memref<1x32xf32, #tpu.memory_space<vmem>>) attributes {dimension_semantics = [#tpu.dimension_semantics<arbitrary>], iteration_bounds = array<i64: 1>, scalar_prefetch = 0 : i64, scratch_operands = 0 : i64, tpu.core_type = #tpu.core_type<tc>, window_params = [{transform_indices = @transform_0, window_bounds = array<i64: 32, 32>}, {pipeline_mode = #tpu.pipeline_mode<synchronous>, transform_indices = @transform_1, window_bounds = array<i64: 1, 32>}, {pipeline_mode = #tpu.pipeline_mode<synchronous>, transform_indices = @transform_2, window_bounds = array<i64: 1, 32>}]} {
    %c0_i32 = arith.constant 0 : i32
    %0 = arith.cmpi eq, %arg0, %c0_i32 : i32
    %1 = arith.extui %0 : i1 to i32
    %c0_i32_0 = arith.constant 0 : i32
    %2 = arith.cmpi ne, %1, %c0_i32_0 : i32
    scf.if %2 {
      %cst_11 = arith.constant 0.000000e+00 : f32
      %15 = vector.broadcast %cst_11 : f32 to vector<1x32xf32>
      %c0_12 = arith.constant 0 : index
      %c0_13 = arith.constant 0 : index
      %16 = vector.load %arg2[%c0_12, %c0_13] : memref<1x32xf32, #tpu.memory_space<vmem>>, vector<1x32xf32>
      tpu.vector_store %arg2[%c0_12, %c0_13], %15 {strides = array<i32>} : memref<1x32xf32, #tpu.memory_space<vmem>>, vector<1x32xf32>,
      %cst_14 = arith.constant 0.000000e+00 : f32
      %17 = vector.broadcast %cst_14 : f32 to vector<1x32xf32>
      %c0_15 = arith.constant 0 : index
      %c0_16 = arith.constant 0 : index
      %18 = vector.load %arg3[%c0_15, %c0_16] : memref<1x32xf32, #tpu.memory_space<vmem>>, vector<1x32xf32>
      tpu.vector_store %arg3[%c0_15, %c0_16], %17 {strides = array<i32>} : memref<1x32xf32, #tpu.memory_space<vmem>>, vector<1x32xf32>,
    } else {
    }
    %c0 = arith.constant 0 : index
    %c0_1 = arith.constant 0 : index
    %3 = vector.load %arg1[%c0, %c0_1] : memref<32x32xf32, #tpu.memory_space<vmem>>, vector<32x32xf32>
    %c0_2 = arith.constant 0 : index
    %c0_3 = arith.constant 0 : index
    %4 = vector.load %arg2[%c0_2, %c0_3] : memref<1x32xf32, #tpu.memory_space<vmem>>, vector<1x32xf32>
    %cst = arith.constant dense<0.000000e+00> : vector<32xf32>
    %5 = vector.multi_reduction <add>, %3, %cst [0] : vector<32x32xf32> to vector<32xf32>
    %6 = vector.shape_cast %5 : vector<32xf32> to vector<1x32xf32>
    %7 = arith.addf %4, %6 : vector<1x32xf32>
    %c0_4 = arith.constant 0 : index
    %c0_5 = arith.constant 0 : index
    %8 = vector.load %arg2[%c0_4, %c0_5] : memref<1x32xf32, #tpu.memory_space<vmem>>, vector<1x32xf32>
    tpu.vector_store %arg2[%c0_4, %c0_5], %7 {strides = array<i32>} : memref<1x32xf32, #tpu.memory_space<vmem>>, vector<1x32xf32>,
    %c0_6 = arith.constant 0 : index
    %c0_7 = arith.constant 0 : index
    %9 = vector.load %arg3[%c0_6, %c0_7] : memref<1x32xf32, #tpu.memory_space<vmem>>, vector<1x32xf32>
    %10 = arith.mulf %3, %3 : vector<32x32xf32>
    %cst_8 = arith.constant dense<0.000000e+00> : vector<32xf32>
    %11 = vector.multi_reduction <add>, %10, %cst_8 [0] : vector<32x32xf32> to vector<32xf32>
    %12 = vector.shape_cast %11 : vector<32xf32> to vector<1x32xf32>
    %13 = arith.addf %9, %12 : vector<1x32xf32>
    %c0_9 = arith.constant 0 : index
    %c0_10 = arith.constant 0 : index
    %14 = vector.load %arg3[%c0_9, %c0_10] : memref<1x32xf32, #tpu.memory_space<vmem>>, vector<1x32xf32>
    tpu.vector_store %arg3[%c0_9, %c0_10], %13 {strides = array<i32>} : memref<1x32xf32, #tpu.memory_space<vmem>>, vector<1x32xf32>,
    return
  }
  func.func @transform_0(%arg0: i32) -> (i32, i32) {
    %c0_i32 = arith.constant 0 : i32
    %c0_i32_0 = arith.constant 0 : i32
    return %arg0, %c0_i32 : i32, i32
  }
  func.func @transform_1(%arg0: i32) -> (i32, i32) {
    %c0_i32 = arith.constant 0 : i32
    %c0_i32_0 = arith.constant 0 : i32
    %c0_i32_1 = arith.constant 0 : i32
    return %c0_i32, %c0_i32_0 : i32, i32
  }
  func.func @transform_2(%arg0: i32) -> (i32, i32) {
    %c0_i32 = arith.constant 0 : i32
    %c0_i32_0 = arith.constant 0 : i32
    %c0_i32_1 = arith.constant 0 : i32
    return %c0_i32, %c0_i32_0 : i32, i32
  }
}

module attributes {stable_mosaic.version = 11 : i64} {
  func.func @_scale_shift_kernel(%arg0: i32, %arg1: memref<32x32xf32, #tpu.memory_space<vmem>>, %arg2: memref<1x32xf32, #tpu.memory_space<vmem>>, %arg3: memref<1x32xf32, #tpu.memory_space<vmem>>, %arg4: memref<32x32xf32, #tpu.memory_space<vmem>>) attributes {dimension_semantics = [#tpu.dimension_semantics<parallel>], iteration_bounds = array<i64: 1>, scalar_prefetch = 0 : i64, scratch_operands = 0 : i64, tpu.core_type = #tpu.core_type<tc>, window_params = [{transform_indices = @transform_0, window_bounds = array<i64: 32, 32>}, {pipeline_mode = #tpu.pipeline_mode<synchronous>, transform_indices = @transform_1, window_bounds = array<i64: 1, 32>}, {pipeline_mode = #tpu.pipeline_mode<synchronous>, transform_indices = @transform_2, window_bounds = array<i64: 1, 32>}, {transform_indices = @transform_3, window_bounds = array<i64: 32, 32>}]} {
    %c0 = arith.constant 0 : index
    %c0_0 = arith.constant 0 : index
    %0 = vector.load %arg1[%c0, %c0_0] : memref<32x32xf32, #tpu.memory_space<vmem>>, vector<32x32xf32>
    %c0_1 = arith.constant 0 : index
    %c0_2 = arith.constant 0 : index
    %1 = vector.load %arg2[%c0_1, %c0_2] : memref<1x32xf32, #tpu.memory_space<vmem>>, vector<1x32xf32>
    %2 = vector.broadcast %1 : vector<1x32xf32> to vector<32x32xf32>
    %3 = arith.mulf %0, %2 : vector<32x32xf32>
    %c0_3 = arith.constant 0 : index
    %c0_4 = arith.constant 0 : index
    %4 = vector.load %arg3[%c0_3, %c0_4] : memref<1x32xf32, #tpu.memory_space<vmem>>, vector<1x32xf32>
    %5 = vector.broadcast %4 : vector<1x32xf32> to vector<32x32xf32>
    %6 = arith.addf %3, %5 : vector<32x32xf32>
    %c0_5 = arith.constant 0 : index
    %c0_6 = arith.constant 0 : index
    %7 = vector.load %arg4[%c0_5, %c0_6] : memref<32x32xf32, #tpu.memory_space<vmem>>, vector<32x32xf32>
    tpu.vector_store %arg4[%c0_5, %c0_6], %6 {strides = array<i32>} : memref<32x32xf32, #tpu.memory_space<vmem>>, vector<32x32xf32>,
    return
  }
  func.func @transform_0(%arg0: i32) -> (i32, i32) {
    %c0_i32 = arith.constant 0 : i32
    %c0_i32_0 = arith.constant 0 : i32
    return %arg0, %c0_i32 : i32, i32
  }
  func.func @transform_1(%arg0: i32) -> (i32, i32) {
    %c0_i32 = arith.constant 0 : i32
    %c0_i32_0 = arith.constant 0 : i32
    %c0_i32_1 = arith.constant 0 : i32
    return %c0_i32, %c0_i32_0 : i32, i32
  }
  func.func @transform_2(%arg0: i32) -> (i32, i32) {
    %c0_i32 = arith.constant 0 : i32
    %c0_i32_0 = arith.constant 0 : i32
    %c0_i32_1 = arith.constant 0 : i32
    return %c0_i32, %c0_i32_0 : i32, i32
  }
  func.func @transform_3(%arg0: i32) -> (i32, i32) {
    %c0_i32 = arith.constant 0 : i32
    %c0_i32_0 = arith.constant 0 : i32
    return %arg0, %c0_i32 : i32, i32
  }
}

module attributes {stable_mosaic.version = 11 : i64} {
  func.func @_gemm_kernel(%arg0: i32, %arg1: i32, %arg2: i32, %arg3: memref<128x512xbf16, #tpu.memory_space<vmem>>, %arg4: memref<512x128xbf16, #tpu.memory_space<vmem>>, %arg5: memref<1x128xf32, #tpu.memory_space<vmem>>, %arg6: memref<128x128xf32, #tpu.memory_space<vmem>>, %arg7: memref<128x128xf32, #tpu.memory_space<vmem>>) attributes {dimension_semantics = [#tpu.dimension_semantics<parallel>, #tpu.dimension_semantics<parallel>, #tpu.dimension_semantics<arbitrary>], iteration_bounds = array<i64: 1, 1, 1>, scalar_prefetch = 0 : i64, scratch_operands = 1 : i64, tpu.core_type = #tpu.core_type<tc>, window_params = [{transform_indices = @transform_0, window_bounds = array<i64: 128, 512>}, {transform_indices = @transform_1, window_bounds = array<i64: 512, 128>}, {transform_indices = @transform_2, window_bounds = array<i64: 1, 128>}, {transform_indices = @transform_3, window_bounds = array<i64: 128, 128>}]} {
    %c0_i32 = arith.constant 0 : i32
    %0 = arith.cmpi eq, %arg2, %c0_i32 : i32
    %1 = arith.extui %0 : i1 to i32
    %c0_i32_0 = arith.constant 0 : i32
    %2 = arith.cmpi ne, %1, %c0_i32_0 : i32
    scf.if %2 {
      %cst_12 = arith.constant 0.000000e+00 : f32
      %17 = vector.broadcast %cst_12 : f32 to vector<128x128xf32>
      %c0_13 = arith.constant 0 : index
      %c0_14 = arith.constant 0 : index
      %18 = vector.load %arg7[%c0_13, %c0_14] : memref<128x128xf32, #tpu.memory_space<vmem>>, vector<128x128xf32>
      tpu.vector_store %arg7[%c0_13, %c0_14], %17 {strides = array<i32>} : memref<128x128xf32, #tpu.memory_space<vmem>>, vector<128x128xf32>,
    } else {
    }
    %c0 = arith.constant 0 : index
    %c0_1 = arith.constant 0 : index
    %3 = vector.load %arg3[%c0, %c0_1] : memref<128x512xbf16, #tpu.memory_space<vmem>>, vector<128x512xbf16>
    %cst = arith.constant 0.000000e+00 : bf16
    %4 = vector.broadcast %cst : bf16 to vector<128x512xbf16>
    %5 = arith.cmpf ogt, %3, %4 : vector<128x512xbf16>
    %cst_2 = arith.constant 2.001950e-01 : bf16
    %6 = vector.broadcast %cst_2 : bf16 to vector<128x512xbf16>
    %7 = arith.mulf %3, %6 : vector<128x512xbf16>
    %8 = arith.select %5, %3, %7 : vector<128x512xi1>, vector<128x512xbf16>
    %c0_3 = arith.constant 0 : index
    %c0_4 = arith.constant 0 : index
    %9 = vector.load %arg7[%c0_3, %c0_4] : memref<128x128xf32, #tpu.memory_space<vmem>>, vector<128x128xf32>
    %c0_5 = arith.constant 0 : index
    %c0_6 = arith.constant 0 : index
    %10 = vector.load %arg4[%c0_5, %c0_6] : memref<512x128xbf16, #tpu.memory_space<vmem>>, vector<512x128xbf16>
    %cst_7 = arith.constant dense<0.000000e+00> : vector<128x128xf32>
    %11 = tpu.matmul %8, %10, %cst_7 {dimension_numbers = #tpu.dot_dimension_numbers<[1], [0], [0], [1], [0, 0, 1, 1], [], []>} : vector<128x512xbf16>, vector<512x128xbf16>, vector<128x128xf32> -> vector<128x128xf32>
    %12 = arith.addf %9, %11 : vector<128x128xf32>
    %c0_8 = arith.constant 0 : index
    %c0_9 = arith.constant 0 : index
    %13 = vector.load %arg7[%c0_8, %c0_9] : memref<128x128xf32, #tpu.memory_space<vmem>>, vector<128x128xf32>
    tpu.vector_store %arg7[%c0_8, %c0_9], %12 {strides = array<i32>} : memref<128x128xf32, #tpu.memory_space<vmem>>, vector<128x128xf32>,
    %c0_i32_10 = arith.constant 0 : i32
    %14 = arith.cmpi eq, %arg2, %c0_i32_10 : i32
    %15 = arith.extui %14 : i1 to i32
    %c0_i32_11 = arith.constant 0 : i32
    %16 = arith.cmpi ne, %15, %c0_i32_11 : i32
    scf.if %16 {
      %c0_12 = arith.constant 0 : index
      %c0_13 = arith.constant 0 : index
      %17 = vector.load %arg7[%c0_12, %c0_13] : memref<128x128xf32, #tpu.memory_space<vmem>>, vector<128x128xf32>
      %c0_14 = arith.constant 0 : index
      %c0_15 = arith.constant 0 : index
      %18 = vector.load %arg5[%c0_14, %c0_15] : memref<1x128xf32, #tpu.memory_space<vmem>>, vector<1x128xf32>
      %19 = vector.broadcast %18 : vector<1x128xf32> to vector<128x128xf32>
      %20 = arith.addf %17, %19 : vector<128x128xf32>
      %c0_16 = arith.constant 0 : index
      %c0_17 = arith.constant 0 : index
      %21 = vector.load %arg6[%c0_16, %c0_17] : memref<128x128xf32, #tpu.memory_space<vmem>>, vector<128x128xf32>
      tpu.vector_store %arg6[%c0_16, %c0_17], %20 {strides = array<i32>} : memref<128x128xf32, #tpu.memory_space<vmem>>, vector<128x128xf32>,
    } else {
    }
    return
  }
  func.func @transform_0(%arg0: i32, %arg1: i32, %arg2: i32) -> (i32, i32) {
    %c0_i32 = arith.constant 0 : i32
    return %arg0, %arg2 : i32, i32
  }
  func.func @transform_1(%arg0: i32, %arg1: i32, %arg2: i32) -> (i32, i32) {
    %c0_i32 = arith.constant 0 : i32
    return %arg2, %arg1 : i32, i32
  }
  func.func @transform_2(%arg0: i32, %arg1: i32, %arg2: i32) -> (i32, i32) {
    %c0_i32 = arith.constant 0 : i32
    %c0_i32_0 = arith.constant 0 : i32
    return %c0_i32, %arg1 : i32, i32
  }
  func.func @transform_3(%arg0: i32, %arg1: i32, %arg2: i32) -> (i32, i32) {
    %c0_i32 = arith.constant 0 : i32
    return %arg0, %arg1 : i32, i32
  }
}

module attributes {stable_mosaic.version = 11 : i64} {
  func.func @_gemm_kernel(%arg0: i32, %arg1: i32, %arg2: i32, %arg3: memref<128x640xbf16, #tpu.memory_space<vmem>>, %arg4: memref<640x128xbf16, #tpu.memory_space<vmem>>, %arg5: memref<1x128xf32, #tpu.memory_space<vmem>>, %arg6: memref<128x128xf32, #tpu.memory_space<vmem>>, %arg7: memref<128x128xf32, #tpu.memory_space<vmem>>) attributes {dimension_semantics = [#tpu.dimension_semantics<parallel>, #tpu.dimension_semantics<parallel>, #tpu.dimension_semantics<arbitrary>], iteration_bounds = array<i64: 1, 1, 1>, scalar_prefetch = 0 : i64, scratch_operands = 1 : i64, tpu.core_type = #tpu.core_type<tc>, window_params = [{transform_indices = @transform_0, window_bounds = array<i64: 128, 640>}, {transform_indices = @transform_1, window_bounds = array<i64: 640, 128>}, {transform_indices = @transform_2, window_bounds = array<i64: 1, 128>}, {transform_indices = @transform_3, window_bounds = array<i64: 128, 128>}]} {
    %c0_i32 = arith.constant 0 : i32
    %0 = arith.cmpi eq, %arg2, %c0_i32 : i32
    %1 = arith.extui %0 : i1 to i32
    %c0_i32_0 = arith.constant 0 : i32
    %2 = arith.cmpi ne, %1, %c0_i32_0 : i32
    scf.if %2 {
      %cst_11 = arith.constant 0.000000e+00 : f32
      %14 = vector.broadcast %cst_11 : f32 to vector<128x128xf32>
      %c0_12 = arith.constant 0 : index
      %c0_13 = arith.constant 0 : index
      %15 = vector.load %arg7[%c0_12, %c0_13] : memref<128x128xf32, #tpu.memory_space<vmem>>, vector<128x128xf32>
      tpu.vector_store %arg7[%c0_12, %c0_13], %14 {strides = array<i32>} : memref<128x128xf32, #tpu.memory_space<vmem>>, vector<128x128xf32>,
    } else {
    }
    %c0 = arith.constant 0 : index
    %c0_1 = arith.constant 0 : index
    %3 = vector.load %arg3[%c0, %c0_1] : memref<128x640xbf16, #tpu.memory_space<vmem>>, vector<128x640xbf16>
    %cst = arith.constant 0.000000e+00 : bf16
    %4 = vector.broadcast %cst : bf16 to vector<128x640xbf16>
    %5 = arith.maximumf %3, %4 : vector<128x640xbf16>
    %c0_2 = arith.constant 0 : index
    %c0_3 = arith.constant 0 : index
    %6 = vector.load %arg7[%c0_2, %c0_3] : memref<128x128xf32, #tpu.memory_space<vmem>>, vector<128x128xf32>
    %c0_4 = arith.constant 0 : index
    %c0_5 = arith.constant 0 : index
    %7 = vector.load %arg4[%c0_4, %c0_5] : memref<640x128xbf16, #tpu.memory_space<vmem>>, vector<640x128xbf16>
    %cst_6 = arith.constant dense<0.000000e+00> : vector<128x128xf32>
    %8 = tpu.matmul %5, %7, %cst_6 {dimension_numbers = #tpu.dot_dimension_numbers<[1], [0], [0], [1], [0, 0, 1, 1], [], []>} : vector<128x640xbf16>, vector<640x128xbf16>, vector<128x128xf32> -> vector<128x128xf32>
    %9 = arith.addf %6, %8 : vector<128x128xf32>
    %c0_7 = arith.constant 0 : index
    %c0_8 = arith.constant 0 : index
    %10 = vector.load %arg7[%c0_7, %c0_8] : memref<128x128xf32, #tpu.memory_space<vmem>>, vector<128x128xf32>
    tpu.vector_store %arg7[%c0_7, %c0_8], %9 {strides = array<i32>} : memref<128x128xf32, #tpu.memory_space<vmem>>, vector<128x128xf32>,
    %c0_i32_9 = arith.constant 0 : i32
    %11 = arith.cmpi eq, %arg2, %c0_i32_9 : i32
    %12 = arith.extui %11 : i1 to i32
    %c0_i32_10 = arith.constant 0 : i32
    %13 = arith.cmpi ne, %12, %c0_i32_10 : i32
    scf.if %13 {
      %c0_11 = arith.constant 0 : index
      %c0_12 = arith.constant 0 : index
      %14 = vector.load %arg7[%c0_11, %c0_12] : memref<128x128xf32, #tpu.memory_space<vmem>>, vector<128x128xf32>
      %c0_13 = arith.constant 0 : index
      %c0_14 = arith.constant 0 : index
      %15 = vector.load %arg5[%c0_13, %c0_14] : memref<1x128xf32, #tpu.memory_space<vmem>>, vector<1x128xf32>
      %16 = vector.broadcast %15 : vector<1x128xf32> to vector<128x128xf32>
      %17 = arith.addf %14, %16 : vector<128x128xf32>
      %c0_15 = arith.constant 0 : index
      %c0_16 = arith.constant 0 : index
      %18 = vector.load %arg6[%c0_15, %c0_16] : memref<128x128xf32, #tpu.memory_space<vmem>>, vector<128x128xf32>
      tpu.vector_store %arg6[%c0_15, %c0_16], %17 {strides = array<i32>} : memref<128x128xf32, #tpu.memory_space<vmem>>, vector<128x128xf32>,
    } else {
    }
    return
  }
  func.func @transform_0(%arg0: i32, %arg1: i32, %arg2: i32) -> (i32, i32) {
    %c0_i32 = arith.constant 0 : i32
    return %arg0, %arg2 : i32, i32
  }
  func.func @transform_1(%arg0: i32, %arg1: i32, %arg2: i32) -> (i32, i32) {
    %c0_i32 = arith.constant 0 : i32
    return %arg2, %arg1 : i32, i32
  }
  func.func @transform_2(%arg0: i32, %arg1: i32, %arg2: i32) -> (i32, i32) {
    %c0_i32 = arith.constant 0 : i32
    %c0_i32_0 = arith.constant 0 : i32
    return %c0_i32, %arg1 : i32, i32
  }
  func.func @transform_3(%arg0: i32, %arg1: i32, %arg2: i32) -> (i32, i32) {
    %c0_i32 = arith.constant 0 : i32
    return %arg0, %arg1 : i32, i32
  }
}

module attributes {stable_mosaic.version = 11 : i64} {
  func.func @_bn_stats_kernel(%arg0: i32, %arg1: memref<128x16xf32, #tpu.memory_space<vmem>>, %arg2: memref<1x16xf32, #tpu.memory_space<vmem>>, %arg3: memref<1x16xf32, #tpu.memory_space<vmem>>) attributes {dimension_semantics = [#tpu.dimension_semantics<arbitrary>], iteration_bounds = array<i64: 1>, scalar_prefetch = 0 : i64, scratch_operands = 0 : i64, tpu.core_type = #tpu.core_type<tc>, window_params = [{transform_indices = @transform_0, window_bounds = array<i64: 128, 16>}, {pipeline_mode = #tpu.pipeline_mode<synchronous>, transform_indices = @transform_1, window_bounds = array<i64: 1, 16>}, {pipeline_mode = #tpu.pipeline_mode<synchronous>, transform_indices = @transform_2, window_bounds = array<i64: 1, 16>}]} {
    %c0_i32 = arith.constant 0 : i32
    %0 = arith.cmpi eq, %arg0, %c0_i32 : i32
    %1 = arith.extui %0 : i1 to i32
    %c0_i32_0 = arith.constant 0 : i32
    %2 = arith.cmpi ne, %1, %c0_i32_0 : i32
    scf.if %2 {
      %cst_11 = arith.constant 0.000000e+00 : f32
      %15 = vector.broadcast %cst_11 : f32 to vector<1x16xf32>
      %c0_12 = arith.constant 0 : index
      %c0_13 = arith.constant 0 : index
      %16 = vector.load %arg2[%c0_12, %c0_13] : memref<1x16xf32, #tpu.memory_space<vmem>>, vector<1x16xf32>
      tpu.vector_store %arg2[%c0_12, %c0_13], %15 {strides = array<i32>} : memref<1x16xf32, #tpu.memory_space<vmem>>, vector<1x16xf32>,
      %cst_14 = arith.constant 0.000000e+00 : f32
      %17 = vector.broadcast %cst_14 : f32 to vector<1x16xf32>
      %c0_15 = arith.constant 0 : index
      %c0_16 = arith.constant 0 : index
      %18 = vector.load %arg3[%c0_15, %c0_16] : memref<1x16xf32, #tpu.memory_space<vmem>>, vector<1x16xf32>
      tpu.vector_store %arg3[%c0_15, %c0_16], %17 {strides = array<i32>} : memref<1x16xf32, #tpu.memory_space<vmem>>, vector<1x16xf32>,
    } else {
    }
    %c0 = arith.constant 0 : index
    %c0_1 = arith.constant 0 : index
    %3 = vector.load %arg1[%c0, %c0_1] : memref<128x16xf32, #tpu.memory_space<vmem>>, vector<128x16xf32>
    %c0_2 = arith.constant 0 : index
    %c0_3 = arith.constant 0 : index
    %4 = vector.load %arg2[%c0_2, %c0_3] : memref<1x16xf32, #tpu.memory_space<vmem>>, vector<1x16xf32>
    %cst = arith.constant dense<0.000000e+00> : vector<16xf32>
    %5 = vector.multi_reduction <add>, %3, %cst [0] : vector<128x16xf32> to vector<16xf32>
    %6 = vector.shape_cast %5 : vector<16xf32> to vector<1x16xf32>
    %7 = arith.addf %4, %6 : vector<1x16xf32>
    %c0_4 = arith.constant 0 : index
    %c0_5 = arith.constant 0 : index
    %8 = vector.load %arg2[%c0_4, %c0_5] : memref<1x16xf32, #tpu.memory_space<vmem>>, vector<1x16xf32>
    tpu.vector_store %arg2[%c0_4, %c0_5], %7 {strides = array<i32>} : memref<1x16xf32, #tpu.memory_space<vmem>>, vector<1x16xf32>,
    %c0_6 = arith.constant 0 : index
    %c0_7 = arith.constant 0 : index
    %9 = vector.load %arg3[%c0_6, %c0_7] : memref<1x16xf32, #tpu.memory_space<vmem>>, vector<1x16xf32>
    %10 = arith.mulf %3, %3 : vector<128x16xf32>
    %cst_8 = arith.constant dense<0.000000e+00> : vector<16xf32>
    %11 = vector.multi_reduction <add>, %10, %cst_8 [0] : vector<128x16xf32> to vector<16xf32>
    %12 = vector.shape_cast %11 : vector<16xf32> to vector<1x16xf32>
    %13 = arith.addf %9, %12 : vector<1x16xf32>
    %c0_9 = arith.constant 0 : index
    %c0_10 = arith.constant 0 : index
    %14 = vector.load %arg3[%c0_9, %c0_10] : memref<1x16xf32, #tpu.memory_space<vmem>>, vector<1x16xf32>
    tpu.vector_store %arg3[%c0_9, %c0_10], %13 {strides = array<i32>} : memref<1x16xf32, #tpu.memory_space<vmem>>, vector<1x16xf32>,
    return
  }
  func.func @transform_0(%arg0: i32) -> (i32, i32) {
    %c0_i32 = arith.constant 0 : i32
    %c0_i32_0 = arith.constant 0 : i32
    return %arg0, %c0_i32 : i32, i32
  }
  func.func @transform_1(%arg0: i32) -> (i32, i32) {
    %c0_i32 = arith.constant 0 : i32
    %c0_i32_0 = arith.constant 0 : i32
    %c0_i32_1 = arith.constant 0 : i32
    return %c0_i32, %c0_i32_0 : i32, i32
  }
  func.func @transform_2(%arg0: i32) -> (i32, i32) {
    %c0_i32 = arith.constant 0 : i32
    %c0_i32_0 = arith.constant 0 : i32
    %c0_i32_1 = arith.constant 0 : i32
    return %c0_i32, %c0_i32_0 : i32, i32
  }
}

module attributes {stable_mosaic.version = 11 : i64} {
  func.func @_scale_shift_kernel(%arg0: i32, %arg1: memref<128x16xf32, #tpu.memory_space<vmem>>, %arg2: memref<1x16xf32, #tpu.memory_space<vmem>>, %arg3: memref<1x16xf32, #tpu.memory_space<vmem>>, %arg4: memref<128x16xf32, #tpu.memory_space<vmem>>) attributes {dimension_semantics = [#tpu.dimension_semantics<parallel>], iteration_bounds = array<i64: 1>, scalar_prefetch = 0 : i64, scratch_operands = 0 : i64, tpu.core_type = #tpu.core_type<tc>, window_params = [{transform_indices = @transform_0, window_bounds = array<i64: 128, 16>}, {pipeline_mode = #tpu.pipeline_mode<synchronous>, transform_indices = @transform_1, window_bounds = array<i64: 1, 16>}, {pipeline_mode = #tpu.pipeline_mode<synchronous>, transform_indices = @transform_2, window_bounds = array<i64: 1, 16>}, {transform_indices = @transform_3, window_bounds = array<i64: 128, 16>}]} {
    %c0 = arith.constant 0 : index
    %c0_0 = arith.constant 0 : index
    %0 = vector.load %arg1[%c0, %c0_0] : memref<128x16xf32, #tpu.memory_space<vmem>>, vector<128x16xf32>
    %c0_1 = arith.constant 0 : index
    %c0_2 = arith.constant 0 : index
    %1 = vector.load %arg2[%c0_1, %c0_2] : memref<1x16xf32, #tpu.memory_space<vmem>>, vector<1x16xf32>
    %2 = vector.broadcast %1 : vector<1x16xf32> to vector<128x16xf32>
    %3 = arith.mulf %0, %2 : vector<128x16xf32>
    %c0_3 = arith.constant 0 : index
    %c0_4 = arith.constant 0 : index
    %4 = vector.load %arg3[%c0_3, %c0_4] : memref<1x16xf32, #tpu.memory_space<vmem>>, vector<1x16xf32>
    %5 = vector.broadcast %4 : vector<1x16xf32> to vector<128x16xf32>
    %6 = arith.addf %3, %5 : vector<128x16xf32>
    %c0_5 = arith.constant 0 : index
    %c0_6 = arith.constant 0 : index
    %7 = vector.load %arg4[%c0_5, %c0_6] : memref<128x16xf32, #tpu.memory_space<vmem>>, vector<128x16xf32>
    tpu.vector_store %arg4[%c0_5, %c0_6], %6 {strides = array<i32>} : memref<128x16xf32, #tpu.memory_space<vmem>>, vector<128x16xf32>,
    return
  }
  func.func @transform_0(%arg0: i32) -> (i32, i32) {
    %c0_i32 = arith.constant 0 : i32
    %c0_i32_0 = arith.constant 0 : i32
    return %arg0, %c0_i32 : i32, i32
  }
  func.func @transform_1(%arg0: i32) -> (i32, i32) {
    %c0_i32 = arith.constant 0 : i32
    %c0_i32_0 = arith.constant 0 : i32
    %c0_i32_1 = arith.constant 0 : i32
    return %c0_i32, %c0_i32_0 : i32, i32
  }
  func.func @transform_2(%arg0: i32) -> (i32, i32) {
    %c0_i32 = arith.constant 0 : i32
    %c0_i32_0 = arith.constant 0 : i32
    %c0_i32_1 = arith.constant 0 : i32
    return %c0_i32, %c0_i32_0 : i32, i32
  }
  func.func @transform_3(%arg0: i32) -> (i32, i32) {
    %c0_i32 = arith.constant 0 : i32
    %c0_i32_0 = arith.constant 0 : i32
    return %arg0, %c0_i32 : i32, i32
  }
}

module attributes {stable_mosaic.version = 11 : i64} {
  func.func @_gemm_kernel(%arg0: i32, %arg1: i32, %arg2: i32, %arg3: memref<128x384xbf16, #tpu.memory_space<vmem>>, %arg4: memref<384x128xbf16, #tpu.memory_space<vmem>>, %arg5: memref<1x128xf32, #tpu.memory_space<vmem>>, %arg6: memref<128x128xf32, #tpu.memory_space<vmem>>, %arg7: memref<128x128xf32, #tpu.memory_space<vmem>>) attributes {dimension_semantics = [#tpu.dimension_semantics<parallel>, #tpu.dimension_semantics<parallel>, #tpu.dimension_semantics<arbitrary>], iteration_bounds = array<i64: 1, 1, 1>, scalar_prefetch = 0 : i64, scratch_operands = 1 : i64, tpu.core_type = #tpu.core_type<tc>, window_params = [{transform_indices = @transform_0, window_bounds = array<i64: 128, 384>}, {transform_indices = @transform_1, window_bounds = array<i64: 384, 128>}, {transform_indices = @transform_2, window_bounds = array<i64: 1, 128>}, {transform_indices = @transform_3, window_bounds = array<i64: 128, 128>}]} {
    %c0_i32 = arith.constant 0 : i32
    %0 = arith.cmpi eq, %arg2, %c0_i32 : i32
    %1 = arith.extui %0 : i1 to i32
    %c0_i32_0 = arith.constant 0 : i32
    %2 = arith.cmpi ne, %1, %c0_i32_0 : i32
    scf.if %2 {
      %cst_11 = arith.constant 0.000000e+00 : f32
      %14 = vector.broadcast %cst_11 : f32 to vector<128x128xf32>
      %c0_12 = arith.constant 0 : index
      %c0_13 = arith.constant 0 : index
      %15 = vector.load %arg7[%c0_12, %c0_13] : memref<128x128xf32, #tpu.memory_space<vmem>>, vector<128x128xf32>
      tpu.vector_store %arg7[%c0_12, %c0_13], %14 {strides = array<i32>} : memref<128x128xf32, #tpu.memory_space<vmem>>, vector<128x128xf32>,
    } else {
    }
    %c0 = arith.constant 0 : index
    %c0_1 = arith.constant 0 : index
    %3 = vector.load %arg3[%c0, %c0_1] : memref<128x384xbf16, #tpu.memory_space<vmem>>, vector<128x384xbf16>
    %cst = arith.constant 0.000000e+00 : bf16
    %4 = vector.broadcast %cst : bf16 to vector<128x384xbf16>
    %5 = arith.maximumf %3, %4 : vector<128x384xbf16>
    %c0_2 = arith.constant 0 : index
    %c0_3 = arith.constant 0 : index
    %6 = vector.load %arg7[%c0_2, %c0_3] : memref<128x128xf32, #tpu.memory_space<vmem>>, vector<128x128xf32>
    %c0_4 = arith.constant 0 : index
    %c0_5 = arith.constant 0 : index
    %7 = vector.load %arg4[%c0_4, %c0_5] : memref<384x128xbf16, #tpu.memory_space<vmem>>, vector<384x128xbf16>
    %cst_6 = arith.constant dense<0.000000e+00> : vector<128x128xf32>
    %8 = tpu.matmul %5, %7, %cst_6 {dimension_numbers = #tpu.dot_dimension_numbers<[1], [0], [0], [1], [0, 0, 1, 1], [], []>} : vector<128x384xbf16>, vector<384x128xbf16>, vector<128x128xf32> -> vector<128x128xf32>
    %9 = arith.addf %6, %8 : vector<128x128xf32>
    %c0_7 = arith.constant 0 : index
    %c0_8 = arith.constant 0 : index
    %10 = vector.load %arg7[%c0_7, %c0_8] : memref<128x128xf32, #tpu.memory_space<vmem>>, vector<128x128xf32>
    tpu.vector_store %arg7[%c0_7, %c0_8], %9 {strides = array<i32>} : memref<128x128xf32, #tpu.memory_space<vmem>>, vector<128x128xf32>,
    %c0_i32_9 = arith.constant 0 : i32
    %11 = arith.cmpi eq, %arg2, %c0_i32_9 : i32
    %12 = arith.extui %11 : i1 to i32
    %c0_i32_10 = arith.constant 0 : i32
    %13 = arith.cmpi ne, %12, %c0_i32_10 : i32
    scf.if %13 {
      %c0_11 = arith.constant 0 : index
      %c0_12 = arith.constant 0 : index
      %14 = vector.load %arg7[%c0_11, %c0_12] : memref<128x128xf32, #tpu.memory_space<vmem>>, vector<128x128xf32>
      %c0_13 = arith.constant 0 : index
      %c0_14 = arith.constant 0 : index
      %15 = vector.load %arg5[%c0_13, %c0_14] : memref<1x128xf32, #tpu.memory_space<vmem>>, vector<1x128xf32>
      %16 = vector.broadcast %15 : vector<1x128xf32> to vector<128x128xf32>
      %17 = arith.addf %14, %16 : vector<128x128xf32>
      %18 = math.tanh %17 : vector<128x128xf32>
      %c0_15 = arith.constant 0 : index
      %c0_16 = arith.constant 0 : index
      %19 = vector.load %arg6[%c0_15, %c0_16] : memref<128x128xf32, #tpu.memory_space<vmem>>, vector<128x128xf32>
      tpu.vector_store %arg6[%c0_15, %c0_16], %18 {strides = array<i32>} : memref<128x128xf32, #tpu.memory_space<vmem>>, vector<128x128xf32>,
    } else {
    }
    return
  }
  func.func @transform_0(%arg0: i32, %arg1: i32, %arg2: i32) -> (i32, i32) {
    %c0_i32 = arith.constant 0 : i32
    return %arg0, %arg2 : i32, i32
  }
  func.func @transform_1(%arg0: i32, %arg1: i32, %arg2: i32) -> (i32, i32) {
    %c0_i32 = arith.constant 0 : i32
    return %arg2, %arg1 : i32, i32
  }
  func.func @transform_2(%arg0: i32, %arg1: i32, %arg2: i32) -> (i32, i32) {
    %c0_i32 = arith.constant 0 : i32
    %c0_i32_0 = arith.constant 0 : i32
    return %c0_i32, %arg1 : i32, i32
  }
  func.func @transform_3(%arg0: i32, %arg1: i32, %arg2: i32) -> (i32, i32) {
    %c0_i32 = arith.constant 0 : i32
    return %arg0, %arg1 : i32, i32
  }
}

</mosaic_0001>

<bundles_post_ra>
// kernel: unet_forward.12
= control target key start
LH: loop header
LB: loop body
LE: loop exit
PB: predicated region body
PF: predicated region fallthrough
CT: control target
= control target key end

     0   :  { %s542_s1 = inlined_call_operand.vmem [shape: bf16[128,128], index: 1, kind: input, shape index: {}]   ;;  %s543_s2 = inlined_call_operand.vmem [shape: f32[1,128], index: 2, kind: input, shape index: {}]   ;;  %s544_s0 = inlined_call_operand.vmem [shape: bf16[128,128], index: 0, kind: input, shape index: {}]   ;;  %s545_s3 = inlined_call_operand.vmem [shape: f32[128,128], index: 3, kind: output, shape index: {}]  }
   0x1   :  { %v397_v0 = vld [vmem:[%s542_s1 + $0x38] sm:$0xff]  ;;  %v396_v1 = vld [vmem:[%s542_s1 + $0x30] sm:$0xff]  ;;  %v395_v2 = vld [vmem:[%s542_s1 + $0x28] sm:$0xff] }
   0x2   :  { %178 = vmatpush.bf16.msra.mxu0 %v397_v0  ;;  %398 = vmatpush.bf16.msra.mxu1 %v397_v0  ;;  %v394_v3 = vld [vmem:[%s542_s1 + $0x20] sm:$0xff]  ;;  %v393_v4 = vld [vmem:[%s542_s1 + $0x18] sm:$0xff]  ;;  %v392_v5 = vld [vmem:[%s542_s1 + $0x10] sm:$0xff] }
   0x3   :  { %399 = vmatpush.bf16.msra.mxu2 %v397_v0  ;;  %400 = vmatpush.bf16.msra.mxu3 %v397_v0  ;;  %v391_v6 = vld [vmem:[%s542_s1 + $0x8] sm:$0xff]  ;;  %v390_v7 = vld [vmem:[%s542_s1] sm:$0xff]  ;;  %v384_v9 = vld [vmem:[%s544_s0 + $0x10] sm:$0xff] }
   0x4   :  { %v382_v8 = vld [vmem:[%s544_s0] sm:$0xff]  ;;  %v388_v11 = vld [vmem:[%s544_s0 + $0x30] sm:$0xff]  ;;  %v383_v12 = vld [vmem:[%s544_s0 + $0x8] sm:$0xff] }
   0x5   :  { %v386_v10 = vld [vmem:[%s544_s0 + $0x20] sm:$0xff]  ;;  %v385_v13 = vld [vmem:[%s544_s0 + $0x18] sm:$0xff]  ;;  %v387_v14 = vld [vmem:[%s544_s0 + $0x28] sm:$0xff] }
   0x6   :  { %179 = vmatpush.bf16.msra.mxu0 %v396_v1  ;;  %401 = vmatpush.bf16.msra.mxu1 %v396_v1  ;;  %v389_v15 = vld [vmem:[%s544_s0 + $0x38] sm:$0xff]  ;;  %v422_v16 = vld [vmem:[%s543_s2] ss:$0 sm:$0xff] }
   0x7   :  { %402 = vmatpush.bf16.msra.mxu2 %v396_v1  ;;  %403 = vmatpush.bf16.msra.mxu3 %v396_v1 }
   0xa   :  { %180 = vmatpush.bf16.msra.mxu0 %v395_v2  ;;  %404 = vmatpush.bf16.msra.mxu1 %v395_v2 }
   0xb   :  { %405 = vmatpush.bf16.msra.mxu2 %v395_v2  ;;  %406 = vmatpush.bf16.msra.mxu3 %v395_v2 }
   0xe   :  { %181 = vmatpush.bf16.msra.mxu0 %v394_v3  ;;  %407 = vmatpush.bf16.msra.mxu1 %v394_v3 }
   0xf   :  { %408 = vmatpush.bf16.msra.mxu2 %v394_v3  ;;  %409 = vmatpush.bf16.msra.mxu3 %v394_v3 }
  0x12   :  { %182 = vmatpush.bf16.msra.mxu0 %v393_v4  ;;  %410 = vmatpush.bf16.msra.mxu1 %v393_v4 }
  0x13   :  { %411 = vmatpush.bf16.msra.mxu2 %v393_v4  ;;  %412 = vmatpush.bf16.msra.mxu3 %v393_v4 }
  0x16   :  { %183 = vmatpush.bf16.msra.mxu0 %v392_v5  ;;  %413 = vmatpush.bf16.msra.mxu1 %v392_v5 }
  0x17   :  { %414 = vmatpush.bf16.msra.mxu2 %v392_v5  ;;  %415 = vmatpush.bf16.msra.mxu3 %v392_v5 }
  0x1a   :  { %184 = vmatpush.bf16.msra.mxu0 %v391_v6  ;;  %416 = vmatpush.bf16.msra.mxu1 %v391_v6 }
  0x1b   :  { %417 = vmatpush.bf16.msra.mxu2 %v391_v6  ;;  %418 = vmatpush.bf16.msra.mxu3 %v391_v6 }
  0x1e   :  { %185 = vmatpush.bf16.msra.mxu0 %v390_v7  ;;  %419 = vmatpush.bf16.msra.mxu1 %v390_v7 }
  0x1f   :  { %420 = vmatpush.bf16.msra.mxu2 %v390_v7  ;;  %421 = vmatpush.bf16.msra.mxu3 %v390_v7 }
  0x21   :  { %186 = vmatmul.bf16.vlgmr.msra.gmra.mxu0 %v382_v8  ;;  %196 = vmatmul.bf16.vlgmr.msra.gmra.mxu1 %v384_v9 }
  0x22   :  { %206 = vmatmul.bf16.vlgmr.msra.gmra.mxu2 %v386_v10  ;;  %216 = vmatmul.bf16.vlgmr.msra.gmra.mxu3 %v388_v11 }
  0x31   :  { %191 = vmatmul.bf16.gmra.mxu0 %v383_v12  ;;  %201 = vmatmul.bf16.gmra.mxu1 %v385_v13 }
  0x32   :  { %211 = vmatmul.bf16.gmra.mxu2 %v387_v14  ;;  %221 = vmatmul.bf16.gmra.mxu3 %v389_v15 }
  0x9e   :  { %v187_v17 = vpop.f32.mrf.mxu0  ;;  %v197_v18 = vpop.f32.mrf.mxu1 }
  0x9f   :  { %v282_v19 = vadd.f32 %v422_v16, %v187_v17  ;;  %v286_v20 = vadd.f32 %v422_v16, %v197_v18 }
  0xa1   :  { %298 = vst [vmem:[%s545_s3] sm:$0xff] %v282_v19 }
  0xa2   :  { %302 = vst [vmem:[%s545_s3 + $0x20] sm:$0xff] %v286_v20 }
  0xa5   :  { %v207_v21 = vpop.f32.mrf.mxu2  ;;  %v217_v22 = vpop.f32.mrf.mxu3 }
  0xa6   :  { %v290_v23 = vadd.f32 %v422_v16, %v207_v21  ;;  %v294_v24 = vadd.f32 %v422_v16, %v217_v22  ;;  %v189_v25 = vpop.f32.mrf.mxu0  ;;  %v199_v26 = vpop.f32.mrf.mxu1 }
  0xa7   :  { %v283_v27 = vadd.f32 %v422_v16, %v189_v25  ;;  %v287_v28 = vadd.f32 %v422_v16, %v199_v26 }
  0xa8   :  { %306 = vst [vmem:[%s545_s3 + $0x40] sm:$0xff] %v290_v23 }
  0xa9   :  { %310 = vst [vmem:[%s545_s3 + $0x60] sm:$0xff] %v294_v24 }
  0xaa   :  { %299 = vst [vmem:[%s545_s3 + $0x8] sm:$0xff] %v283_v27 }
  0xab   :  { %303 = vst [vmem:[%s545_s3 + $0x28] sm:$0xff] %v287_v28 }
  0xad   :  { %v209_v29 = vpop.f32.mrf.mxu2  ;;  %v219_v30 = vpop.f32.mrf.mxu3 }
  0xae   :  { %v291_v31 = vadd.f32 %v422_v16, %v209_v29  ;;  %v295_v32 = vadd.f32 %v422_v16, %v219_v30  ;;  %v192_v33 = vpop.f32.mrf.mxu0  ;;  %v202_v34 = vpop.f32.mrf.mxu1 }
  0xaf   :  { %v284_v35 = vadd.f32 %v422_v16, %v192_v33  ;;  %v288_v36 = vadd.f32 %v422_v16, %v202_v34 }
  0xb0   :  { %307 = vst [vmem:[%s545_s3 + $0x48] sm:$0xff] %v291_v31 }
  0xb1   :  { %311 = vst [vmem:[%s545_s3 + $0x68] sm:$0xff] %v295_v32 }
  0xb2   :  { %300 = vst [vmem:[%s545_s3 + $0x10] sm:$0xff] %v284_v35 }
  0xb3   :  { %304 = vst [vmem:[%s545_s3 + $0x30] sm:$0xff] %v288_v36 }
  0xb5   :  { %v212_v37 = vpop.f32.mrf.mxu2  ;;  %v222_v38 = vpop.f32.mrf.mxu3 }
  0xb6   :  { %v292_v39 = vadd.f32 %v422_v16, %v212_v37  ;;  %v296_v40 = vadd.f32 %v422_v16, %v222_v38  ;;  %v194_v41 = vpop.f32.mrf.mxu0  ;;  %v204_v42 = vpop.f32.mrf.mxu1 }
  0xb7   :  { %v285_v43 = vadd.f32 %v422_v16, %v194_v41  ;;  %v289_v44 = vadd.f32 %v422_v16, %v204_v42 }
  0xb8   :  { %308 = vst [vmem:[%s545_s3 + $0x50] sm:$0xff] %v292_v39 }
  0xb9   :  { %312 = vst [vmem:[%s545_s3 + $0x70] sm:$0xff] %v296_v40 }
  0xba   :  { %301 = vst [vmem:[%s545_s3 + $0x18] sm:$0xff] %v285_v43 }
  0xbb   :  { %305 = vst [vmem:[%s545_s3 + $0x38] sm:$0xff] %v289_v44 }
  0xbd   :  { %v214_v45 = vpop.f32.mrf.mxu2  ;;  %v224_v46 = vpop.f32.mrf.mxu3 }
  0xbe   :  { %v293_v47 = vadd.f32 %v422_v16, %v214_v45  ;;  %v297_v48 = vadd.f32 %v422_v16, %v224_v46 }
  0xc0   :  { %309 = vst [vmem:[%s545_s3 + $0x58] sm:$0xff] %v293_v47 }
  0xc1   :  { %313 = vst [vmem:[%s545_s3 + $0x78] sm:$0xff] %v297_v48 }

// kernel: unet_forward.14
= control target key start
LH: loop header
LB: loop body
LE: loop exit
PB: predicated region body
PF: predicated region fallthrough
CT: control target
= control target key end

     0   :  { %vm14_vm0 = vcmask 253952   ;;  %vm22_vm1 = vcmask 261120   ;;  %v68_v0 = vmov 0.0   ;;  %s126_s0 = inlined_call_operand.vmem [shape: f32[32,32], index: 0, kind: input, shape index: {}]   ;;  %s127_s1 = inlined_call_operand.vmem [shape: f32[1,32], index: 1, kind: output, shape index: {0}]   ;;  %s128_s2 = inlined_call_operand.vmem [shape: f32[1,32], index: 2, kind: output, shape index: {1}]  }
   0x1   :  { %15 = vst.msk [vmem:[%s127_s1] sm:$0x1] %vm14_vm0, %v68_v0  ;;  %v17_v1 = vld [vmem:[%s126_s0] sm:$0xff]  ;;  %v18_v2 = vld [vmem:[%s126_s0 + $0x8] sm:$0xff]  ;;  %v19_v3 = vld [vmem:[%s126_s0 + $0x10] sm:$0xff] }
   0x2   :  { %v20_v4 = vld [vmem:[%s126_s0 + $0x18] sm:$0xff]  ;;  %v23_v5 = vsel %vm22_vm1, %v17_v1, 0.0  ;;  %v24_v6 = vsel %vm22_vm1, %v18_v2, 0.0  ;;  %v26_v7 = vsel %vm22_vm1, %v19_v3, 0.0  ;;  %16 = vst.msk [vmem:[%s128_s2] sm:$0x1] %vm14_vm0, %v68_v0  ;;  %v40_v8 = vmul.f32 %v17_v1, %v17_v1 }
   0x3   :  { %v25_v9 = vadd.f32 %v24_v6, %v23_v5  ;;  %v41_v10 = vmul.f32 %v18_v2, %v18_v2  ;;  %v42_v11 = vmul.f32 %v19_v3, %v19_v3  ;;  %v28_v12 = vsel %vm22_vm1, %v20_v4, 0.0 }
   0x4   :  { %v43_v13 = vmul.f32 %v20_v4, %v20_v4  ;;  %v44_v14 = vsel %vm22_vm1, %v40_v8, 0.0 }
   0x5   :  { %v27_v15 = vadd.f32 %v26_v7, %v25_v9  ;;  %v45_v16 = vsel %vm22_vm1, %v41_v10, 0.0  ;;  %v47_v17 = vsel %vm22_vm1, %v42_v11, 0.0 }
   0x6   :  { %v46_v18 = vadd.f32 %v45_v16, %v44_v14  ;;  %v49_v20 = vsel %vm22_vm1, %v43_v13, 0.0 }
   0x7   :  { %v29_v19 = vadd.f32 %v28_v12, %v27_v15 }
   0x8   :  { %v48_v21 = vadd.f32 %v47_v17, %v46_v18  ;;  %v21_v31 = vld [vmem:[%s127_s1] sm:$0x1] }
   0x9   :  { %v30_v22 = vrot.slane %v29_v19, 4  ;;  %v39_v36 = vld [vmem:[%s128_s2] sm:$0x1] }
   0xa   :  { %v50_v23 = vadd.f32 %v49_v20, %v48_v21 }
   0xb   :  { %v31_v24 = vadd.f32 %v30_v22, %v29_v19 }
   0xc   :  { %v51_v25 = vrot.slane %v50_v23, 4 }
   0xd   :  { %v32_v26 = vrot.slane %v31_v24, 2 }
   0xe   :  { %v52_v27 = vadd.f32 %v51_v25, %v50_v23 }
   0xf   :  { %v33_v28 = vadd.f32 %v32_v26, %v31_v24 }
  0x10   :  { %v53_v29 = vrot.slane %v52_v27, 2 }
  0x11   :  { %v34_v30 = vrot.slane %v33_v28, 1 }
  0x12   :  { %v54_v32 = vadd.f32 %v53_v29, %v52_v27 }
  0x13   :  { %v35_v33 = vadd.f32 %v34_v30, %v33_v28 }
  0x14   :  { %v55_v34 = vrot.slane %v54_v32, 1 }
  0x15   :  { %v36_v35 = vadd.f32 %v35_v33, %v21_v31 }
  0x16   :  { %v56_v37 = vadd.f32 %v55_v34, %v54_v32 }
  0x17   :  { %38 = vst.msk [vmem:[%s127_s1] sm:$0x1] %vm14_vm0, %v36_v35 }
  0x18   :  { %v57_v38 = vadd.f32 %v56_v37, %v39_v36 }
  0x1a   :  { %58 = vst.msk [vmem:[%s128_s2] sm:$0x1] %vm14_vm0, %v57_v38 }

// kernel: unet_forward.15
= control target key start
LH: loop header
LB: loop body
LE: loop exit
PB: predicated region body
PF: predicated region fallthrough
CT: control target
= control target key end

     0   :  { %vm34_vm0 = vcmask 261120   ;;  %s95_s0 = inlined_call_operand.vmem [shape: f32[32,32], index: 0, kind: input, shape index: {}]   ;;  %s96_s1 = inlined_call_operand.vmem [shape: f32[1,32], index: 1, kind: input, shape index: {}]   ;;  %s97_s2 = inlined_call_operand.vmem [shape: f32[1,32], index: 2, kind: input, shape index: {}]   ;;  %s98_s3 = inlined_call_operand.vmem [shape: f32[32,32], index: 3, kind: output, shape index: {}]  }
   0x1   :  { %v14_v0 = vld [vmem:[%s95_s0] sm:$0xff]  ;;  %v15_v3 = vld [vmem:[%s95_s0 + $0x8] sm:$0xff]  ;;  %v16_v6 = vld [vmem:[%s95_s0 + $0x10] sm:$0xff] }
   0x2   :  { %v43_v1 = vld [vmem:[%s96_s1] ss:$0 sm:$0xff]  ;;  %v17_v7 = vld [vmem:[%s95_s0 + $0x18] sm:$0xff] }
   0x3   :  { %v44_v2 = vld [vmem:[%s97_s2] ss:$0 sm:$0xff]  ;;  %v22_v4 = vmul.f32 %v43_v1, %v14_v0  ;;  %v23_v5 = vmul.f32 %v43_v1, %v15_v3  ;;  %v24_v8 = vmul.f32 %v43_v1, %v16_v6  ;;  %v25_v9 = vmul.f32 %v43_v1, %v17_v7 }
   0x5   :  { %v30_v10 = vadd.f32 %v44_v2, %v22_v4  ;;  %v31_v11 = vadd.f32 %v44_v2, %v23_v5  ;;  %v32_v12 = vadd.f32 %v44_v2, %v24_v8  ;;  %v33_v13 = vadd.f32 %v44_v2, %v25_v9 }
   0x7   :  { %35 = vst.msk [vmem:[%s98_s3] sm:$0xff] %vm34_vm0, %v30_v10 }
   0x8   :  { %36 = vst.msk [vmem:[%s98_s3 + $0x8] sm:$0xff] %vm34_vm0, %v31_v11 }
   0x9   :  { %37 = vst.msk [vmem:[%s98_s3 + $0x10] sm:$0xff] %vm34_vm0, %v32_v12 }
   0xa   :  { %38 = vst.msk [vmem:[%s98_s3 + $0x18] sm:$0xff] %vm34_vm0, %v33_v13 }

// kernel: unet_forward.13
= control target key start
LH: loop header
LB: loop body
LE: loop exit
PB: predicated region body
PF: predicated region fallthrough
CT: control target
= control target key end

     0   :  { %s1091_s1 = inlined_call_operand.vmem [shape: bf16[256,128], index: 1, kind: input, shape index: {}]   ;;  %s1092_s0 = inlined_call_operand.vmem [shape: bf16[128,256], index: 0, kind: input, shape index: {}]   ;;  %s1093_s2 = inlined_call_operand.vmem [shape: f32[1,128], index: 2, kind: input, shape index: {}]   ;;  %s1094_s3 = inlined_call_operand.vmem [shape: f32[128,128], index: 3, kind: output, shape index: {}]  }
   0x1   :  { %v678_v0 = vld [vmem:[%s1091_s1 + $0x38] sm:$0xff]  ;;  %v677_v2 = vld [vmem:[%s1091_s1 + $0x30] sm:$0xff]  ;;  %v34_v4 = vld [vmem:[%s1092_s0] sm:$0xff] }
   0x2   :  { %v686_v1 = vld [vmem:[%s1091_s1 + $0x78] sm:$0xff]  ;;  %418 = vmatpush.bf16.msra.mxu0 %v678_v0  ;;  %687 = vmatpush.bf16.msra.mxu2 %v678_v0  ;;  %v685_v3 = vld [vmem:[%s1091_s1 + $0x70] sm:$0xff]  ;;  %v35_v5 = vld [vmem:[%s1092_s0 + $0x8] sm:$0xff]  ;;  %v50_v10 = vunpack.c.l.bf16 %v34_v4  ;;  %v51_v11 = vunpack.c.h.bf16 %v34_v4 }
   0x3   :  { %467 = vmatpush.bf16.msra.mxu1 %v686_v1  ;;  %695 = vmatpush.bf16.msra.mxu3 %v686_v1  ;;  %v676_v6 = vld [vmem:[%s1091_s1 + $0x28] sm:$0xff]  ;;  %v42_v8 = vld [vmem:[%s1092_s0 + $0x40] sm:$0xff]  ;;  %v52_v12 = vunpack.c.l.bf16 %v35_v5  ;;  %v53_v13 = vunpack.c.h.bf16 %v35_v5  ;;  %v674_v28 = vld [vmem:[%s1091_s1 + $0x18] sm:$0xff] }
   0x4   :  { %v684_v7 = vld [vmem:[%s1091_s1 + $0x68] sm:$0xff]  ;;  %v675_v14 = vld [vmem:[%s1091_s1 + $0x20] sm:$0xff]  ;;  %v66_v15 = vunpack.c.l.bf16 %v42_v8  ;;  %v67_v16 = vunpack.c.h.bf16 %v42_v8  ;;  %v114_v20 = vmul.f32 0.20019531, %v50_v10  ;;  %v115_v21 = vmul.f32 0.20019531, %v51_v11  ;;  %v682_v33 = vld [vmem:[%s1091_s1 + $0x58] sm:$0xff] }
   0x5   :  { %v43_v9 = vld [vmem:[%s1092_s0 + $0x48] sm:$0xff]  ;;  %v683_v19 = vld [vmem:[%s1091_s1 + $0x60] sm:$0xff]  ;;  %v116_v22 = vmul.f32 0.20019531, %v52_v12  ;;  %v117_v23 = vmul.f32 0.20019531, %v53_v13  ;;  %vm760_vm0 = vcmp.gt.f32.partialorder %v50_v10, 0.0  ;;  %vm764_vm1 = vcmp.gt.f32.partialorder %v51_v11, 0.0 }
   0x6   :  { %419 = vmatpush.bf16.msra.mxu0 %v677_v2  ;;  %688 = vmatpush.bf16.msra.mxu2 %v677_v2  ;;  %v68_v17 = vunpack.c.l.bf16 %v43_v9  ;;  %v69_v18 = vunpack.c.h.bf16 %v43_v9  ;;  %vm768_vm2 = vcmp.gt.f32.partialorder %v52_v12, 0.0  ;;  %vm772_vm3 = vcmp.gt.f32.partialorder %v53_v13, 0.0  ;;  %vm162_vm6 = vmpackc.low %vm764_vm1, %vm760_vm0  ;;  %v673_v40 = vld [vmem:[%s1091_s1 + $0x10] sm:$0xff]  ;;  %v828_v47 = vld [vmem:[%s1092_s0 + $0x18] sm:$0xff] }
   0x7   :  { %468 = vmatpush.bf16.msra.mxu1 %v685_v3  ;;  %696 = vmatpush.bf16.msra.mxu3 %v685_v3  ;;  %v130_v29 = vmul.f32 0.20019531, %v66_v15  ;;  %v131_v30 = vmul.f32 0.20019531, %v67_v16  ;;  %vm782_vm4 = vcmp.gt.f32.partialorder %v66_v15, 0.0  ;;  %vm786_vm5 = vcmp.gt.f32.partialorder %v67_v16, 0.0  ;;  %vm163_vm9 = vmpackc.low %vm772_vm3, %vm768_vm2  ;;  %v681_v43 = vld [vmem:[%s1091_s1 + $0x50] sm:$0xff]  ;;  %v672_v48 = vld [vmem:[%s1091_s1 + $0x8] sm:$0xff] }
   0x8   :  { %v132_v31 = vmul.f32 0.20019531, %v68_v17  ;;  %v133_v32 = vmul.f32 0.20019531, %v69_v18  ;;  %v146_v36 = vpack.c.bf16 %v115_v21, %v114_v20  ;;  %v147_v37 = vpack.c.bf16 %v117_v23, %v116_v22  ;;  %vm170_vm10 = vmpackc.low %vm786_vm5, %vm782_vm4  ;;  %v823_v46 = vld [vmem:[%s1092_s0 + $0x10] sm:$0xff]  ;;  %v680_v51 = vld [vmem:[%s1091_s1 + $0x48] sm:$0xff] }
   0x9   :  { %vm794_vm7 = vcmp.gt.f32.partialorder %v68_v17, 0.0  ;;  %vm798_vm8 = vcmp.gt.f32.partialorder %v69_v18, 0.0  ;;  %v154_v41 = vpack.c.bf16 %v131_v30, %v130_v29  ;;  %v44_v56 = vld [vmem:[%s1092_s0 + $0x50] sm:$0xff]  ;;  %v45_v57 = vld [vmem:[%s1092_s0 + $0x58] sm:$0xff]  ;;  %v54_v58 = vunpack.c.l.bf16 %v823_v46  ;;  %v671_v2 = vld [vmem:[%s1091_s1] sm:$0xff] }
   0xa   :  { %420 = vmatpush.bf16.msra.mxu0 %v676_v6  ;;  %689 = vmatpush.bf16.msra.mxu2 %v676_v6  ;;  %v155_v42 = vpack.c.bf16 %v133_v32, %v132_v31  ;;  %vm171_vm11 = vmpackc.low %vm798_vm8, %vm794_vm7  ;;  %v178_v44 = vsel %vm162_vm6, %v34_v4, %v146_v36  ;;  %v179_v45 = vsel %vm163_vm9, %v35_v5, %v147_v37  ;;  %v55_v59 = vunpack.c.h.bf16 %v823_v46  ;;  %v38_v34 = vld [vmem:[%s1092_s0 + $0x20] sm:$0xff]  ;;  %v39_v35 = vld [vmem:[%s1092_s0 + $0x28] sm:$0xff] }
   0xb   :  { %469 = vmatpush.bf16.msra.mxu1 %v684_v7  ;;  %697 = vmatpush.bf16.msra.mxu3 %v684_v7  ;;  %v186_v49 = vsel %vm170_vm10, %v42_v8, %v154_v41  ;;  %v258_v52 = vunpack.c.l.b16 %v178_v44  ;;  %v260_v53 = vunpack.c.l.b16 %v179_v45  ;;  %v259_v54 = vunpack.c.h.b16 %v178_v44  ;;  %v679_v7 = vld [vmem:[%s1091_s1 + $0x40] sm:$0xff]  ;;  %v40_v18 = vld [vmem:[%s1092_s0 + $0x30] sm:$0xff] }
   0xc   :  { %v187_v50 = vsel %vm171_vm11, %v43_v9, %v155_v42  ;;  %v261_v55 = vunpack.c.h.b16 %v179_v45  ;;  %v56_v60 = vunpack.c.l.bf16 %v828_v47  ;;  %v57_v61 = vunpack.c.h.bf16 %v828_v47  ;;  %v46_v42 = vld [vmem:[%s1092_s0 + $0x60] sm:$0xff] }
   0xd   :  { %v274_v62 = vunpack.c.l.b16 %v186_v49  ;;  %v276_v63 = vunpack.c.l.b16 %v187_v50  ;;  %v275_v0 = vunpack.c.h.b16 %v186_v49  ;;  %v277_v1 = vunpack.c.h.b16 %v187_v50 }
   0xe   :  { %421 = vmatpush.bf16.msra.mxu0 %v675_v14  ;;  %690 = vmatpush.bf16.msra.mxu2 %v675_v14  ;;  %v70_v3 = vunpack.c.l.bf16 %v44_v56  ;;  %v71_v4 = vunpack.c.h.bf16 %v44_v56  ;;  %v72_v5 = vunpack.c.l.bf16 %v45_v57  ;;  %v73_v6 = vunpack.c.h.bf16 %v45_v57 }
   0xf   :  { %470 = vmatpush.bf16.msra.mxu1 %v683_v19  ;;  %698 = vmatpush.bf16.msra.mxu3 %v683_v19  ;;  %v290_v8 = vpack.c.b16 %v260_v53, %v258_v52  ;;  %v291_v9 = vpack.c.b16 %v261_v55, %v259_v54  ;;  %vm852_vm12 = vcmp.gt.f32.partialorder %v54_v58, 0.0  ;;  %vm856_vm13 = vcmp.gt.f32.partialorder %v55_v59, 0.0  ;;  %v41_v19 = vld [vmem:[%s1092_s0 + $0x38] sm:$0xff] }
  0x10   :  { %v118_v12 = vmul.f32 0.20019531, %v54_v58  ;;  %v119_v13 = vmul.f32 0.20019531, %v55_v59  ;;  %v120_v14 = vmul.f32 0.20019531, %v56_v60  ;;  %v121_v15 = vmul.f32 0.20019531, %v57_v61  ;;  %vm164_vm2 = vmpackc.low %vm856_vm13, %vm852_vm12 }
  0x11   :  { %v298_v16 = vpack.c.b16 %v276_v63, %v274_v62  ;;  %v299_v17 = vpack.c.b16 %v277_v1, %v275_v0  ;;  %vm860_vm14 = vcmp.gt.f32.partialorder %v56_v60, 0.0  ;;  %vm864_vm15 = vcmp.gt.f32.partialorder %v57_v61, 0.0 }
  0x12   :  { %422 = vmatpush.bf16.msra.mxu0 %v674_v28  ;;  %691 = vmatpush.bf16.msra.mxu2 %v674_v28  ;;  %v134_v20 = vmul.f32 0.20019531, %v70_v3  ;;  %v135_v21 = vmul.f32 0.20019531, %v71_v4  ;;  %v136_v22 = vmul.f32 0.20019531, %v72_v5  ;;  %v137_v23 = vmul.f32 0.20019531, %v73_v6  ;;  %vm165_vm5 = vmpackc.low %vm864_vm15, %vm860_vm14 }
  0x13   :  { %471 = vmatpush.bf16.msra.mxu1 %v682_v33  ;;  %699 = vmatpush.bf16.msra.mxu3 %v682_v33  ;;  %vm868_vm0 = vcmp.gt.f32.partialorder %v70_v3, 0.0  ;;  %vm872_vm1 = vcmp.gt.f32.partialorder %v71_v4, 0.0  ;;  %v148_v26 = vpack.c.bf16 %v119_v13, %v118_v12  ;;  %v149_v27 = vpack.c.bf16 %v121_v15, %v120_v14 }
  0x14   :  { %vm880_vm3 = vcmp.gt.f32.partialorder %v72_v5, 0.0  ;;  %vm884_vm4 = vcmp.gt.f32.partialorder %v73_v6, 0.0  ;;  %v156_v30 = vpack.c.bf16 %v135_v21, %v134_v20  ;;  %v157_v31 = vpack.c.bf16 %v137_v23, %v136_v22  ;;  %vm172_vm6 = vmpackc.low %vm872_vm1, %vm868_vm0 }
  0x15   :  { %vm173_vm7 = vmpackc.low %vm884_vm4, %vm880_vm3  ;;  %v180_v32 = vsel %vm164_vm2, %v823_v46, %v148_v26  ;;  %v181_v33 = vsel %vm165_vm5, %v828_v47, %v149_v27  ;;  %v58_v44 = vunpack.c.l.bf16 %v38_v34  ;;  %v59_v45 = vunpack.c.h.bf16 %v38_v34  ;;  %v48_v26 = vld [vmem:[%s1092_s0 + $0x70] sm:$0xff]  ;;  %v49_v27 = vld [vmem:[%s1092_s0 + $0x78] sm:$0xff] }
  0x16   :  { %423 = vmatpush.bf16.msra.mxu0 %v673_v40  ;;  %692 = vmatpush.bf16.msra.mxu2 %v673_v40  ;;  %v188_v36 = vsel %vm172_vm6, %v44_v56, %v156_v30  ;;  %v189_v37 = vsel %vm173_vm7, %v45_v57, %v157_v31  ;;  %v262_v38 = vunpack.c.l.b16 %v180_v32  ;;  %v264_v39 = vunpack.c.l.b16 %v181_v33 }
  0x17   :  { %472 = vmatpush.bf16.msra.mxu1 %v681_v43  ;;  %700 = vmatpush.bf16.msra.mxu3 %v681_v43  ;;  %v263_v40 = vunpack.c.h.b16 %v180_v32  ;;  %v265_v41 = vunpack.c.h.b16 %v181_v33  ;;  %v47_v43 = vld [vmem:[%s1092_s0 + $0x68] sm:$0xff]  ;;  %v60_v46 = vunpack.c.l.bf16 %v39_v35  ;;  %v61_v47 = vunpack.c.h.bf16 %v39_v35 }
  0x18   :  { %v280_v49 = vunpack.c.l.b16 %v189_v37  ;;  %v279_v50 = vunpack.c.h.b16 %v188_v36  ;;  %v74_v52 = vunpack.c.l.bf16 %v46_v42  ;;  %v75_v53 = vunpack.c.h.bf16 %v46_v42 }
  0x19   :  { %v76_v54 = vunpack.c.l.bf16 %v47_v43  ;;  %v77_v55 = vunpack.c.h.bf16 %v47_v43  ;;  %v292_v56 = vpack.c.b16 %v264_v39, %v262_v38  ;;  %v293_v57 = vpack.c.b16 %v265_v41, %v263_v40 }
  0x1a   :  { %424 = vmatpush.bf16.msra.mxu0 %v672_v48  ;;  %693 = vmatpush.bf16.msra.mxu2 %v672_v48  ;;  %v278_v48 = vunpack.c.l.b16 %v188_v36  ;;  %vm914_vm8 = vcmp.gt.f32.partialorder %v58_v44, 0.0  ;;  %vm918_vm9 = vcmp.gt.f32.partialorder %v59_v45, 0.0  ;;  %v122_v60 = vmul.f32 0.20019531, %v58_v44 }
  0x1b   :  { %473 = vmatpush.bf16.msra.mxu1 %v680_v51  ;;  %701 = vmatpush.bf16.msra.mxu3 %v680_v51  ;;  %v281_v51 = vunpack.c.h.b16 %v189_v37  ;;  %v123_v61 = vmul.f32 0.20019531, %v59_v45  ;;  %v124_v62 = vmul.f32 0.20019531, %v60_v46  ;;  %v125_v63 = vmul.f32 0.20019531, %v61_v47  ;;  %vm166_vm14 = vmpackc.low %vm918_vm9, %vm914_vm8 }
  0x1c   :  { %v300_v0 = vpack.c.b16 %v280_v49, %v278_v48  ;;  %vm922_vm10 = vcmp.gt.f32.partialorder %v60_v46, 0.0  ;;  %vm926_vm11 = vcmp.gt.f32.partialorder %v61_v47, 0.0  ;;  %v138_v4 = vmul.f32 0.20019531, %v74_v52 }
  0x1d   :  { %v301_v1 = vpack.c.b16 %v281_v51, %v279_v50  ;;  %v139_v5 = vmul.f32 0.20019531, %v75_v53  ;;  %v140_v6 = vmul.f32 0.20019531, %v76_v54  ;;  %vm930_vm12 = vcmp.gt.f32.partialorder %v74_v52, 0.0  ;;  %vm167_vm1 = vmpackc.low %vm926_vm11, %vm922_vm10 }
  0x1e   :  { %425 = vmatpush.bf16.msra.mxu0 %v671_v2  ;;  %694 = vmatpush.bf16.msra.mxu2 %v671_v2  ;;  %vm934_vm13 = vcmp.gt.f32.partialorder %v75_v53, 0.0  ;;  %v150_v10 = vpack.c.bf16 %v123_v61, %v122_v60  ;;  %v151_v11 = vpack.c.bf16 %v125_v63, %v124_v62  ;;  %vm942_vm15 = vcmp.gt.f32.partialorder %v76_v54, 0.0 }
  0x1f   :  { %474 = vmatpush.bf16.msra.mxu1 %v679_v7  ;;  %702 = vmatpush.bf16.msra.mxu3 %v679_v7  ;;  %v141_v7 = vmul.f32 0.20019531, %v77_v55  ;;  %vm946_vm0 = vcmp.gt.f32.partialorder %v77_v55, 0.0  ;;  %v158_v14 = vpack.c.bf16 %v139_v5, %v138_v4  ;;  %vm174_vm2 = vmpackc.low %vm934_vm13, %vm930_vm12  ;;  %v62_v28 = vunpack.c.l.bf16 %v40_v18 }
  0x20   :  { %vm175_vm3 = vmpackc.low %vm946_vm0, %vm942_vm15  ;;  %v63_v29 = vunpack.c.h.bf16 %v40_v18  ;;  %v64_v30 = vunpack.c.l.bf16 %v41_v19  ;;  %v65_v31 = vunpack.c.h.bf16 %v41_v19  ;;  %v78_v36 = vunpack.c.l.bf16 %v48_v26 }
  0x21   :  { %426 = vmatmul.bf16.vlgmr.msra.gmra.mxu0 %v290_v8  ;;  %446 = vmatmul.bf16.vlgmr.msra.gmra.mxu2 %v298_v16  ;;  %v159_v15 = vpack.c.bf16 %v141_v7, %v140_v6  ;;  %v182_v16 = vsel %vm166_vm14, %v38_v34, %v150_v10  ;;  %v190_v20 = vsel %vm174_vm2, %v46_v42, %v158_v14  ;;  %v79_v37 = vunpack.c.h.bf16 %v48_v26 }
  0x22   :  { %475 = vmatmul.bf16.vlgmr.msra.gmra.mxu1 %v291_v9  ;;  %495 = vmatmul.bf16.vlgmr.msra.gmra.mxu3 %v299_v17  ;;  %v183_v17 = vsel %vm167_vm1, %v39_v35, %v151_v11  ;;  %v266_v22 = vunpack.c.l.b16 %v182_v16  ;;  %v267_v24 = vunpack.c.h.b16 %v182_v16  ;;  %v282_v32 = vunpack.c.l.b16 %v190_v20 }
  0x23   :  { %v191_v21 = vsel %vm175_vm3, %v47_v43, %v159_v15  ;;  %v268_v23 = vunpack.c.l.b16 %v183_v17  ;;  %v269_v25 = vunpack.c.h.b16 %v183_v17  ;;  %v283_v34 = vunpack.c.h.b16 %v190_v20  ;;  %v1025_v17 = vld [vmem:[%s1093_s2] ss:$0 sm:$0xff] }
  0x24   :  { %v284_v33 = vunpack.c.l.b16 %v191_v21  ;;  %v285_v35 = vunpack.c.h.b16 %v191_v21  ;;  %v80_v38 = vunpack.c.l.bf16 %v49_v27  ;;  %v81_v39 = vunpack.c.h.bf16 %v49_v27 }
  0x25   :  { %v294_v40 = vpack.c.b16 %v268_v23, %v266_v22  ;;  %v295_v41 = vpack.c.b16 %v269_v25, %v267_v24  ;;  %vm974_vm4 = vcmp.gt.f32.partialorder %v62_v28, 0.0  ;;  %vm978_vm5 = vcmp.gt.f32.partialorder %v63_v29, 0.0 }
  0x26   :  { %vm982_vm6 = vcmp.gt.f32.partialorder %v64_v30, 0.0  ;;  %vm986_vm7 = vcmp.gt.f32.partialorder %v65_v31, 0.0  ;;  %v126_v46 = vmul.f32 0.20019531, %v62_v28  ;;  %v127_v47 = vmul.f32 0.20019531, %v63_v29  ;;  %vm168_vm10 = vmpackc.low %vm978_vm5, %vm974_vm4 }
  0x27   :  { %v302_v48 = vpack.c.b16 %v284_v33, %v282_v32  ;;  %v303_v49 = vpack.c.b16 %v285_v35, %v283_v34  ;;  %v128_v50 = vmul.f32 0.20019531, %v64_v30  ;;  %v129_v51 = vmul.f32 0.20019531, %v65_v31  ;;  %vm169_vm13 = vmpackc.low %vm986_vm7, %vm982_vm6 }
  0x28   :  { %v142_v52 = vmul.f32 0.20019531, %v78_v36  ;;  %v143_v53 = vmul.f32 0.20019531, %v79_v37  ;;  %v144_v54 = vmul.f32 0.20019531, %v80_v38  ;;  %v145_v55 = vmul.f32 0.20019531, %v81_v39 }
  0x29   :  { %vm990_vm8 = vcmp.gt.f32.partialorder %v78_v36, 0.0  ;;  %vm994_vm9 = vcmp.gt.f32.partialorder %v79_v37, 0.0  ;;  %vm1002_vm11 = vcmp.gt.f32.partialorder %v80_v38, 0.0  ;;  %vm1006_vm12 = vcmp.gt.f32.partialorder %v81_v39, 0.0 }
  0x2a   :  { %v152_v60 = vpack.c.bf16 %v127_v47, %v126_v46  ;;  %v153_v61 = vpack.c.bf16 %v129_v51, %v128_v50  ;;  %v160_v62 = vpack.c.bf16 %v143_v53, %v142_v52  ;;  %v161_v63 = vpack.c.bf16 %v145_v55, %v144_v54  ;;  %vm176_vm14 = vmpackc.low %vm994_vm9, %vm990_vm8 }
  0x2b   :  { %vm177_vm15 = vmpackc.low %vm1006_vm12, %vm1002_vm11 }
  0x2c   :  { %v192_v2 = vsel %vm176_vm14, %v48_v26, %v160_v62  ;;  %v193_v3 = vsel %vm177_vm15, %v49_v27, %v161_v63 }
  0x2d   :  { %v286_v6 = vunpack.c.l.b16 %v192_v2  ;;  %v288_v7 = vunpack.c.l.b16 %v193_v3  ;;  %v287_v10 = vunpack.c.h.b16 %v192_v2  ;;  %v289_v11 = vunpack.c.h.b16 %v193_v3 }
  0x2f   :  { %v304_v13 = vpack.c.b16 %v288_v7, %v286_v6  ;;  %v305_v15 = vpack.c.b16 %v289_v11, %v287_v10 }
  0x31   :  { %431 = vmatmul.bf16.gmra.mxu0 %v292_v56  ;;  %451 = vmatmul.bf16.gmra.mxu2 %v300_v0  ;;  %v184_v0 = vsel %vm168_vm10, %v40_v18, %v152_v60 }
  0x32   :  { %480 = vmatmul.bf16.gmra.mxu1 %v293_v57  ;;  %500 = vmatmul.bf16.gmra.mxu3 %v301_v1  ;;  %v185_v1 = vsel %vm169_vm13, %v41_v19, %v153_v61  ;;  %v270_v4 = vunpack.c.l.b16 %v184_v0  ;;  %v271_v8 = vunpack.c.h.b16 %v184_v0 }
  0x33   :  { %v272_v5 = vunpack.c.l.b16 %v185_v1  ;;  %v273_v9 = vunpack.c.h.b16 %v185_v1 }
  0x35   :  { %v296_v12 = vpack.c.b16 %v272_v5, %v270_v4  ;;  %v297_v14 = vpack.c.b16 %v273_v9, %v271_v8 }
  0x41   :  { %436 = vmatmul.bf16.gmra.mxu0 %v294_v40  ;;  %456 = vmatmul.bf16.gmra.mxu2 %v302_v48 }
  0x42   :  { %485 = vmatmul.bf16.gmra.mxu1 %v295_v41  ;;  %505 = vmatmul.bf16.gmra.mxu3 %v303_v49 }
  0x51   :  { %441 = vmatmul.bf16.gmra.mxu0 %v296_v12  ;;  %461 = vmatmul.bf16.gmra.mxu2 %v304_v13 }
  0x52   :  { %490 = vmatmul.bf16.gmra.mxu1 %v297_v14  ;;  %510 = vmatmul.bf16.gmra.mxu3 %v305_v15 }
  0x9e   :  { %v427_v16 = vpop.f32.mrf.mxu0 }
  0x9f   :  { %v476_v18 = vpop.f32.mrf.mxu1 }
  0xa0   :  { %v477_v19 = vadd.f32 %v476_v18, %v427_v16 }
  0xa2   :  { %v571_v20 = vadd.f32 %v1025_v17, %v477_v19 }
  0xa4   :  { %587 = vst [vmem:[%s1094_s3] sm:$0xff] %v571_v20  ;;  %v447_v21 = vpop.f32.mrf.mxu2 }
  0xa5   :  { %v496_v22 = vpop.f32.mrf.mxu3 }
  0xa6   :  { %v497_v23 = vadd.f32 %v496_v22, %v447_v21  ;;  %v429_v24 = vpop.f32.mrf.mxu0 }
  0xa7   :  { %v478_v25 = vpop.f32.mrf.mxu1 }
  0xa8   :  { %v579_v26 = vadd.f32 %v1025_v17, %v497_v23  ;;  %v479_v27 = vadd.f32 %v478_v25, %v429_v24 }
  0xaa   :  { %595 = vst [vmem:[%s1094_s3 + $0x40] sm:$0xff] %v579_v26  ;;  %v572_v28 = vadd.f32 %v1025_v17, %v479_v27 }
  0xac   :  { %588 = vst [vmem:[%s1094_s3 + $0x8] sm:$0xff] %v572_v28  ;;  %v449_v29 = vpop.f32.mrf.mxu2 }
  0xad   :  { %v498_v30 = vpop.f32.mrf.mxu3 }
  0xae   :  { %v499_v31 = vadd.f32 %v498_v30, %v449_v29  ;;  %v432_v32 = vpop.f32.mrf.mxu0 }
  0xaf   :  { %v481_v33 = vpop.f32.mrf.mxu1 }
  0xb0   :  { %v580_v34 = vadd.f32 %v1025_v17, %v499_v31  ;;  %v482_v35 = vadd.f32 %v481_v33, %v432_v32 }
  0xb2   :  { %596 = vst [vmem:[%s1094_s3 + $0x48] sm:$0xff] %v580_v34  ;;  %v573_v36 = vadd.f32 %v1025_v17, %v482_v35 }
  0xb4   :  { %589 = vst [vmem:[%s1094_s3 + $0x10] sm:$0xff] %v573_v36  ;;  %v452_v37 = vpop.f32.mrf.mxu2 }
  0xb5   :  { %v501_v38 = vpop.f32.mrf.mxu3 }
  0xb6   :  { %v502_v39 = vadd.f32 %v501_v38, %v452_v37  ;;  %v434_v40 = vpop.f32.mrf.mxu0 }
  0xb7   :  { %v483_v41 = vpop.f32.mrf.mxu1 }
  0xb8   :  { %v581_v42 = vadd.f32 %v1025_v17, %v502_v39  ;;  %v484_v43 = vadd.f32 %v483_v41, %v434_v40 }
  0xba   :  { %597 = vst [vmem:[%s1094_s3 + $0x50] sm:$0xff] %v581_v42  ;;  %v574_v44 = vadd.f32 %v1025_v17, %v484_v43 }
  0xbc   :  { %590 = vst [vmem:[%s1094_s3 + $0x18] sm:$0xff] %v574_v44  ;;  %v454_v45 = vpop.f32.mrf.mxu2 }
  0xbd   :  { %v503_v46 = vpop.f32.mrf.mxu3 }
  0xbe   :  { %v504_v47 = vadd.f32 %v503_v46, %v454_v45  ;;  %v437_v48 = vpop.f32.mrf.mxu0 }
  0xbf   :  { %v486_v49 = vpop.f32.mrf.mxu1 }
  0xc0   :  { %v582_v50 = vadd.f32 %v1025_v17, %v504_v47  ;;  %v487_v51 = vadd.f32 %v486_v49, %v437_v48 }
  0xc2   :  { %598 = vst [vmem:[%s1094_s3 + $0x58] sm:$0xff] %v582_v50  ;;  %v575_v52 = vadd.f32 %v1025_v17, %v487_v51 }
  0xc4   :  { %591 = vst [vmem:[%s1094_s3 + $0x20] sm:$0xff] %v575_v52  ;;  %v457_v53 = vpop.f32.mrf.mxu2 }
  0xc5   :  { %v506_v54 = vpop.f32.mrf.mxu3 }
  0xc6   :  { %v507_v55 = vadd.f32 %v506_v54, %v457_v53  ;;  %v439_v56 = vpop.f32.mrf.mxu0 }
  0xc7   :  { %v488_v57 = vpop.f32.mrf.mxu1 }
  0xc8   :  { %v583_v58 = vadd.f32 %v1025_v17, %v507_v55  ;;  %v489_v59 = vadd.f32 %v488_v57, %v439_v56 }
  0xca   :  { %599 = vst [vmem:[%s1094_s3 + $0x60] sm:$0xff] %v583_v58  ;;  %v576_v60 = vadd.f32 %v1025_v17, %v489_v59 }
  0xcc   :  { %592 = vst [vmem:[%s1094_s3 + $0x28] sm:$0xff] %v576_v60  ;;  %v459_v61 = vpop.f32.mrf.mxu2 }
  0xcd   :  { %v508_v62 = vpop.f32.mrf.mxu3 }
  0xce   :  { %v509_v63 = vadd.f32 %v508_v62, %v459_v61  ;;  %v442_v0 = vpop.f32.mrf.mxu0 }
  0xcf   :  { %v491_v1 = vpop.f32.mrf.mxu1 }
  0xd0   :  { %v584_v2 = vadd.f32 %v1025_v17, %v509_v63  ;;  %v492_v3 = vadd.f32 %v491_v1, %v442_v0 }
  0xd2   :  { %600 = vst [vmem:[%s1094_s3 + $0x68] sm:$0xff] %v584_v2  ;;  %v577_v4 = vadd.f32 %v1025_v17, %v492_v3 }
  0xd4   :  { %593 = vst [vmem:[%s1094_s3 + $0x30] sm:$0xff] %v577_v4  ;;  %v462_v5 = vpop.f32.mrf.mxu2 }
  0xd5   :  { %v511_v6 = vpop.f32.mrf.mxu3 }
  0xd6   :  { %v512_v7 = vadd.f32 %v511_v6, %v462_v5  ;;  %v444_v8 = vpop.f32.mrf.mxu0 }
  0xd7   :  { %v493_v9 = vpop.f32.mrf.mxu1 }
  0xd8   :  { %v585_v10 = vadd.f32 %v1025_v17, %v512_v7  ;;  %v494_v11 = vadd.f32 %v493_v9, %v444_v8 }
  0xda   :  { %601 = vst [vmem:[%s1094_s3 + $0x70] sm:$0xff] %v585_v10  ;;  %v578_v12 = vadd.f32 %v1025_v17, %v494_v11 }
  0xdc   :  { %594 = vst [vmem:[%s1094_s3 + $0x38] sm:$0xff] %v578_v12  ;;  %v464_v13 = vpop.f32.mrf.mxu2 }
  0xdd   :  { %v513_v14 = vpop.f32.mrf.mxu3 }
  0xde   :  { %v514_v15 = vadd.f32 %v513_v14, %v464_v13 }
  0xe0   :  { %v586_v16 = vadd.f32 %v1025_v17, %v514_v15 }
  0xe2   :  { %602 = vst [vmem:[%s1094_s3 + $0x78] sm:$0xff] %v586_v16 }

// kernel: unet_forward.16
= control target key start
LH: loop header
LB: loop body
LE: loop exit
PB: predicated region body
PF: predicated region fallthrough
CT: control target
= control target key end

     0   :  { %s1917_s1 = inlined_call_operand.vmem [shape: bf16[512,128], index: 1, kind: input, shape index: {}]   ;;  %s1918_s0 = inlined_call_operand.vmem [shape: bf16[128,512], index: 0, kind: input, shape index: {}]   ;;  %s1919_s2 = inlined_call_operand.vmem [shape: f32[1,128], index: 2, kind: input, shape index: {}]   ;;  %s1920_s3 = inlined_call_operand.vmem [shape: f32[128,128], index: 3, kind: output, shape index: {}]  }
   0x1   :  { %v1208_v0 = vld [vmem:[%s1917_s1 + $0x38] sm:$0xff]  ;;  %v1207_v4 = vld [vmem:[%s1917_s1 + $0x30] sm:$0xff]  ;;  %v1206_v8 = vld [vmem:[%s1917_s1 + $0x28] sm:$0xff] }
   0x2   :  { %v1216_v1 = vld [vmem:[%s1917_s1 + $0x78] sm:$0xff]  ;;  %786 = vmatpush.bf16.msra.mxu0 %v1208_v0  ;;  %v1215_v5 = vld [vmem:[%s1917_s1 + $0x70] sm:$0xff]  ;;  %v1214_v9 = vld [vmem:[%s1917_s1 + $0x68] sm:$0xff] }
   0x3   :  { %v1224_v2 = vld [vmem:[%s1917_s1 + $0xb8] sm:$0xff]  ;;  %835 = vmatpush.bf16.msra.mxu1 %v1216_v1  ;;  %v1223_v6 = vld [vmem:[%s1917_s1 + $0xb0] sm:$0xff]  ;;  %v1222_v10 = vld [vmem:[%s1917_s1 + $0xa8] sm:$0xff] }
   0x4   :  { %v1232_v3 = vld [vmem:[%s1917_s1 + $0xf8] sm:$0xff]  ;;  %884 = vmatpush.bf16.msra.mxu2 %v1224_v2  ;;  %v1231_v7 = vld [vmem:[%s1917_s1 + $0xf0] sm:$0xff]  ;;  %v1230_v11 = vld [vmem:[%s1917_s1 + $0xe8] sm:$0xff] }
   0x5   :  { %933 = vmatpush.bf16.msra.mxu3 %v1232_v3  ;;  %v1205_v12 = vld [vmem:[%s1917_s1 + $0x20] sm:$0xff]  ;;  %v36_v17 = vld [vmem:[%s1918_s0 + $0x10] sm:$0xff]  ;;  %v35_v20 = vld [vmem:[%s1918_s0 + $0x8] sm:$0xff] }
   0x6   :  { %787 = vmatpush.bf16.msra.mxu0 %v1207_v4  ;;  %v1213_v13 = vld [vmem:[%s1917_s1 + $0x60] sm:$0xff]  ;;  %v70_v21 = vunpack.c.l.bf16 %v36_v17  ;;  %v71_v22 = vunpack.c.h.bf16 %v36_v17  ;;  %v1314_v23 = vld [vmem:[%s1918_s0 + $0x18] sm:$0xff]  ;;  %v68_v24 = vunpack.c.l.bf16 %v35_v20  ;;  %v69_v25 = vunpack.c.h.bf16 %v35_v20  ;;  %v1203_v49 = vld [vmem:[%s1917_s1 + $0x10] sm:$0xff] }
   0x7   :  { %836 = vmatpush.bf16.msra.mxu1 %v1215_v5  ;;  %v1221_v14 = vld [vmem:[%s1917_s1 + $0xa0] sm:$0xff]  ;;  %v1204_v30 = vld [vmem:[%s1917_s1 + $0x18] sm:$0xff]  ;;  %v72_v39 = vunpack.c.l.bf16 %v1314_v23  ;;  %v73_v40 = vunpack.c.h.bf16 %v1314_v23  ;;  %v1211_v50 = vld [vmem:[%s1917_s1 + $0x50] sm:$0xff] }
   0x8   :  { %885 = vmatpush.bf16.msra.mxu2 %v1223_v6  ;;  %v34_v15 = vld [vmem:[%s1918_s0] sm:$0xff]  ;;  %v1212_v31 = vld [vmem:[%s1917_s1 + $0x58] sm:$0xff]  ;;  %vm1330_vm2 = vcmp.gt.f32.partialorder %v70_v21, 0.0  ;;  %vm1334_vm3 = vcmp.gt.f32.partialorder %v71_v22, 0.0  ;;  %v198_v34 = vmul.f32 0.20019531, %v70_v21  ;;  %v199_v35 = vmul.f32 0.20019531, %v71_v22 }
   0x9   :  { %934 = vmatpush.bf16.msra.mxu3 %v1231_v7  ;;  %v1229_v16 = vld [vmem:[%s1917_s1 + $0xe0] sm:$0xff]  ;;  %v66_v18 = vunpack.c.l.bf16 %v34_v15  ;;  %v67_v19 = vunpack.c.h.bf16 %v34_v15  ;;  %v1220_v36 = vld [vmem:[%s1917_s1 + $0x98] sm:$0xff]  ;;  %vm1346_vm4 = vcmp.gt.f32.partialorder %v68_v24, 0.0  ;;  %vm1354_vm6 = vcmp.gt.f32.partialorder %v69_v25, 0.0  ;;  %vm292_vm7 = vmpackc.low %vm1334_vm3, %vm1330_vm2 }
   0xa   :  { %788 = vmatpush.bf16.msra.mxu0 %v1206_v8  ;;  %v1228_v37 = vld [vmem:[%s1917_s1 + $0xd8] sm:$0xff]  ;;  %v260_v42 = vpack.c.bf16 %v199_v35, %v198_v34  ;;  %v196_v44 = vmul.f32 0.20019531, %v68_v24  ;;  %v197_v45 = vmul.f32 0.20019531, %v69_v25  ;;  %vm1362_vm8 = vcmp.gt.f32.partialorder %v72_v39, 0.0  ;;  %v1219_v52 = vld [vmem:[%s1917_s1 + $0x90] sm:$0xff]  ;;  %vm291_vm10 = vmpackc.low %vm1354_vm6, %vm1346_vm4 }
   0xb   :  { %837 = vmatpush.bf16.msra.mxu1 %v1214_v9  ;;  %vm1316_vm0 = vcmp.gt.f32.partialorder %v66_v18, 0.0  ;;  %vm1320_vm1 = vcmp.gt.f32.partialorder %v67_v19, 0.0  ;;  %v194_v28 = vmul.f32 0.20019531, %v66_v18  ;;  %v195_v29 = vmul.f32 0.20019531, %v67_v19  ;;  %v1227_v53 = vld [vmem:[%s1917_s1 + $0xd0] sm:$0xff]  ;;  %v1403_v58 = vld [vmem:[%s1918_s0 + $0x20] sm:$0xff] }
   0xc   :  { %886 = vmatpush.bf16.msra.mxu2 %v1222_v10  ;;  %vm290_vm5 = vmpackc.low %vm1320_vm1, %vm1316_vm0  ;;  %vm1366_vm9 = vcmp.gt.f32.partialorder %v73_v40, 0.0  ;;  %v200_v48 = vmul.f32 0.20019531, %v72_v39  ;;  %v201_v51 = vmul.f32 0.20019531, %v73_v40  ;;  %v259_v55 = vpack.c.bf16 %v197_v45, %v196_v44  ;;  %v1408_v59 = vld [vmem:[%s1918_s0 + $0x30] sm:$0xff]  ;;  %v1202_v60 = vld [vmem:[%s1917_s1 + $0x8] sm:$0xff] }
   0xd   :  { %935 = vmatpush.bf16.msra.mxu3 %v1230_v11  ;;  %v258_v38 = vpack.c.bf16 %v195_v29, %v194_v28  ;;  %v324_v56 = vsel %vm292_vm7, %v36_v17, %v260_v42  ;;  %vm293_vm11 = vmpackc.low %vm1366_vm9, %vm1362_vm8  ;;  %v1210_v61 = vld [vmem:[%s1917_s1 + $0x48] sm:$0xff]  ;;  %v74_v7 = vunpack.c.l.bf16 %v1403_v58  ;;  %v75_v8 = vunpack.c.h.bf16 %v1403_v58  ;;  %v41_v11 = vld [vmem:[%s1918_s0 + $0x38] sm:$0xff] }
   0xe   :  { %789 = vmatpush.bf16.msra.mxu0 %v1205_v12  ;;  %v261_v57 = vpack.c.bf16 %v201_v51, %v200_v48  ;;  %v323_v63 = vsel %vm291_vm10, %v35_v20, %v259_v55  ;;  %v1218_v0 = vld [vmem:[%s1917_s1 + $0x88] sm:$0xff]  ;;  %v470_v2 = vunpack.c.l.b16 %v324_v56  ;;  %v471_v4 = vunpack.c.h.b16 %v324_v56  ;;  %v1217_v20 = vld [vmem:[%s1917_s1 + $0x80] sm:$0xff]  ;;  %v49_v45 = vld [vmem:[%s1918_s0 + $0x78] sm:$0xff] }
   0xf   :  { %838 = vmatpush.bf16.msra.mxu1 %v1213_v13  ;;  %v322_v54 = vsel %vm290_vm5, %v34_v15, %v258_v38  ;;  %v1226_v1 = vld [vmem:[%s1917_s1 + $0xc8] sm:$0xff]  ;;  %v78_v9 = vunpack.c.l.bf16 %v1408_v59  ;;  %v79_v10 = vunpack.c.h.bf16 %v1408_v59  ;;  %v468_v12 = vunpack.c.l.b16 %v323_v63  ;;  %v1209_v15 = vld [vmem:[%s1917_s1 + $0x40] sm:$0xff] }
  0x10   :  { %887 = vmatpush.bf16.msra.mxu2 %v1221_v14  ;;  %v466_v62 = vunpack.c.l.b16 %v322_v54  ;;  %v467_v3 = vunpack.c.h.b16 %v322_v54  ;;  %v325_v5 = vsel %vm293_vm11, %v1314_v23, %v261_v57  ;;  %v39_v6 = vld [vmem:[%s1918_s0 + $0x28] sm:$0xff]  ;;  %v469_v13 = vunpack.c.h.b16 %v323_v63  ;;  %v1201_v14 = vld [vmem:[%s1917_s1] sm:$0xff] }
  0x11   :  { %936 = vmatpush.bf16.msra.mxu3 %v1229_v16  ;;  %v472_v16 = vunpack.c.l.b16 %v325_v5  ;;  %v473_v17 = vunpack.c.h.b16 %v325_v5  ;;  %v76_v18 = vunpack.c.l.bf16 %v39_v6  ;;  %v77_v19 = vunpack.c.h.bf16 %v39_v6  ;;  %v1225_v21 = vld [vmem:[%s1917_s1 + $0xc0] sm:$0xff]  ;;  %v43_v56 = vld [vmem:[%s1918_s0 + $0x48] sm:$0xff] }
  0x12   :  { %790 = vmatpush.bf16.msra.mxu0 %v1204_v30  ;;  %v530_v22 = vpack.c.b16 %v470_v2, %v466_v62  ;;  %v531_v23 = vpack.c.b16 %v471_v4, %v467_v3  ;;  %v80_v24 = vunpack.c.l.bf16 %v41_v11  ;;  %v81_v25 = vunpack.c.h.bf16 %v41_v11 }
  0x13   :  { %839 = vmatpush.bf16.msra.mxu1 %v1212_v31  ;;  %v202_v26 = vmul.f32 0.20019531, %v74_v7  ;;  %v203_v27 = vmul.f32 0.20019531, %v75_v8  ;;  %v206_v28 = vmul.f32 0.20019531, %v78_v9  ;;  %v207_v29 = vmul.f32 0.20019531, %v79_v10 }
  0x14   :  { %888 = vmatpush.bf16.msra.mxu2 %v1220_v36  ;;  %vm1450_vm12 = vcmp.gt.f32.partialorder %v74_v7, 0.0  ;;  %vm1454_vm13 = vcmp.gt.f32.partialorder %v75_v8, 0.0  ;;  %vm1458_vm14 = vcmp.gt.f32.partialorder %v78_v9, 0.0  ;;  %vm1462_vm15 = vcmp.gt.f32.partialorder %v79_v10, 0.0 }
  0x15   :  { %937 = vmatpush.bf16.msra.mxu3 %v1228_v37  ;;  %v532_v34 = vpack.c.b16 %v472_v16, %v468_v12  ;;  %v533_v35 = vpack.c.b16 %v473_v17, %v469_v13  ;;  %v204_v36 = vmul.f32 0.20019531, %v76_v18  ;;  %v205_v37 = vmul.f32 0.20019531, %v77_v19  ;;  %vm294_vm0 = vmpackc.low %vm1454_vm13, %vm1450_vm12 }
  0x16   :  { %791 = vmatpush.bf16.msra.mxu0 %v1203_v49  ;;  %v208_v38 = vmul.f32 0.20019531, %v80_v24  ;;  %v209_v39 = vmul.f32 0.20019531, %v81_v25  ;;  %v262_v40 = vpack.c.bf16 %v203_v27, %v202_v26  ;;  %v264_v41 = vpack.c.bf16 %v207_v29, %v206_v28  ;;  %vm296_vm3 = vmpackc.low %vm1462_vm15, %vm1458_vm14  ;;  %v51_v26 = vld [vmem:[%s1918_s0 + $0x88] sm:$0xff] }
  0x17   :  { %840 = vmatpush.bf16.msra.mxu1 %v1211_v50  ;;  %vm1470_vm1 = vcmp.gt.f32.partialorder %v76_v18, 0.0  ;;  %vm1474_vm2 = vcmp.gt.f32.partialorder %v77_v19, 0.0  ;;  %vm1482_vm4 = vcmp.gt.f32.partialorder %v80_v24, 0.0  ;;  %vm1486_vm5 = vcmp.gt.f32.partialorder %v81_v25, 0.0  ;;  %v42_v50 = vld [vmem:[%s1918_s0 + $0x40] sm:$0xff] }
  0x18   :  { %889 = vmatpush.bf16.msra.mxu2 %v1219_v52  ;;  %v263_v46 = vpack.c.bf16 %v205_v37, %v204_v36  ;;  %v265_v47 = vpack.c.bf16 %v209_v39, %v208_v38  ;;  %vm295_vm6 = vmpackc.low %vm1474_vm2, %vm1470_vm1  ;;  %v326_v48 = vsel %vm294_vm0, %v1403_v58, %v262_v40  ;;  %v328_v49 = vsel %vm296_vm3, %v1408_v59, %v264_v41  ;;  %v44_v52 = vld [vmem:[%s1918_s0 + $0x50] sm:$0xff]  ;;  %v47_v40 = vld [vmem:[%s1918_s0 + $0x68] sm:$0xff] }
  0x19   :  { %938 = vmatpush.bf16.msra.mxu3 %v1227_v53  ;;  %vm297_vm7 = vmpackc.low %vm1486_vm5, %vm1482_vm4  ;;  %v474_v53 = vunpack.c.l.b16 %v326_v48  ;;  %v478_v54 = vunpack.c.l.b16 %v328_v49  ;;  %v475_v57 = vunpack.c.h.b16 %v326_v48  ;;  %v479_v58 = vunpack.c.h.b16 %v328_v49  ;;  %v48_v36 = vld [vmem:[%s1918_s0 + $0x70] sm:$0xff] }
  0x1a   :  { %792 = vmatpush.bf16.msra.mxu0 %v1202_v60  ;;  %v327_v51 = vsel %vm295_vm6, %v39_v6, %v263_v46  ;;  %v329_v55 = vsel %vm297_vm7, %v41_v11, %v265_v47  ;;  %v82_v59 = vunpack.c.l.bf16 %v42_v50  ;;  %v83_v60 = vunpack.c.h.bf16 %v42_v50 }
  0x1b   :  { %841 = vmatpush.bf16.msra.mxu1 %v1210_v61  ;;  %v45_v61 = vld [vmem:[%s1918_s0 + $0x58] sm:$0xff]  ;;  %v476_v62 = vunpack.c.l.b16 %v327_v51  ;;  %v477_v63 = vunpack.c.h.b16 %v327_v51  ;;  %v480_v2 = vunpack.c.l.b16 %v329_v55  ;;  %v481_v3 = vunpack.c.h.b16 %v329_v55 }
  0x1c   :  { %890 = vmatpush.bf16.msra.mxu2 %v1218_v0  ;;  %v86_v0 = vunpack.c.l.bf16 %v44_v52  ;;  %v84_v4 = vunpack.c.l.bf16 %v43_v56  ;;  %v85_v5 = vunpack.c.h.bf16 %v43_v56  ;;  %v88_v6 = vunpack.c.l.bf16 %v45_v61 }
  0x1d   :  { %939 = vmatpush.bf16.msra.mxu3 %v1226_v1  ;;  %v87_v1 = vunpack.c.h.bf16 %v44_v52  ;;  %v89_v7 = vunpack.c.h.bf16 %v45_v61  ;;  %v534_v8 = vpack.c.b16 %v478_v54, %v474_v53  ;;  %v535_v9 = vpack.c.b16 %v479_v58, %v475_v57 }
  0x1e   :  { %793 = vmatpush.bf16.msra.mxu0 %v1201_v14  ;;  %v210_v10 = vmul.f32 0.20019531, %v82_v59  ;;  %v211_v11 = vmul.f32 0.20019531, %v83_v60  ;;  %vm1512_vm8 = vcmp.gt.f32.partialorder %v82_v59, 0.0  ;;  %vm1516_vm9 = vcmp.gt.f32.partialorder %v83_v60, 0.0 }
  0x1f   :  { %842 = vmatpush.bf16.msra.mxu1 %v1209_v15  ;;  %v214_v14 = vmul.f32 0.20019531, %v86_v0  ;;  %v215_v15 = vmul.f32 0.20019531, %v87_v1  ;;  %v536_v16 = vpack.c.b16 %v480_v2, %v476_v62  ;;  %v537_v17 = vpack.c.b16 %v481_v3, %v477_v63  ;;  %vm298_vm14 = vmpackc.low %vm1516_vm9, %vm1512_vm8 }
  0x20   :  { %891 = vmatpush.bf16.msra.mxu2 %v1217_v20  ;;  %v212_v18 = vmul.f32 0.20019531, %v84_v4  ;;  %v213_v19 = vmul.f32 0.20019531, %v85_v5  ;;  %vm1520_vm10 = vcmp.gt.f32.partialorder %v86_v0, 0.0  ;;  %vm1524_vm11 = vcmp.gt.f32.partialorder %v87_v1, 0.0 }
  0x21   :  { %940 = vmatpush.bf16.msra.mxu3 %v1225_v21  ;;  %794 = vmatmul.bf16.vlgmr.msra.gmra.mxu0 %v530_v22  ;;  %v216_v22 = vmul.f32 0.20019531, %v88_v6  ;;  %v266_v24 = vpack.c.bf16 %v211_v11, %v210_v10  ;;  %vm1528_vm12 = vcmp.gt.f32.partialorder %v84_v4, 0.0  ;;  %vm1532_vm13 = vcmp.gt.f32.partialorder %v85_v5, 0.0  ;;  %vm300_vm1 = vmpackc.low %vm1524_vm11, %vm1520_vm10 }
  0x22   :  { %843 = vmatmul.bf16.vlgmr.msra.gmra.mxu1 %v531_v23  ;;  %v217_v23 = vmul.f32 0.20019531, %v89_v7  ;;  %v268_v27 = vpack.c.bf16 %v215_v15, %v214_v14  ;;  %vm1540_vm15 = vcmp.gt.f32.partialorder %v88_v6, 0.0  ;;  %vm1544_vm0 = vcmp.gt.f32.partialorder %v89_v7, 0.0  ;;  %vm299_vm2 = vmpackc.low %vm1532_vm13, %vm1528_vm12  ;;  %v50_v15 = vld [vmem:[%s1918_s0 + $0x80] sm:$0xff] }
  0x23   :  { %892 = vmatmul.bf16.vlgmr.msra.gmra.mxu2 %v532_v34  ;;  %v267_v30 = vpack.c.bf16 %v213_v19, %v212_v18  ;;  %v330_v32 = vsel %vm298_vm14, %v42_v50, %v266_v24  ;;  %vm301_vm3 = vmpackc.low %vm1544_vm0, %vm1540_vm15  ;;  %v46_v34 = vld [vmem:[%s1918_s0 + $0x60] sm:$0xff]  ;;  %v94_v48 = vunpack.c.l.bf16 %v48_v36  ;;  %v95_v49 = vunpack.c.h.bf16 %v48_v36 }
  0x24   :  { %941 = vmatmul.bf16.vlgmr.msra.gmra.mxu3 %v533_v35  ;;  %v269_v31 = vpack.c.bf16 %v217_v23, %v216_v22  ;;  %v332_v33 = vsel %vm300_vm1, %v44_v52, %v268_v27  ;;  %v482_v37 = vunpack.c.l.b16 %v330_v32  ;;  %v483_v38 = vunpack.c.h.b16 %v330_v32 }
  0x25   :  { %v331_v35 = vsel %vm299_vm2, %v43_v56, %v267_v30  ;;  %v486_v41 = vunpack.c.l.b16 %v332_v33  ;;  %v487_v42 = vunpack.c.h.b16 %v332_v33  ;;  %v90_v43 = vunpack.c.l.bf16 %v46_v34 }
  0x26   :  { %v333_v39 = vsel %vm301_vm3, %v45_v61, %v269_v31  ;;  %v91_v44 = vunpack.c.h.bf16 %v46_v34  ;;  %v484_v46 = vunpack.c.l.b16 %v331_v35  ;;  %v485_v47 = vunpack.c.h.b16 %v331_v35  ;;  %v53_v31 = vld [vmem:[%s1918_s0 + $0x98] sm:$0xff] }
  0x27   :  { %v488_v50 = vunpack.c.l.b16 %v333_v39  ;;  %v489_v51 = vunpack.c.h.b16 %v333_v39  ;;  %v92_v52 = vunpack.c.l.bf16 %v47_v40  ;;  %v93_v53 = vunpack.c.h.bf16 %v47_v40 }
  0x28   :  { %v96_v54 = vunpack.c.l.bf16 %v49_v45  ;;  %v97_v55 = vunpack.c.h.bf16 %v49_v45  ;;  %v538_v56 = vpack.c.b16 %v486_v41, %v482_v37  ;;  %v539_v57 = vpack.c.b16 %v487_v42, %v483_v38 }
  0x29   :  { %vm1572_vm4 = vcmp.gt.f32.partialorder %v90_v43, 0.0  ;;  %vm1576_vm5 = vcmp.gt.f32.partialorder %v91_v44, 0.0  ;;  %v218_v60 = vmul.f32 0.20019531, %v90_v43  ;;  %v219_v61 = vmul.f32 0.20019531, %v91_v44 }
  0x2a   :  { %v222_v62 = vmul.f32 0.20019531, %v94_v48  ;;  %v223_v63 = vmul.f32 0.20019531, %v95_v49  ;;  %v540_v0 = vpack.c.b16 %v488_v50, %v484_v46  ;;  %v541_v1 = vpack.c.b16 %v489_v51, %v485_v47  ;;  %vm302_vm10 = vmpackc.low %vm1576_vm5, %vm1572_vm4 }
  0x2b   :  { %v220_v2 = vmul.f32 0.20019531, %v92_v52  ;;  %v221_v3 = vmul.f32 0.20019531, %v93_v53  ;;  %vm1580_vm6 = vcmp.gt.f32.partialorder %v94_v48, 0.0  ;;  %vm1584_vm7 = vcmp.gt.f32.partialorder %v95_v49, 0.0 }
  0x2c   :  { %v224_v6 = vmul.f32 0.20019531, %v96_v54  ;;  %v225_v7 = vmul.f32 0.20019531, %v97_v55  ;;  %vm1588_vm8 = vcmp.gt.f32.partialorder %v92_v52, 0.0  ;;  %vm1592_vm9 = vcmp.gt.f32.partialorder %v93_v53, 0.0  ;;  %vm304_vm13 = vmpackc.low %vm1584_vm7, %vm1580_vm6 }
  0x2d   :  { %v270_v10 = vpack.c.bf16 %v219_v61, %v218_v60  ;;  %v272_v11 = vpack.c.bf16 %v223_v63, %v222_v62  ;;  %vm1600_vm11 = vcmp.gt.f32.partialorder %v96_v54, 0.0  ;;  %vm1604_vm12 = vcmp.gt.f32.partialorder %v97_v55, 0.0  ;;  %vm303_vm14 = vmpackc.low %vm1592_vm9, %vm1588_vm8  ;;  %v54_v62 = vld [vmem:[%s1918_s0 + $0xa0] sm:$0xff]  ;;  %v56_v63 = vld [vmem:[%s1918_s0 + $0xb0] sm:$0xff] }
  0x2e   :  { %v271_v14 = vpack.c.bf16 %v221_v3, %v220_v2  ;;  %vm305_vm15 = vmpackc.low %vm1604_vm12, %vm1600_vm11  ;;  %v98_v20 = vunpack.c.l.bf16 %v50_v15  ;;  %v99_v21 = vunpack.c.h.bf16 %v50_v15  ;;  %v100_v38 = vunpack.c.l.bf16 %v51_v26 }
  0x2f   :  { %v334_v18 = vsel %vm302_vm10, %v46_v34, %v270_v10  ;;  %v336_v19 = vsel %vm304_vm13, %v48_v36, %v272_v11  ;;  %v101_v39 = vunpack.c.h.bf16 %v51_v26  ;;  %v104_v42 = vunpack.c.l.bf16 %v53_v31 }
  0x30   :  { %v335_v22 = vsel %vm303_vm14, %v47_v40, %v271_v14  ;;  %v490_v27 = vunpack.c.l.b16 %v334_v18  ;;  %v494_v28 = vunpack.c.l.b16 %v336_v19  ;;  %v491_v29 = vunpack.c.h.b16 %v334_v18  ;;  %v55_v18 = vld [vmem:[%s1918_s0 + $0xa8] sm:$0xff] }
  0x31   :  { %799 = vmatmul.bf16.gmra.mxu0 %v534_v8  ;;  %v495_v30 = vunpack.c.h.b16 %v336_v19  ;;  %v492_v32 = vunpack.c.l.b16 %v335_v22  ;;  %v493_v33 = vunpack.c.h.b16 %v335_v22  ;;  %v226_v34 = vmul.f32 0.20019531, %v98_v20  ;;  %v57_v19 = vld [vmem:[%s1918_s0 + $0xb8] sm:$0xff] }
  0x32   :  { %848 = vmatmul.bf16.gmra.mxu1 %v535_v9  ;;  %v227_v35 = vmul.f32 0.20019531, %v99_v21  ;;  %v105_v43 = vunpack.c.h.bf16 %v53_v31  ;;  %vm1632_vm0 = vcmp.gt.f32.partialorder %v98_v20, 0.0  ;;  %vm1636_vm1 = vcmp.gt.f32.partialorder %v99_v21, 0.0 }
  0x33   :  { %897 = vmatmul.bf16.gmra.mxu2 %v536_v16  ;;  %v273_v16 = vpack.c.bf16 %v225_v7, %v224_v6  ;;  %v542_v46 = vpack.c.b16 %v494_v28, %v490_v27  ;;  %v543_v47 = vpack.c.b16 %v495_v30, %v491_v29  ;;  %v228_v52 = vmul.f32 0.20019531, %v100_v38  ;;  %vm306_vm4 = vmpackc.low %vm1636_vm1, %vm1632_vm0 }
  0x34   :  { %946 = vmatmul.bf16.gmra.mxu3 %v537_v17  ;;  %v52_v17 = vld [vmem:[%s1918_s0 + $0x90] sm:$0xff]  ;;  %v229_v53 = vmul.f32 0.20019531, %v101_v39  ;;  %v274_v54 = vpack.c.bf16 %v227_v35, %v226_v34  ;;  %vm1656_vm6 = vcmp.gt.f32.partialorder %v100_v38, 0.0  ;;  %vm1660_vm7 = vcmp.gt.f32.partialorder %v101_v39, 0.0 }
  0x35   :  { %v337_v23 = vsel %vm305_vm15, %v49_v45, %v273_v16  ;;  %v102_v24 = vunpack.c.l.bf16 %v52_v17  ;;  %v103_v25 = vunpack.c.h.bf16 %v52_v17  ;;  %vm1664_vm8 = vcmp.gt.f32.partialorder %v104_v42, 0.0  ;;  %vm307_vm10 = vmpackc.low %vm1660_vm7, %vm1656_vm6 }
  0x36   :  { %v496_v36 = vunpack.c.l.b16 %v337_v23  ;;  %v497_v37 = vunpack.c.h.b16 %v337_v23  ;;  %vm1668_vm9 = vcmp.gt.f32.partialorder %v105_v43, 0.0  ;;  %v106_v4 = vunpack.c.l.bf16 %v54_v62 }
  0x37   :  { %v230_v40 = vmul.f32 0.20019531, %v102_v24  ;;  %v231_v41 = vmul.f32 0.20019531, %v103_v25  ;;  %vm1640_vm2 = vcmp.gt.f32.partialorder %v102_v24, 0.0  ;;  %vm1644_vm3 = vcmp.gt.f32.partialorder %v103_v25, 0.0  ;;  %vm309_vm11 = vmpackc.low %vm1668_vm9, %vm1664_vm8 }
  0x38   :  { %v544_v50 = vpack.c.b16 %v496_v36, %v492_v32  ;;  %v545_v51 = vpack.c.b16 %v497_v37, %v493_v33  ;;  %vm308_vm5 = vmpackc.low %vm1644_vm3, %vm1640_vm2  ;;  %v107_v5 = vunpack.c.h.bf16 %v54_v62  ;;  %v110_v6 = vunpack.c.l.bf16 %v56_v63 }
  0x39   :  { %v276_v55 = vpack.c.bf16 %v231_v41, %v230_v40  ;;  %v111_v7 = vunpack.c.h.bf16 %v56_v63  ;;  %v234_v14 = vmul.f32 0.20019531, %v106_v4  ;;  %vm1692_vm12 = vcmp.gt.f32.partialorder %v106_v4, 0.0 }
  0x3a   :  { %v238_v16 = vmul.f32 0.20019531, %v110_v6  ;;  %vm1696_vm13 = vcmp.gt.f32.partialorder %v107_v5, 0.0  ;;  %vm1700_vm14 = vcmp.gt.f32.partialorder %v110_v6, 0.0  ;;  %v108_v28 = vunpack.c.l.bf16 %v55_v18 }
  0x3b   :  { %v340_v2 = vsel %vm308_vm5, %v52_v17, %v276_v55  ;;  %v239_v17 = vmul.f32 0.20019531, %v111_v7  ;;  %vm1704_vm15 = vcmp.gt.f32.partialorder %v111_v7, 0.0  ;;  %v109_v29 = vunpack.c.h.bf16 %v55_v18  ;;  %vm310_vm0 = vmpackc.low %vm1696_vm13, %vm1692_vm12  ;;  %v60_v55 = vld [vmem:[%s1918_s0 + $0xd0] sm:$0xff] }
  0x3c   :  { %v502_v10 = vunpack.c.l.b16 %v340_v2  ;;  %v503_v12 = vunpack.c.h.b16 %v340_v2  ;;  %v112_v30 = vunpack.c.l.bf16 %v57_v19  ;;  %vm312_vm1 = vmpackc.low %vm1704_vm15, %vm1700_vm14  ;;  %v236_v38 = vmul.f32 0.20019531, %v108_v28 }
  0x3d   :  { %v280_v33 = vpack.c.bf16 %v239_v17, %v238_v16  ;;  %v237_v39 = vmul.f32 0.20019531, %v109_v29  ;;  %vm1716_vm2 = vcmp.gt.f32.partialorder %v108_v28, 0.0  ;;  %vm1720_vm3 = vcmp.gt.f32.partialorder %v109_v29, 0.0 }
  0x3e   :  { %v240_v40 = vmul.f32 0.20019531, %v112_v30  ;;  %vm311_vm6 = vmpackc.low %vm1720_vm3, %vm1716_vm2 }
  0x41   :  { %804 = vmatmul.bf16.gmra.mxu0 %v538_v56  ;;  %v232_v56 = vmul.f32 0.20019531, %v104_v42 }
  0x42   :  { %853 = vmatmul.bf16.gmra.mxu1 %v539_v57  ;;  %v233_v57 = vmul.f32 0.20019531, %v105_v43  ;;  %v344_v43 = vsel %vm312_vm1, %v56_v63, %v280_v33 }
  0x43   :  { %902 = vmatmul.bf16.gmra.mxu2 %v540_v0  ;;  %v275_v0 = vpack.c.bf16 %v229_v53, %v228_v52  ;;  %v510_v49 = vunpack.c.l.b16 %v344_v43  ;;  %v511_v53 = vunpack.c.h.b16 %v344_v43 }
  0x44   :  { %951 = vmatmul.bf16.gmra.mxu3 %v541_v1  ;;  %v338_v1 = vsel %vm306_vm4, %v50_v15, %v274_v54  ;;  %v277_v3 = vpack.c.bf16 %v233_v57, %v232_v56  ;;  %v235_v15 = vmul.f32 0.20019531, %v107_v5  ;;  %vm1724_vm4 = vcmp.gt.f32.partialorder %v112_v30, 0.0  ;;  %v58_v54 = vld [vmem:[%s1918_s0 + $0xc0] sm:$0xff]  ;;  %v59_v56 = vld [vmem:[%s1918_s0 + $0xc8] sm:$0xff]  ;;  %v61_v57 = vld [vmem:[%s1918_s0 + $0xd8] sm:$0xff] }
  0x45   :  { %v498_v8 = vunpack.c.l.b16 %v338_v1  ;;  %v339_v9 = vsel %vm307_vm10, %v51_v26, %v275_v0  ;;  %v499_v11 = vunpack.c.h.b16 %v338_v1  ;;  %v114_v61 = vunpack.c.l.bf16 %v58_v54 }
  0x46   :  { %v341_v13 = vsel %vm309_vm11, %v53_v31, %v277_v3  ;;  %v500_v20 = vunpack.c.l.b16 %v339_v9  ;;  %v501_v21 = vunpack.c.h.b16 %v339_v9  ;;  %v113_v31 = vunpack.c.h.bf16 %v57_v19 }
  0x47   :  { %v504_v24 = vunpack.c.l.b16 %v341_v13  ;;  %v505_v25 = vunpack.c.h.b16 %v341_v13  ;;  %v278_v32 = vpack.c.bf16 %v235_v15, %v234_v14  ;;  %v546_v34 = vpack.c.b16 %v502_v10, %v498_v8 }
  0x48   :  { %v547_v35 = vpack.c.b16 %v503_v12, %v499_v11  ;;  %v241_v41 = vmul.f32 0.20019531, %v113_v31  ;;  %vm1728_vm5 = vcmp.gt.f32.partialorder %v113_v31, 0.0  ;;  %v115_v63 = vunpack.c.h.bf16 %v58_v54 }
  0x49   :  { %v548_v36 = vpack.c.b16 %v504_v24, %v500_v20  ;;  %v549_v37 = vpack.c.b16 %v505_v25, %v501_v21  ;;  %v342_v42 = vsel %vm310_vm0, %v54_v62, %v278_v32  ;;  %vm313_vm7 = vmpackc.low %vm1728_vm5, %vm1724_vm4  ;;  %v118_v0 = vunpack.c.l.bf16 %v60_v55 }
  0x4a   :  { %v506_v48 = vunpack.c.l.b16 %v342_v42  ;;  %v507_v52 = vunpack.c.h.b16 %v342_v42  ;;  %v119_v1 = vunpack.c.h.bf16 %v60_v55  ;;  %v116_v2 = vunpack.c.l.bf16 %v59_v56 }
  0x4b   :  { %v117_v3 = vunpack.c.h.bf16 %v59_v56  ;;  %v120_v4 = vunpack.c.l.bf16 %v61_v57  ;;  %v121_v5 = vunpack.c.h.bf16 %v61_v57  ;;  %vm1752_vm8 = vcmp.gt.f32.partialorder %v114_v61, 0.0 }
  0x4c   :  { %v550_v58 = vpack.c.b16 %v510_v49, %v506_v48  ;;  %v551_v62 = vpack.c.b16 %v511_v53, %v507_v52  ;;  %vm1756_vm9 = vcmp.gt.f32.partialorder %v115_v63, 0.0  ;;  %vm1760_vm10 = vcmp.gt.f32.partialorder %v118_v0, 0.0 }
  0x4d   :  { %v242_v13 = vmul.f32 0.20019531, %v114_v61  ;;  %vm1764_vm11 = vcmp.gt.f32.partialorder %v119_v1, 0.0  ;;  %v243_v15 = vmul.f32 0.20019531, %v115_v63  ;;  %v246_v16 = vmul.f32 0.20019531, %v118_v0  ;;  %vm314_vm14 = vmpackc.low %vm1756_vm9, %vm1752_vm8 }
  0x4e   :  { %v247_v17 = vmul.f32 0.20019531, %v119_v1  ;;  %v248_v20 = vmul.f32 0.20019531, %v120_v4  ;;  %v249_v21 = vmul.f32 0.20019531, %v121_v5  ;;  %vm1768_vm12 = vcmp.gt.f32.partialorder %v116_v2, 0.0  ;;  %vm316_vm1 = vmpackc.low %vm1764_vm11, %vm1760_vm10 }
  0x4f   :  { %vm1772_vm13 = vcmp.gt.f32.partialorder %v117_v3, 0.0  ;;  %vm1780_vm15 = vcmp.gt.f32.partialorder %v120_v4, 0.0  ;;  %vm1784_vm0 = vcmp.gt.f32.partialorder %v121_v5, 0.0  ;;  %v282_v28 = vpack.c.bf16 %v243_v15, %v242_v13 }
  0x50   :  { %v284_v29 = vpack.c.bf16 %v247_v17, %v246_v16  ;;  %v285_v31 = vpack.c.bf16 %v249_v21, %v248_v20  ;;  %vm315_vm2 = vmpackc.low %vm1772_vm13, %vm1768_vm12 }
  0x51   :  { %809 = vmatmul.bf16.gmra.mxu0 %v542_v46  ;;  %vm317_vm3 = vmpackc.low %vm1784_vm0, %vm1780_vm15  ;;  %v346_v32 = vsel %vm314_vm14, %v58_v54, %v282_v28  ;;  %v63_v46 = vld [vmem:[%s1918_s0 + $0xe8] sm:$0xff] }
  0x52   :  { %858 = vmatmul.bf16.gmra.mxu1 %v543_v47  ;;  %v348_v33 = vsel %vm316_vm1, %v60_v55, %v284_v29  ;;  %v65_v47 = vld [vmem:[%s1918_s0 + $0xf8] sm:$0xff]  ;;  %v124_v52 = vunpack.c.l.bf16 %v63_v46  ;;  %v125_v53 = vunpack.c.h.bf16 %v63_v46 }
  0x53   :  { %907 = vmatmul.bf16.gmra.mxu2 %v544_v50  ;;  %v279_v50 = vpack.c.bf16 %v237_v39, %v236_v38  ;;  %v515_v38 = vunpack.c.h.b16 %v346_v32  ;;  %v519_v39 = vunpack.c.h.b16 %v348_v33  ;;  %v128_v54 = vunpack.c.l.bf16 %v65_v47 }
  0x54   :  { %956 = vmatmul.bf16.gmra.mxu3 %v545_v51  ;;  %v281_v51 = vpack.c.bf16 %v241_v41, %v240_v40  ;;  %v62_v40 = vld [vmem:[%s1918_s0 + $0xe0] sm:$0xff]  ;;  %v64_v41 = vld [vmem:[%s1918_s0 + $0xf0] sm:$0xff]  ;;  %v129_v55 = vunpack.c.h.bf16 %v65_v47  ;;  %v252_v4 = vmul.f32 0.20019531, %v124_v52  ;;  %v253_v5 = vmul.f32 0.20019531, %v125_v53 }
  0x55   :  { %v343_v59 = vsel %vm311_vm6, %v55_v18, %v279_v50  ;;  %v244_v18 = vmul.f32 0.20019531, %v116_v2  ;;  %v122_v48 = vunpack.c.l.bf16 %v62_v40  ;;  %v123_v49 = vunpack.c.h.bf16 %v62_v40 }
  0x56   :  { %v345_v60 = vsel %vm313_vm7, %v57_v19, %v281_v51  ;;  %v508_v6 = vunpack.c.l.b16 %v343_v59  ;;  %v509_v8 = vunpack.c.h.b16 %v343_v59  ;;  %v245_v19 = vmul.f32 0.20019531, %v117_v3 }
  0x57   :  { %v512_v7 = vunpack.c.l.b16 %v345_v60  ;;  %v513_v9 = vunpack.c.h.b16 %v345_v60  ;;  %v126_v50 = vunpack.c.l.bf16 %v64_v41  ;;  %v127_v51 = vunpack.c.h.bf16 %v64_v41 }
  0x58   :  { %v283_v30 = vpack.c.bf16 %v245_v19, %v244_v18  ;;  %vm1812_vm4 = vcmp.gt.f32.partialorder %v122_v48, 0.0  ;;  %vm1816_vm5 = vcmp.gt.f32.partialorder %v123_v49, 0.0  ;;  %v250_v0 = vmul.f32 0.20019531, %v122_v48 }
  0x59   :  { %v552_v22 = vpack.c.b16 %v512_v7, %v508_v6  ;;  %v553_v23 = vpack.c.b16 %v513_v9, %v509_v8  ;;  %vm1820_vm6 = vcmp.gt.f32.partialorder %v126_v50, 0.0  ;;  %vm1824_vm7 = vcmp.gt.f32.partialorder %v127_v51, 0.0  ;;  %vm318_vm10 = vmpackc.low %vm1816_vm5, %vm1812_vm4 }
  0x5a   :  { %v251_v1 = vmul.f32 0.20019531, %v123_v49  ;;  %v254_v2 = vmul.f32 0.20019531, %v126_v50  ;;  %v255_v3 = vmul.f32 0.20019531, %v127_v51  ;;  %v256_v6 = vmul.f32 0.20019531, %v128_v54  ;;  %vm320_vm13 = vmpackc.low %vm1824_vm7, %vm1820_vm6 }
  0x5b   :  { %v257_v7 = vmul.f32 0.20019531, %v129_v55  ;;  %vm1828_vm8 = vcmp.gt.f32.partialorder %v124_v52, 0.0  ;;  %vm1832_vm9 = vcmp.gt.f32.partialorder %v125_v53, 0.0  ;;  %vm192_vm11 = vcmp.gt.f32.partialorder %v128_v54, 0.0 }
  0x5c   :  { %vm193_vm12 = vcmp.gt.f32.partialorder %v129_v55, 0.0  ;;  %v286_v10 = vpack.c.bf16 %v251_v1, %v250_v0  ;;  %v288_v11 = vpack.c.bf16 %v255_v3, %v254_v2  ;;  %v287_v12 = vpack.c.bf16 %v253_v5, %v252_v4  ;;  %vm319_vm14 = vmpackc.low %vm1832_vm9, %vm1828_vm8 }
  0x5d   :  { %v289_v13 = vpack.c.bf16 %v257_v7, %v256_v6  ;;  %vm321_vm15 = vmpackc.low %vm193_vm12, %vm192_vm11 }
  0x5e   :  { %v350_v14 = vsel %vm318_vm10, %v62_v40, %v286_v10  ;;  %v352_v15 = vsel %vm320_vm13, %v64_v41, %v288_v11  ;;  %v351_v16 = vsel %vm319_vm14, %v63_v46, %v287_v12 }
  0x5f   :  { %v353_v17 = vsel %vm321_vm15, %v65_v47, %v289_v13  ;;  %v522_v18 = vunpack.c.l.b16 %v350_v14  ;;  %v526_v19 = vunpack.c.l.b16 %v352_v15  ;;  %v523_v20 = vunpack.c.h.b16 %v350_v14 }
  0x60   :  { %v527_v21 = vunpack.c.h.b16 %v352_v15  ;;  %v525_v24 = vunpack.c.h.b16 %v351_v16  ;;  %v529_v25 = vunpack.c.h.b16 %v353_v17 }
  0x61   :  { %814 = vmatmul.bf16.gmra.mxu0 %v546_v34  ;;  %v347_v34 = vsel %vm315_vm2, %v59_v56, %v283_v30  ;;  %v558_v26 = vpack.c.b16 %v526_v19, %v522_v18 }
  0x62   :  { %863 = vmatmul.bf16.gmra.mxu1 %v547_v35  ;;  %v349_v35 = vsel %vm317_vm3, %v61_v57, %v285_v31  ;;  %v516_v42 = vunpack.c.l.b16 %v347_v34  ;;  %v517_v44 = vunpack.c.h.b16 %v347_v34  ;;  %v555_v57 = vpack.c.b16 %v519_v39, %v515_v38 }
  0x63   :  { %912 = vmatmul.bf16.gmra.mxu2 %v548_v36  ;;  %v514_v36 = vunpack.c.l.b16 %v346_v32  ;;  %v520_v43 = vunpack.c.l.b16 %v349_v35  ;;  %v521_v45 = vunpack.c.h.b16 %v349_v35  ;;  %v559_v27 = vpack.c.b16 %v527_v21, %v523_v20 }
  0x64   :  { %961 = vmatmul.bf16.gmra.mxu3 %v549_v37  ;;  %v518_v37 = vunpack.c.l.b16 %v348_v33  ;;  %v561_v29 = vpack.c.b16 %v529_v25, %v525_v24 }
  0x65   :  { %v557_v59 = vpack.c.b16 %v521_v45, %v517_v44 }
  0x66   :  { %v554_v56 = vpack.c.b16 %v518_v37, %v514_v36  ;;  %v1851_v36 = vld [vmem:[%s1919_s2] ss:$0 sm:$0xff] }
  0x71   :  { %819 = vmatmul.bf16.gmra.mxu0 %v550_v58  ;;  %v556_v58 = vpack.c.b16 %v520_v43, %v516_v42 }
  0x72   :  { %868 = vmatmul.bf16.gmra.mxu1 %v551_v62 }
  0x73   :  { %917 = vmatmul.bf16.gmra.mxu2 %v552_v22  ;;  %v524_v22 = vunpack.c.l.b16 %v351_v16 }
  0x74   :  { %966 = vmatmul.bf16.gmra.mxu3 %v553_v23  ;;  %v528_v23 = vunpack.c.l.b16 %v353_v17 }
  0x76   :  { %v560_v28 = vpack.c.b16 %v528_v23, %v524_v22 }
  0x81   :  { %824 = vmatmul.bf16.gmra.mxu0 %v554_v56 }
  0x82   :  { %873 = vmatmul.bf16.gmra.mxu1 %v555_v57 }
  0x83   :  { %922 = vmatmul.bf16.gmra.mxu2 %v556_v58 }
  0x84   :  { %971 = vmatmul.bf16.gmra.mxu3 %v557_v59 }
  0x91   :  { %829 = vmatmul.bf16.gmra.mxu0 %v558_v26 }
  0x92   :  { %878 = vmatmul.bf16.gmra.mxu1 %v559_v27 }
  0x93   :  { %927 = vmatmul.bf16.gmra.mxu2 %v560_v28 }
  0x94   :  { %976 = vmatmul.bf16.gmra.mxu3 %v561_v29 }
  0x9e   :  { %v795_v30 = vpop.f32.mrf.mxu0 }
  0x9f   :  { %v844_v31 = vpop.f32.mrf.mxu1 }
  0xa0   :  { %v845_v32 = vadd.f32 %v844_v31, %v795_v30 }
  0xa6   :  { %v893_v33 = vpop.f32.mrf.mxu2  ;;  %v797_v37 = vpop.f32.mrf.mxu0 }
  0xa7   :  { %v942_v34 = vpop.f32.mrf.mxu3  ;;  %v894_v35 = vadd.f32 %v893_v33, %v845_v32  ;;  %v846_v38 = vpop.f32.mrf.mxu1 }
  0xa8   :  { %v847_v41 = vadd.f32 %v846_v38, %v797_v37 }
  0xa9   :  { %v943_v39 = vadd.f32 %v942_v34, %v894_v35 }
  0xab   :  { %v1037_v40 = vadd.f32 %v1851_v36, %v943_v39 }
  0xad   :  { %1053 = vst [vmem:[%s1920_s3] sm:$0xff] %v1037_v40 }
  0xae   :  { %v895_v42 = vpop.f32.mrf.mxu2  ;;  %v800_v45 = vpop.f32.mrf.mxu0 }
  0xaf   :  { %v944_v43 = vpop.f32.mrf.mxu3  ;;  %v896_v44 = vadd.f32 %v895_v42, %v847_v41  ;;  %v849_v46 = vpop.f32.mrf.mxu1 }
  0xb0   :  { %v850_v49 = vadd.f32 %v849_v46, %v800_v45 }
  0xb1   :  { %v945_v47 = vadd.f32 %v944_v43, %v896_v44 }
  0xb3   :  { %v1038_v48 = vadd.f32 %v1851_v36, %v945_v47 }
  0xb5   :  { %1054 = vst [vmem:[%s1920_s3 + $0x8] sm:$0xff] %v1038_v48 }
  0xb6   :  { %v898_v50 = vpop.f32.mrf.mxu2  ;;  %v802_v53 = vpop.f32.mrf.mxu0 }
  0xb7   :  { %v947_v51 = vpop.f32.mrf.mxu3  ;;  %v899_v52 = vadd.f32 %v898_v50, %v850_v49  ;;  %v851_v54 = vpop.f32.mrf.mxu1 }
  0xb8   :  { %v852_v57 = vadd.f32 %v851_v54, %v802_v53 }
  0xb9   :  { %v948_v55 = vadd.f32 %v947_v51, %v899_v52 }
  0xbb   :  { %v1039_v56 = vadd.f32 %v1851_v36, %v948_v55 }
  0xbd   :  { %1055 = vst [vmem:[%s1920_s3 + $0x10] sm:$0xff] %v1039_v56 }
  0xbe   :  { %v900_v58 = vpop.f32.mrf.mxu2  ;;  %v805_v61 = vpop.f32.mrf.mxu0 }
  0xbf   :  { %v949_v59 = vpop.f32.mrf.mxu3  ;;  %v901_v60 = vadd.f32 %v900_v58, %v852_v57  ;;  %v854_v62 = vpop.f32.mrf.mxu1 }
  0xc0   :  { %v855_v1 = vadd.f32 %v854_v62, %v805_v61 }
  0xc1   :  { %v950_v63 = vadd.f32 %v949_v59, %v901_v60 }
  0xc3   :  { %v1040_v0 = vadd.f32 %v1851_v36, %v950_v63 }
  0xc5   :  { %1056 = vst [vmem:[%s1920_s3 + $0x18] sm:$0xff] %v1040_v0 }
  0xc6   :  { %v903_v2 = vpop.f32.mrf.mxu2  ;;  %v807_v5 = vpop.f32.mrf.mxu0 }
  0xc7   :  { %v952_v3 = vpop.f32.mrf.mxu3  ;;  %v904_v4 = vadd.f32 %v903_v2, %v855_v1  ;;  %v856_v6 = vpop.f32.mrf.mxu1 }
  0xc8   :  { %v857_v9 = vadd.f32 %v856_v6, %v807_v5 }
  0xc9   :  { %v953_v7 = vadd.f32 %v952_v3, %v904_v4 }
  0xcb   :  { %v1041_v8 = vadd.f32 %v1851_v36, %v953_v7 }
  0xcd   :  { %1057 = vst [vmem:[%s1920_s3 + $0x20] sm:$0xff] %v1041_v8 }
  0xce   :  { %v905_v10 = vpop.f32.mrf.mxu2  ;;  %v810_v13 = vpop.f32.mrf.mxu0 }
  0xcf   :  { %v954_v11 = vpop.f32.mrf.mxu3  ;;  %v906_v12 = vadd.f32 %v905_v10, %v857_v9  ;;  %v859_v14 = vpop.f32.mrf.mxu1 }
  0xd0   :  { %v860_v17 = vadd.f32 %v859_v14, %v810_v13 }
  0xd1   :  { %v955_v15 = vadd.f32 %v954_v11, %v906_v12 }
  0xd3   :  { %v1042_v16 = vadd.f32 %v1851_v36, %v955_v15 }
  0xd5   :  { %1058 = vst [vmem:[%s1920_s3 + $0x28] sm:$0xff] %v1042_v16 }
  0xd6   :  { %v908_v18 = vpop.f32.mrf.mxu2  ;;  %v812_v21 = vpop.f32.mrf.mxu0 }
  0xd7   :  { %v957_v19 = vpop.f32.mrf.mxu3  ;;  %v909_v20 = vadd.f32 %v908_v18, %v860_v17  ;;  %v861_v22 = vpop.f32.mrf.mxu1 }
  0xd8   :  { %v862_v25 = vadd.f32 %v861_v22, %v812_v21 }
  0xd9   :  { %v958_v23 = vadd.f32 %v957_v19, %v909_v20 }
  0xdb   :  { %v1043_v24 = vadd.f32 %v1851_v36, %v958_v23 }
  0xdd   :  { %1059 = vst [vmem:[%s1920_s3 + $0x30] sm:$0xff] %v1043_v24 }
  0xde   :  { %v910_v26 = vpop.f32.mrf.mxu2  ;;  %v815_v29 = vpop.f32.mrf.mxu0 }
  0xdf   :  { %v959_v27 = vpop.f32.mrf.mxu3  ;;  %v911_v28 = vadd.f32 %v910_v26, %v862_v25  ;;  %v864_v30 = vpop.f32.mrf.mxu1 }
  0xe0   :  { %v865_v33 = vadd.f32 %v864_v30, %v815_v29 }
  0xe1   :  { %v960_v31 = vadd.f32 %v959_v27, %v911_v28 }
  0xe3   :  { %v1044_v32 = vadd.f32 %v1851_v36, %v960_v31 }
  0xe5   :  { %1060 = vst [vmem:[%s1920_s3 + $0x38] sm:$0xff] %v1044_v32 }
  0xe6   :  { %v913_v34 = vpop.f32.mrf.mxu2  ;;  %v817_v38 = vpop.f32.mrf.mxu0 }
  0xe7   :  { %v962_v35 = vpop.f32.mrf.mxu3  ;;  %v914_v37 = vadd.f32 %v913_v34, %v865_v33  ;;  %v866_v39 = vpop.f32.mrf.mxu1 }
  0xe8   :  { %v867_v42 = vadd.f32 %v866_v39, %v817_v38 }
  0xe9   :  { %v963_v40 = vadd.f32 %v962_v35, %v914_v37 }
  0xeb   :  { %v1045_v41 = vadd.f32 %v1851_v36, %v963_v40 }
  0xed   :  { %1061 = vst [vmem:[%s1920_s3 + $0x40] sm:$0xff] %v1045_v41 }
  0xee   :  { %v915_v43 = vpop.f32.mrf.mxu2  ;;  %v820_v46 = vpop.f32.mrf.mxu0 }
  0xef   :  { %v964_v44 = vpop.f32.mrf.mxu3  ;;  %v916_v45 = vadd.f32 %v915_v43, %v867_v42  ;;  %v869_v47 = vpop.f32.mrf.mxu1 }
  0xf0   :  { %v870_v50 = vadd.f32 %v869_v47, %v820_v46 }
  0xf1   :  { %v965_v48 = vadd.f32 %v964_v44, %v916_v45 }
  0xf3   :  { %v1046_v49 = vadd.f32 %v1851_v36, %v965_v48 }
  0xf5   :  { %1062 = vst [vmem:[%s1920_s3 + $0x48] sm:$0xff] %v1046_v49 }
  0xf6   :  { %v918_v51 = vpop.f32.mrf.mxu2  ;;  %v822_v54 = vpop.f32.mrf.mxu0 }
  0xf7   :  { %v967_v52 = vpop.f32.mrf.mxu3  ;;  %v919_v53 = vadd.f32 %v918_v51, %v870_v50  ;;  %v871_v55 = vpop.f32.mrf.mxu1 }
  0xf8   :  { %v872_v58 = vadd.f32 %v871_v55, %v822_v54 }
  0xf9   :  { %v968_v56 = vadd.f32 %v967_v52, %v919_v53 }
  0xfb   :  { %v1047_v57 = vadd.f32 %v1851_v36, %v968_v56 }
  0xfd   :  { %1063 = vst [vmem:[%s1920_s3 + $0x50] sm:$0xff] %v1047_v57 }
  0xfe   :  { %v920_v59 = vpop.f32.mrf.mxu2  ;;  %v825_v62 = vpop.f32.mrf.mxu0 }
  0xff   :  { %v969_v60 = vpop.f32.mrf.mxu3  ;;  %v921_v61 = vadd.f32 %v920_v59, %v872_v58  ;;  %v874_v63 = vpop.f32.mrf.mxu1 }
 0x100   :  { %v875_v2 = vadd.f32 %v874_v63, %v825_v62 }
 0x101   :  { %v970_v0 = vadd.f32 %v969_v60, %v921_v61 }
 0x103   :  { %v1048_v1 = vadd.f32 %v1851_v36, %v970_v0 }
 0x105   :  { %1064 = vst [vmem:[%s1920_s3 + $0x58] sm:$0xff] %v1048_v1 }
 0x106   :  { %v923_v3 = vpop.f32.mrf.mxu2  ;;  %v827_v6 = vpop.f32.mrf.mxu0 }
 0x107   :  { %v972_v4 = vpop.f32.mrf.mxu3  ;;  %v924_v5 = vadd.f32 %v923_v3, %v875_v2  ;;  %v876_v7 = vpop.f32.mrf.mxu1 }
 0x108   :  { %v877_v10 = vadd.f32 %v876_v7, %v827_v6 }
 0x109   :  { %v973_v8 = vadd.f32 %v972_v4, %v924_v5 }
 0x10b   :  { %v1049_v9 = vadd.f32 %v1851_v36, %v973_v8 }
 0x10d   :  { %1065 = vst [vmem:[%s1920_s3 + $0x60] sm:$0xff] %v1049_v9 }
 0x10e   :  { %v925_v11 = vpop.f32.mrf.mxu2  ;;  %v830_v14 = vpop.f32.mrf.mxu0 }
 0x10f   :  { %v974_v12 = vpop.f32.mrf.mxu3  ;;  %v926_v13 = vadd.f32 %v925_v11, %v877_v10  ;;  %v879_v15 = vpop.f32.mrf.mxu1 }
 0x110   :  { %v880_v18 = vadd.f32 %v879_v15, %v830_v14 }
 0x111   :  { %v975_v16 = vadd.f32 %v974_v12, %v926_v13 }
 0x113   :  { %v1050_v17 = vadd.f32 %v1851_v36, %v975_v16 }
 0x115   :  { %1066 = vst [vmem:[%s1920_s3 + $0x68] sm:$0xff] %v1050_v17 }
 0x116   :  { %v928_v19 = vpop.f32.mrf.mxu2  ;;  %v832_v23 = vpop.f32.mrf.mxu0 }
 0x117   :  { %v977_v20 = vpop.f32.mrf.mxu3  ;;  %v929_v21 = vadd.f32 %v928_v19, %v880_v18  ;;  %v881_v24 = vpop.f32.mrf.mxu1 }
 0x118   :  { %v882_v26 = vadd.f32 %v881_v24, %v832_v23 }
 0x119   :  { %v978_v22 = vadd.f32 %v977_v20, %v929_v21 }
 0x11b   :  { %v1051_v25 = vadd.f32 %v1851_v36, %v978_v22 }
 0x11d   :  { %1067 = vst [vmem:[%s1920_s3 + $0x70] sm:$0xff] %v1051_v25 }
 0x11e   :  { %v930_v27 = vpop.f32.mrf.mxu2 }
 0x11f   :  { %v931_v28 = vadd.f32 %v930_v27, %v882_v26  ;;  %v979_v29 = vpop.f32.mrf.mxu3 }
 0x121   :  { %v980_v30 = vadd.f32 %v979_v29, %v931_v28 }
 0x123   :  { %v1052_v31 = vadd.f32 %v1851_v36, %v980_v30 }
 0x125   :  { %1068 = vst [vmem:[%s1920_s3 + $0x78] sm:$0xff] %v1052_v31 }

// kernel: tile.18
= control target key start
LH: loop header
LB: loop body
LE: loop exit
PB: predicated region body
PF: predicated region fallthrough
CT: control target
= control target key end

     0   :  { %s22_s0 = inlined_call_operand.vmem [shape: f32[32], index: 0, kind: input, shape index: {}]   ;;  %s23_s1 = inlined_call_operand.vmem [shape: f32[4,32], index: 1, kind: output, shape index: {}]  }
   0x1   :  { %v4_v0 = vld [vmem:[%s22_s0] ss:$0 sm:$0xff] }
   0x2   :  { %5 = vst [vmem:[%s23_s1] sm:$0xf] %v4_v0 }

// kernel: unet_forward.17
= control target key start
LH: loop header
LB: loop body
LE: loop exit
PB: predicated region body
PF: predicated region fallthrough
CT: control target
= control target key end

     0   :  { %s1647_s1 = inlined_call_operand.vmem [shape: bf16[640,128], index: 1, kind: input, shape index: {}]   ;;  %s1648_s0 = inlined_call_operand.vmem [shape: bf16[128,640], index: 0, kind: input, shape index: {}]   ;;  %s1649_s2 = inlined_call_operand.vmem [shape: f32[1,128], index: 2, kind: input, shape index: {}]   ;;  %s1650_s3 = inlined_call_operand.vmem [shape: f32[128,128], index: 3, kind: output, shape index: {}]  }
   0x1   :  { %v1121_v0 = vld [vmem:[%s1647_s1 + $0x38] sm:$0xff]  ;;  %v1120_v1 = vld [vmem:[%s1647_s1 + $0x30] sm:$0xff]  ;;  %v1119_v2 = vld [vmem:[%s1647_s1 + $0x28] sm:$0xff] }
   0x2   :  { %1154 = vmatpush.bf16.msra.mxu1 %v1121_v0  ;;  %1155 = vmatpush.bf16.msra.mxu2 %v1121_v0  ;;  %v1118_v3 = vld [vmem:[%s1647_s1 + $0x20] sm:$0xff]  ;;  %v1117_v4 = vld [vmem:[%s1647_s1 + $0x18] sm:$0xff]  ;;  %v1116_v5 = vld [vmem:[%s1647_s1 + $0x10] sm:$0xff] }
   0x3   :  { %1156 = vmatpush.bf16.msra.mxu3 %v1121_v0  ;;  %618 = vmatpush.bf16.msra.mxu0 %v1121_v0  ;;  %v1220_v6 = vld [vmem:[%s1648_s0 + $0x50] sm:$0xff]  ;;  %v1225_v7 = vld [vmem:[%s1648_s0 + $0x64] sm:$0xff]  ;;  %v1137_v32 = vld [vmem:[%s1647_s1 + $0xb8] sm:$0xff] }
   0x4   :  { %v1230_v8 = vld [vmem:[%s1648_s0 + $0xa0] sm:$0xff]  ;;  %v1235_v9 = vld [vmem:[%s1648_s0 + $0xb4] sm:$0xff]  ;;  %v102_v14 = vunpack.c.l.bf16 %v1220_v6  ;;  %v107_v15 = vunpack.c.l.bf16 %v1225_v7  ;;  %v1115_v18 = vld [vmem:[%s1647_s1 + $0x8] sm:$0xff] }
   0x5   :  { %v1240_v10 = vld [vmem:[%s1648_s0 + $0xf0] sm:$0xff]  ;;  %v1245_v11 = vld [vmem:[%s1648_s0 + $0x104] sm:$0xff]  ;;  %v122_v16 = vunpack.c.l.bf16 %v1230_v8  ;;  %v127_v17 = vunpack.c.l.bf16 %v1235_v9  ;;  %v1129_v33 = vld [vmem:[%s1647_s1 + $0x78] sm:$0xff] }
   0x6   :  { %1157 = vmatpush.bf16.msra.mxu1 %v1120_v1  ;;  %1158 = vmatpush.bf16.msra.mxu2 %v1120_v1  ;;  %v1250_v12 = vld [vmem:[%s1648_s0] sm:$0xff]  ;;  %v1255_v13 = vld [vmem:[%s1648_s0 + $0x14] sm:$0xff]  ;;  %v142_v19 = vunpack.c.l.bf16 %v1240_v10  ;;  %v147_v20 = vunpack.c.l.bf16 %v1245_v11  ;;  %v182_v23 = vmax.f32 %v102_v14, 0.0  ;;  %v187_v24 = vmax.f32 %v107_v15, 0.0  ;;  %v1303_v45 = vld [vmem:[%s1648_s0 + $0x8c] sm:$0xff] }
   0x7   :  { %1159 = vmatpush.bf16.msra.mxu3 %v1120_v1  ;;  %619 = vmatpush.bf16.msra.mxu0 %v1120_v1  ;;  %v82_v21 = vunpack.c.l.bf16 %v1250_v12  ;;  %v87_v22 = vunpack.c.l.bf16 %v1255_v13  ;;  %v202_v25 = vmax.f32 %v122_v16, 0.0  ;;  %v207_v26 = vmax.f32 %v127_v17, 0.0  ;;  %v1114_v27 = vld [vmem:[%s1647_s1] sm:$0xff]  ;;  %v1145_v38 = vld [vmem:[%s1647_s1 + $0xf8] sm:$0xff]  ;;  %v1136_v40 = vld [vmem:[%s1647_s1 + $0xb0] sm:$0xff] }
   0x8   :  { %v222_v28 = vmax.f32 %v142_v19, 0.0  ;;  %v227_v29 = vmax.f32 %v147_v20, 0.0  ;;  %v252_v34 = vpack.c.bf16 %v187_v24, %v182_v23  ;;  %v1153_v39 = vld [vmem:[%s1647_s1 + $0x138] sm:$0xff]  ;;  %v1128_v41 = vld [vmem:[%s1647_s1 + $0x70] sm:$0xff]  ;;  %v1308_v46 = vld [vmem:[%s1648_s0 + $0xc8] sm:$0xff]  ;;  %v117_v55 = vunpack.c.l.bf16 %v1303_v45 }
   0x9   :  { %v162_v30 = vmax.f32 %v82_v21, 0.0  ;;  %v167_v31 = vmax.f32 %v87_v22, 0.0  ;;  %v262_v35 = vpack.c.bf16 %v207_v26, %v202_v25  ;;  %v1144_v42 = vld [vmem:[%s1647_s1 + $0xf0] sm:$0xff]  ;;  %v1298_v44 = vld [vmem:[%s1648_s0 + $0x78] sm:$0xff]  ;;  %v1328_v50 = vld [vmem:[%s1648_s0 + $0x28] sm:$0xff]  ;;  %v132_v56 = vunpack.c.l.bf16 %v1308_v46 }
   0xa   :  { %1160 = vmatpush.bf16.msra.mxu1 %v1119_v2  ;;  %1161 = vmatpush.bf16.msra.mxu2 %v1119_v2  ;;  %v272_v36 = vpack.c.bf16 %v227_v29, %v222_v28  ;;  %v1152_v43 = vld [vmem:[%s1647_s1 + $0x130] sm:$0xff]  ;;  %v1313_v47 = vld [vmem:[%s1648_s0 + $0xdc] sm:$0xff]  ;;  %v1135_v52 = vld [vmem:[%s1647_s1 + $0xa8] sm:$0xff]  ;;  %v112_v54 = vunpack.c.l.bf16 %v1298_v44  ;;  %v92_v60 = vunpack.c.l.bf16 %v1328_v50 }
   0xb   :  { %1162 = vmatpush.bf16.msra.mxu3 %v1119_v2  ;;  %620 = vmatpush.bf16.msra.mxu0 %v1119_v2  ;;  %v242_v37 = vpack.c.bf16 %v167_v31, %v162_v30  ;;  %v1318_v48 = vld [vmem:[%s1648_s0 + $0x118] sm:$0xff]  ;;  %v1323_v49 = vld [vmem:[%s1648_s0 + $0x12c] sm:$0xff]  ;;  %v137_v57 = vunpack.c.l.bf16 %v1313_v47  ;;  %v1134_v0 = vld [vmem:[%s1647_s1 + $0xa0] sm:$0xff] }
   0xc   :  { %v1333_v51 = vld [vmem:[%s1648_s0 + $0x3c] sm:$0xff]  ;;  %v1127_v53 = vld [vmem:[%s1647_s1 + $0x68] sm:$0xff]  ;;  %v152_v58 = vunpack.c.l.bf16 %v1318_v48  ;;  %v157_v59 = vunpack.c.l.bf16 %v1323_v49  ;;  %v192_v2 = vmax.f32 %v112_v54, 0.0  ;;  %v172_v16 = vmax.f32 %v92_v60, 0.0  ;;  %v1132_v28 = vld [vmem:[%s1647_s1 + $0x90] sm:$0xff] }
   0xd   :  { %v97_v61 = vunpack.c.l.bf16 %v1333_v51  ;;  %v1143_v62 = vld [vmem:[%s1647_s1 + $0xe8] sm:$0xff]  ;;  %v1126_v1 = vld [vmem:[%s1647_s1 + $0x60] sm:$0xff]  ;;  %v1133_v20 = vld [vmem:[%s1647_s1 + $0x98] sm:$0xff] }
   0xe   :  { %1163 = vmatpush.bf16.msra.mxu1 %v1118_v3  ;;  %1164 = vmatpush.bf16.msra.mxu2 %v1118_v3  ;;  %v1151_v63 = vld [vmem:[%s1647_s1 + $0x128] sm:$0xff]  ;;  %v232_v14 = vmax.f32 %v152_v58, 0.0  ;;  %v237_v15 = vmax.f32 %v157_v59, 0.0  ;;  %v1150_v19 = vld [vmem:[%s1647_s1 + $0x120] sm:$0xff]  ;;  %v1125_v21 = vld [vmem:[%s1647_s1 + $0x58] sm:$0xff] }
   0xf   :  { %1165 = vmatpush.bf16.msra.mxu3 %v1118_v3  ;;  %621 = vmatpush.bf16.msra.mxu0 %v1118_v3  ;;  %v197_v3 = vmax.f32 %v117_v55, 0.0  ;;  %v177_v17 = vmax.f32 %v97_v61, 0.0  ;;  %v1141_v26 = vld [vmem:[%s1647_s1 + $0xd8] sm:$0xff]  ;;  %v1124_v29 = vld [vmem:[%s1647_s1 + $0x50] sm:$0xff]  ;;  %v35_v31 = vld [vmem:[%s1648_s0 + $0x8] sm:$0xff] }
  0x10   :  { %v277_v24 = vpack.c.bf16 %v237_v15, %v232_v14  ;;  %v1140_v30 = vld [vmem:[%s1647_s1 + $0xd0] sm:$0xff]  ;;  %v1122_v58 = vld [vmem:[%s1647_s1 + $0x40] sm:$0xff] }
  0x11   :  { %v257_v22 = vpack.c.bf16 %v197_v3, %v192_v2  ;;  %v247_v25 = vpack.c.bf16 %v177_v17, %v172_v16  ;;  %v1138_v3 = vld [vmem:[%s1647_s1 + $0xc0] sm:$0xff]  ;;  %v41_v17 = vld [vmem:[%s1648_s0 + $0x30] sm:$0xff] }
  0x12   :  { %1166 = vmatpush.bf16.msra.mxu1 %v1117_v4  ;;  %1167 = vmatpush.bf16.msra.mxu2 %v1117_v4 }
  0x13   :  { %1168 = vmatpush.bf16.msra.mxu3 %v1117_v4  ;;  %622 = vmatpush.bf16.msra.mxu0 %v1117_v4  ;;  %v212_v4 = vmax.f32 %v132_v56, 0.0  ;;  %v1139_v56 = vld [vmem:[%s1647_s1 + $0xc8] sm:$0xff] }
  0x16   :  { %1169 = vmatpush.bf16.msra.mxu1 %v1116_v5  ;;  %1170 = vmatpush.bf16.msra.mxu2 %v1116_v5 }
  0x17   :  { %1171 = vmatpush.bf16.msra.mxu3 %v1116_v5  ;;  %623 = vmatpush.bf16.msra.mxu0 %v1116_v5  ;;  %v217_v5 = vmax.f32 %v137_v57, 0.0  ;;  %v1147_v57 = vld [vmem:[%s1647_s1 + $0x108] sm:$0xff] }
  0x19   :  { %v267_v23 = vpack.c.bf16 %v217_v5, %v212_v4  ;;  %v1146_v4 = vld [vmem:[%s1647_s1 + $0x100] sm:$0xff] }
  0x1a   :  { %1172 = vmatpush.bf16.msra.mxu1 %v1115_v18  ;;  %1173 = vmatpush.bf16.msra.mxu2 %v1115_v18 }
  0x1b   :  { %1174 = vmatpush.bf16.msra.mxu3 %v1115_v18  ;;  %624 = vmatpush.bf16.msra.mxu0 %v1115_v18  ;;  %v1142_v18 = vld [vmem:[%s1647_s1 + $0xe0] sm:$0xff] }
  0x1e   :  { %1175 = vmatpush.bf16.msra.mxu1 %v1114_v27  ;;  %1176 = vmatpush.bf16.msra.mxu2 %v1114_v27 }
  0x1f   :  { %1177 = vmatpush.bf16.msra.mxu3 %v1114_v27  ;;  %625 = vmatpush.bf16.msra.mxu0 %v1114_v27  ;;  %v1149_v27 = vld [vmem:[%s1647_s1 + $0x118] sm:$0xff] }
  0x21   :  { %636 = vmatmul.bf16.vlgmr.msra.gmra.mxu1 %v252_v34  ;;  %646 = vmatmul.bf16.vlgmr.msra.gmra.mxu2 %v262_v35  ;;  %v108_v34 = vunpack.c.h.bf16 %v1225_v7  ;;  %v1148_v35 = vld [vmem:[%s1647_s1 + $0x110] sm:$0xff]  ;;  %v1123_v7 = vld [vmem:[%s1647_s1 + $0x48] sm:$0xff] }
  0x22   :  { %716 = vmatpush.bf16.msrb.mxu2 %v1137_v32  ;;  %667 = vmatpush.bf16.msrb.mxu1 %v1129_v33  ;;  %v38_v32 = vld [vmem:[%s1648_s0 + $0x1c] sm:$0xff]  ;;  %v103_v33 = vunpack.c.h.bf16 %v1220_v6  ;;  %v1131_v6 = vld [vmem:[%s1647_s1 + $0x88] sm:$0xff] }
  0x23   :  { %656 = vmatmul.bf16.vlgmr.msra.gmra.mxu3 %v272_v36  ;;  %626 = vmatmul.bf16.vlgmr.msra.gmra.mxu0 %v242_v37  ;;  %v36_v36 = vld [vmem:[%s1648_s0 + $0x10] sm:$0xf]  ;;  %v39_v37 = vld [vmem:[%s1648_s0 + $0x24] sm:$0xf] }
  0x24   :  { %765 = vmatpush.bf16.msrb.mxu3 %v1145_v38  ;;  %814 = vmatpush.bf16.msrb.mxu0 %v1153_v39  ;;  %v83_v38 = vunpack.c.h.bf16 %v1250_v12  ;;  %v1412_v39 = vmax.f32 %v103_v33, 0.0  ;;  %v90_v12 = vunpack.c.h.bf16 %v38_v32  ;;  %v91_v54 = vunpack.c.l.bf16 %v39_v37 }
  0x26   :  { %717 = vmatpush.bf16.msrb.mxu2 %v1136_v40  ;;  %668 = vmatpush.bf16.msrb.mxu1 %v1128_v41  ;;  %v1414_v40 = vmax.f32 %v108_v34, 0.0  ;;  %v88_v41 = vunpack.c.h.bf16 %v1255_v13  ;;  %v1130_v13 = vld [vmem:[%s1647_s1 + $0x80] sm:$0xff]  ;;  %v163_v59 = vmax.f32 %v83_v38, 0.0  ;;  %v171_v2 = vmax.f32 %v91_v54, 0.0 }
  0x28   :  { %766 = vmatpush.bf16.msrb.mxu3 %v1144_v42  ;;  %815 = vmatpush.bf16.msrb.mxu0 %v1152_v43  ;;  %v84_v42 = vunpack.c.l.bf16 %v35_v31  ;;  %v89_v43 = vunpack.c.l.bf16 %v38_v32  ;;  %v253_v55 = vpack.c.bf16 %v1414_v40, %v1412_v39  ;;  %v168_v60 = vmax.f32 %v88_v41, 0.0  ;;  %v57_v39 = vld [vmem:[%s1648_s0 + $0x9c] sm:$0xf] }
  0x2a   :  { %718 = vmatpush.bf16.msrb.mxu2 %v1135_v52  ;;  %669 = vmatpush.bf16.msrb.mxu1 %v1127_v53  ;;  %v85_v52 = vunpack.c.h.bf16 %v35_v31  ;;  %v86_v53 = vunpack.c.l.bf16 %v36_v36  ;;  %v164_v61 = vmax.f32 %v84_v42, 0.0  ;;  %v243_v5 = vpack.c.bf16 %v168_v60, %v163_v59  ;;  %v47_v42 = vld [vmem:[%s1648_s0 + $0x58] sm:$0xff] }
  0x2c   :  { %767 = vmatpush.bf16.msrb.mxu3 %v1143_v62  ;;  %816 = vmatpush.bf16.msrb.mxu0 %v1151_v63  ;;  %v169_v62 = vmax.f32 %v89_v43, 0.0  ;;  %v165_v63 = vmax.f32 %v85_v52, 0.0  ;;  %v50_v43 = vld [vmem:[%s1648_s0 + $0x6c] sm:$0xff]  ;;  %v48_v52 = vld [vmem:[%s1648_s0 + $0x60] sm:$0xf] }
  0x2d   :  { %v109_v54 = vunpack.c.l.bf16 %v50_v43 }
  0x2e   :  { %719 = vmatpush.bf16.msrb.mxu2 %v1134_v0  ;;  %670 = vmatpush.bf16.msrb.mxu1 %v1126_v1  ;;  %v170_v0 = vmax.f32 %v90_v12, 0.0  ;;  %v166_v1 = vmax.f32 %v86_v53, 0.0  ;;  %v244_v14 = vpack.c.bf16 %v169_v62, %v164_v61  ;;  %v51_v12 = vld [vmem:[%s1648_s0 + $0x74] sm:$0xf]  ;;  %v104_v53 = vunpack.c.l.bf16 %v47_v42 }
  0x2f   :  { %v189_v60 = vmax.f32 %v109_v54, 0.0  ;;  %v68_v54 = vld [vmem:[%s1648_s0 + $0xe4] sm:$0xff] }
  0x30   :  { %768 = vmatpush.bf16.msrb.mxu3 %v1142_v18  ;;  %817 = vmatpush.bf16.msrb.mxu0 %v1150_v19  ;;  %v245_v15 = vpack.c.bf16 %v170_v0, %v165_v63  ;;  %v246_v16 = vpack.c.bf16 %v171_v2, %v166_v1  ;;  %v44_v18 = vld [vmem:[%s1648_s0 + $0x44] sm:$0xff]  ;;  %v113_v19 = vunpack.c.h.bf16 %v1298_v44  ;;  %v184_v59 = vmax.f32 %v104_v53, 0.0 }
  0x31   :  { %641 = vmatmul.bf16.gmra.mxu1 %v257_v22  ;;  %651 = vmatmul.bf16.gmra.mxu2 %v267_v23  ;;  %v45_v22 = vld [vmem:[%s1648_s0 + $0x4c] sm:$0xf]  ;;  %v93_v23 = vunpack.c.h.bf16 %v1328_v50  ;;  %v99_v44 = vunpack.c.l.bf16 %v44_v18 }
  0x32   :  { %720 = vmatpush.bf16.msrb.mxu2 %v1133_v20  ;;  %671 = vmatpush.bf16.msrb.mxu1 %v1125_v21  ;;  %v118_v20 = vunpack.c.h.bf16 %v1303_v45  ;;  %v42_v21 = vld [vmem:[%s1648_s0 + $0x38] sm:$0xf]  ;;  %v100_v45 = vunpack.c.h.bf16 %v44_v18  ;;  %v254_v1 = vpack.c.bf16 %v189_v60, %v184_v59  ;;  %v121_v18 = vunpack.c.l.bf16 %v57_v39 }
  0x33   :  { %661 = vmatmul.bf16.gmra.mxu3 %v277_v24  ;;  %631 = vmatmul.bf16.gmra.mxu0 %v247_v25  ;;  %v1452_v24 = vmax.f32 %v113_v19, 0.0  ;;  %v173_v32 = vmax.f32 %v93_v23, 0.0  ;;  %v139_v60 = vunpack.c.l.bf16 %v68_v54 }
  0x34   :  { %769 = vmatpush.bf16.msrb.mxu3 %v1141_v26  ;;  %818 = vmatpush.bf16.msrb.mxu0 %v1149_v27  ;;  %v1454_v25 = vmax.f32 %v118_v20, 0.0  ;;  %v98_v26 = vunpack.c.h.bf16 %v1333_v51  ;;  %v94_v27 = vunpack.c.l.bf16 %v41_v17  ;;  %v180_v36 = vmax.f32 %v100_v45, 0.0  ;;  %v60_v45 = vld [vmem:[%s1648_s0 + $0xb0] sm:$0xf] }
  0x36   :  { %721 = vmatpush.bf16.msrb.mxu2 %v1132_v28  ;;  %672 = vmatpush.bf16.msrb.mxu1 %v1124_v29  ;;  %v95_v28 = vunpack.c.h.bf16 %v41_v17  ;;  %v96_v29 = vunpack.c.l.bf16 %v42_v21  ;;  %v258_v31 = vpack.c.bf16 %v1454_v25, %v1452_v24  ;;  %v178_v33 = vmax.f32 %v98_v26, 0.0 }
  0x37   :  { %v174_v34 = vmax.f32 %v94_v27, 0.0  ;;  %v201_v24 = vmax.f32 %v121_v18, 0.0  ;;  %v72_v18 = vld [vmem:[%s1648_s0 + $0x100] sm:$0xf] }
  0x38   :  { %770 = vmatpush.bf16.msrb.mxu3 %v1140_v30  ;;  %819 = vmatpush.bf16.msrb.mxu0 %v1148_v35  ;;  %v101_v30 = vunpack.c.l.bf16 %v45_v22  ;;  %v179_v35 = vmax.f32 %v99_v44, 0.0  ;;  %v175_v50 = vmax.f32 %v95_v28, 0.0  ;;  %v176_v37 = vmax.f32 %v96_v29, 0.0  ;;  %v59_v44 = vld [vmem:[%s1648_s0 + $0xa8] sm:$0xff]  ;;  %v62_v28 = vld [vmem:[%s1648_s0 + $0xbc] sm:$0xff] }
  0x39   :  { %v63_v29 = vld [vmem:[%s1648_s0 + $0xc4] sm:$0xf] }
  0x3a   :  { %722 = vmatpush.bf16.msrb.mxu2 %v1131_v6  ;;  %673 = vmatpush.bf16.msrb.mxu1 %v1123_v7  ;;  %v181_v38 = vmax.f32 %v101_v30, 0.0  ;;  %v248_v6 = vpack.c.bf16 %v178_v33, %v173_v32  ;;  %v249_v7 = vpack.c.bf16 %v179_v35, %v174_v34  ;;  %v250_v51 = vpack.c.bf16 %v180_v36, %v175_v50 }
  0x3b   :  { %v123_v30 = vunpack.c.h.bf16 %v1230_v8  ;;  %v124_v32 = vunpack.c.l.bf16 %v59_v44  ;;  %v129_v33 = vunpack.c.l.bf16 %v62_v28  ;;  %v125_v34 = vunpack.c.h.bf16 %v59_v44 }
  0x3c   :  { %771 = vmatpush.bf16.msrb.mxu3 %v1139_v56  ;;  %820 = vmatpush.bf16.msrb.mxu0 %v1147_v57  ;;  %v251_v41 = vpack.c.bf16 %v181_v38, %v176_v37  ;;  %v105_v56 = vunpack.c.h.bf16 %v47_v42  ;;  %v110_v57 = vunpack.c.h.bf16 %v50_v43  ;;  %v130_v35 = vunpack.c.h.bf16 %v62_v28 }
  0x3d   :  { %v126_v50 = vunpack.c.l.bf16 %v60_v45  ;;  %v131_v36 = vunpack.c.l.bf16 %v63_v29  ;;  %v203_v37 = vmax.f32 %v123_v30, 0.0 }
  0x3e   :  { %723 = vmatpush.bf16.msrb.mxu2 %v1130_v13  ;;  %674 = vmatpush.bf16.msrb.mxu1 %v1122_v58  ;;  %v106_v13 = vunpack.c.l.bf16 %v48_v52  ;;  %v111_v58 = vunpack.c.l.bf16 %v51_v12  ;;  %v185_v61 = vmax.f32 %v105_v56, 0.0  ;;  %v190_v62 = vmax.f32 %v110_v57, 0.0  ;;  %v66_v56 = vld [vmem:[%s1648_s0 + $0xd8] sm:$0xf]  ;;  %v69_v57 = vld [vmem:[%s1648_s0 + $0xec] sm:$0xf] }
  0x3f   :  { %v206_v42 = vmax.f32 %v126_v50, 0.0  ;;  %v211_v43 = vmax.f32 %v131_v36, 0.0 }
  0x40   :  { %772 = vmatpush.bf16.msrb.mxu3 %v1138_v3  ;;  %821 = vmatpush.bf16.msrb.mxu0 %v1146_v4  ;;  %v186_v63 = vmax.f32 %v106_v13, 0.0  ;;  %v191_v0 = vmax.f32 %v111_v58, 0.0  ;;  %v255_v2 = vpack.c.bf16 %v190_v62, %v185_v61  ;;  %v53_v4 = vld [vmem:[%s1648_s0 + $0x80] sm:$0xff]  ;;  %v133_v13 = vunpack.c.h.bf16 %v1308_v46 }
  0x41   :  { %675 = vmatmul.bf16.vlgmr.msrb.gmra.mxu1 %v243_v5  ;;  %724 = vmatmul.bf16.vlgmr.msrb.gmra.mxu2 %v244_v14  ;;  %v56_v5 = vld [vmem:[%s1648_s0 + $0x94] sm:$0xff]  ;;  %v54_v14 = vld [vmem:[%s1648_s0 + $0x88] sm:$0xf]  ;;  %v114_v40 = vunpack.c.l.bf16 %v53_v4  ;;  %v266_v8 = vpack.c.bf16 %v211_v43, %v206_v42  ;;  %v138_v58 = vunpack.c.h.bf16 %v1313_v47  ;;  %v140_v62 = vunpack.c.h.bf16 %v68_v54 }
  0x42   :  { %v256_v3 = vpack.c.bf16 %v191_v0, %v186_v63  ;;  %v116_v17 = vunpack.c.l.bf16 %v54_v14  ;;  %v136_v63 = vunpack.c.l.bf16 %v66_v56  ;;  %v141_v0 = vunpack.c.l.bf16 %v69_v57  ;;  %v71_v47 = vld [vmem:[%s1648_s0 + $0xf8] sm:$0xff] }
  0x43   :  { %773 = vmatmul.bf16.vlgmr.msrb.gmra.mxu3 %v245_v15  ;;  %822 = vmatmul.bf16.vlgmr.msrb.gmra.mxu0 %v246_v16  ;;  %v115_v15 = vunpack.c.h.bf16 %v53_v4  ;;  %v120_v16 = vunpack.c.h.bf16 %v56_v5  ;;  %v194_v19 = vmax.f32 %v114_v40, 0.0  ;;  %v219_v4 = vmax.f32 %v139_v60, 0.0 }
  0x44   :  { %v196_v23 = vmax.f32 %v116_v17, 0.0  ;;  %v220_v14 = vmax.f32 %v140_v62, 0.0  ;;  %v216_v39 = vmax.f32 %v136_v63, 0.0  ;;  %v221_v40 = vmax.f32 %v141_v0, 0.0  ;;  %v74_v17 = vld [vmem:[%s1648_s0 + $0x10c] sm:$0xff] }
  0x45   :  { %v195_v21 = vmax.f32 %v115_v15, 0.0  ;;  %v200_v22 = vmax.f32 %v120_v16, 0.0  ;;  %v153_v42 = vunpack.c.h.bf16 %v1318_v48  ;;  %v158_v43 = vunpack.c.h.bf16 %v1323_v49 }
  0x46   :  { %v261_v27 = vpack.c.bf16 %v201_v24, %v196_v23  ;;  %v271_v46 = vpack.c.bf16 %v221_v40, %v216_v39  ;;  %v149_v23 = vunpack.c.l.bf16 %v74_v17  ;;  %v145_v24 = vunpack.c.h.bf16 %v71_v47 }
  0x47   :  { %v260_v26 = vpack.c.bf16 %v200_v22, %v195_v21  ;;  %v148_v21 = vunpack.c.h.bf16 %v1245_v11  ;;  %v144_v22 = vunpack.c.l.bf16 %v71_v47 }
  0x48   :  { %v229_v29 = vmax.f32 %v149_v23, 0.0  ;;  %v225_v30 = vmax.f32 %v145_v24, 0.0  ;;  %v1569_v24 = vld [vmem:[%s1649_s2] ss:$0 sm:$0xff] }
  0x49   :  { %v228_v28 = vmax.f32 %v148_v21, 0.0  ;;  %v224_v45 = vmax.f32 %v144_v22, 0.0 }
  0x51   :  { %680 = vmatmul.bf16.gmra.mxu1 %v248_v6  ;;  %729 = vmatmul.bf16.gmra.mxu2 %v249_v7  ;;  %v204_v6 = vmax.f32 %v124_v32, 0.0  ;;  %v209_v7 = vmax.f32 %v129_v33, 0.0 }
  0x53   :  { %778 = vmatmul.bf16.gmra.mxu3 %v250_v51  ;;  %827 = vmatmul.bf16.gmra.mxu0 %v251_v41  ;;  %v205_v51 = vmax.f32 %v125_v34, 0.0  ;;  %v210_v41 = vmax.f32 %v130_v35, 0.0  ;;  %v264_v12 = vpack.c.bf16 %v209_v7, %v204_v6  ;;  %v274_v35 = vpack.c.bf16 %v229_v29, %v224_v45  ;;  %v78_v6 = vld [vmem:[%s1648_s0 + $0x128] sm:$0xf]  ;;  %v81_v7 = vld [vmem:[%s1648_s0 + $0x13c] sm:$0xf] }
  0x54   :  { %v156_v54 = vunpack.c.l.bf16 %v78_v6  ;;  %v161_v56 = vunpack.c.l.bf16 %v81_v7 }
  0x55   :  { %v265_v53 = vpack.c.bf16 %v210_v41, %v205_v51 }
  0x56   :  { %v236_v63 = vmax.f32 %v156_v54, 0.0  ;;  %v241_v0 = vmax.f32 %v161_v56, 0.0 }
  0x61   :  { %685 = vmatmul.bf16.gmra.mxu1 %v253_v55  ;;  %734 = vmatmul.bf16.gmra.mxu2 %v254_v1  ;;  %v119_v55 = vunpack.c.l.bf16 %v56_v5  ;;  %v213_v1 = vmax.f32 %v133_v13, 0.0  ;;  %v233_v13 = vmax.f32 %v153_v42, 0.0 }
  0x63   :  { %783 = vmatmul.bf16.gmra.mxu3 %v255_v2  ;;  %832 = vmatmul.bf16.gmra.mxu0 %v256_v3  ;;  %v199_v20 = vmax.f32 %v119_v55, 0.0  ;;  %v218_v2 = vmax.f32 %v138_v58, 0.0  ;;  %v238_v58 = vmax.f32 %v158_v43, 0.0 }
  0x65   :  { %v259_v25 = vpack.c.bf16 %v199_v20, %v194_v19  ;;  %v268_v55 = vpack.c.bf16 %v218_v2, %v213_v1  ;;  %v75_v19 = vld [vmem:[%s1648_s0 + $0x114] sm:$0xf]  ;;  %v143_v20 = vunpack.c.h.bf16 %v1240_v10  ;;  %v278_v1 = vpack.c.bf16 %v238_v58, %v233_v13 }
  0x67   :  { %v223_v44 = vmax.f32 %v143_v20, 0.0 }
  0x69   :  { %v273_v34 = vpack.c.bf16 %v228_v28, %v223_v44 }
  0x71   :  { %690 = vmatmul.bf16.gmra.mxu1 %v258_v31  ;;  %739 = vmatmul.bf16.gmra.mxu2 %v259_v25  ;;  %v128_v31 = vunpack.c.h.bf16 %v1235_v9  ;;  %v65_v9 = vld [vmem:[%s1648_s0 + $0xd0] sm:$0xff]  ;;  %v150_v25 = vunpack.c.h.bf16 %v74_v17 }
  0x72   :  { %v134_v59 = vunpack.c.l.bf16 %v65_v9  ;;  %v135_v61 = vunpack.c.h.bf16 %v65_v9 }
  0x73   :  { %788 = vmatmul.bf16.gmra.mxu3 %v260_v26  ;;  %837 = vmatmul.bf16.gmra.mxu0 %v261_v27  ;;  %v208_v38 = vmax.f32 %v128_v31, 0.0  ;;  %v146_v26 = vunpack.c.l.bf16 %v72_v18  ;;  %v151_v27 = vunpack.c.l.bf16 %v75_v19  ;;  %v230_v31 = vmax.f32 %v150_v25, 0.0 }
  0x74   :  { %v214_v3 = vmax.f32 %v134_v59, 0.0  ;;  %v215_v5 = vmax.f32 %v135_v61, 0.0 }
  0x75   :  { %v263_v52 = vpack.c.bf16 %v208_v38, %v203_v37  ;;  %v226_v32 = vmax.f32 %v146_v26, 0.0  ;;  %v231_v33 = vmax.f32 %v151_v27, 0.0  ;;  %v275_v10 = vpack.c.bf16 %v230_v31, %v225_v30  ;;  %v77_v37 = vld [vmem:[%s1648_s0 + $0x120] sm:$0xff]  ;;  %v80_v38 = vld [vmem:[%s1648_s0 + $0x134] sm:$0xff] }
  0x76   :  { %v269_v15 = vpack.c.bf16 %v219_v4, %v214_v3  ;;  %v270_v16 = vpack.c.bf16 %v220_v14, %v215_v5  ;;  %v160_v9 = vunpack.c.h.bf16 %v80_v38  ;;  %v281_v5 = vpack.c.bf16 %v241_v0, %v236_v63 }
  0x77   :  { %v276_v11 = vpack.c.bf16 %v231_v33, %v226_v32 }
  0x78   :  { %v240_v62 = vmax.f32 %v160_v9, 0.0 }
  0x81   :  { %695 = vmatmul.bf16.gmra.mxu1 %v263_v52  ;;  %744 = vmatmul.bf16.gmra.mxu2 %v264_v12  ;;  %v154_v52 = vunpack.c.l.bf16 %v77_v37  ;;  %v159_v12 = vunpack.c.l.bf16 %v80_v38 }
  0x83   :  { %793 = vmatmul.bf16.gmra.mxu3 %v265_v53  ;;  %842 = vmatmul.bf16.gmra.mxu0 %v266_v8  ;;  %v155_v8 = vunpack.c.h.bf16 %v77_v37  ;;  %v234_v59 = vmax.f32 %v154_v52, 0.0  ;;  %v239_v60 = vmax.f32 %v159_v12, 0.0 }
  0x85   :  { %v235_v61 = vmax.f32 %v155_v8, 0.0  ;;  %v279_v2 = vpack.c.bf16 %v239_v60, %v234_v59 }
  0x87   :  { %v280_v4 = vpack.c.bf16 %v240_v62, %v235_v61 }
  0x91   :  { %700 = vmatmul.bf16.gmra.mxu1 %v268_v55  ;;  %749 = vmatmul.bf16.gmra.mxu2 %v269_v15 }
  0x93   :  { %798 = vmatmul.bf16.gmra.mxu3 %v270_v16  ;;  %847 = vmatmul.bf16.gmra.mxu0 %v271_v46 }
  0x9e   :  { %v1528_v50 = vpop.f32.mrf.mxu1 }
  0xa0   :  { %v627_v36 = vpop.f32.mrf.mxu0 }
  0xa1   :  { %705 = vmatmul.bf16.gmra.mxu1 %v273_v34  ;;  %754 = vmatmul.bf16.gmra.mxu2 %v274_v35 }
  0xa3   :  { %803 = vmatmul.bf16.gmra.mxu3 %v275_v10  ;;  %852 = vmatmul.bf16.gmra.mxu0 %v276_v11 }
  0xa4   :  { %v1542_v51 = vpop.f32.mrf.mxu2 }
  0xa6   :  { %v1544_v41 = vpop.f32.mrf.mxu3  ;;  %v1548_v53 = vpop.f32.mrf.mxu1 }
  0xa8   :  { %v629_v57 = vpop.f32.mrf.mxu0 }
  0xac   :  { %v1550_v48 = vpop.f32.mrf.mxu2 }
  0xae   :  { %v1552_v49 = vpop.f32.mrf.mxu3  ;;  %v1554_v3 = vpop.f32.mrf.mxu1 }
  0xb0   :  { %v632_v14 = vpop.f32.mrf.mxu0 }
  0xb1   :  { %710 = vmatmul.bf16.gmra.mxu1 %v278_v1  ;;  %759 = vmatmul.bf16.gmra.mxu2 %v279_v2 }
  0xb3   :  { %808 = vmatmul.bf16.gmra.mxu3 %v280_v4  ;;  %857 = vmatmul.bf16.gmra.mxu0 %v281_v5 }
  0xb4   :  { %v1556_v39 = vpop.f32.mrf.mxu2 }
  0xb6   :  { %v1558_v40 = vpop.f32.mrf.mxu3  ;;  %v1560_v55 = vpop.f32.mrf.mxu1 }
  0xb8   :  { %v634_v15 = vpop.f32.mrf.mxu0 }
  0xbc   :  { %v1562_v16 = vpop.f32.mrf.mxu2 }
  0xbe   :  { %v1564_v46 = vpop.f32.mrf.mxu3  ;;  %v676_v47 = vpop.f32.mrf.mxu1 }
  0xbf   :  { %v677_v18 = vadd.f32 %v676_v47, %v627_v36 }
  0xc0   :  { %v823_v17 = vpop.f32.mrf.mxu0 }
  0xc4   :  { %v725_v19 = vpop.f32.mrf.mxu2 }
  0xc5   :  { %v726_v20 = vadd.f32 %v725_v19, %v677_v18 }
  0xc6   :  { %v774_v21 = vpop.f32.mrf.mxu3  ;;  %v678_v22 = vpop.f32.mrf.mxu1 }
  0xc7   :  { %v775_v23 = vadd.f32 %v774_v21, %v726_v20  ;;  %v679_v44 = vadd.f32 %v678_v22, %v629_v57 }
  0xc8   :  { %v825_v25 = vpop.f32.mrf.mxu0 }
  0xc9   :  { %v824_v26 = vadd.f32 %v823_v17, %v775_v23 }
  0xcb   :  { %v918_v27 = vadd.f32 %v1569_v24, %v824_v26 }
  0xcc   :  { %v727_v28 = vpop.f32.mrf.mxu2 }
  0xcd   :  { %934 = vst [vmem:[%s1650_s3] sm:$0xff] %v918_v27  ;;  %v728_v45 = vadd.f32 %v727_v28, %v679_v44 }
  0xce   :  { %v776_v29 = vpop.f32.mrf.mxu3  ;;  %v681_v30 = vpop.f32.mrf.mxu1 }
  0xcf   :  { %v777_v31 = vadd.f32 %v776_v29, %v728_v45  ;;  %v682_v35 = vadd.f32 %v681_v30, %v632_v14 }
  0xd0   :  { %v828_v32 = vpop.f32.mrf.mxu0 }
  0xd1   :  { %v826_v33 = vadd.f32 %v825_v25, %v777_v31 }
  0xd3   :  { %v919_v34 = vadd.f32 %v1569_v24, %v826_v33 }
  0xd4   :  { %v730_v10 = vpop.f32.mrf.mxu2 }
  0xd5   :  { %935 = vst [vmem:[%s1650_s3 + $0x8] sm:$0xff] %v919_v34  ;;  %v731_v11 = vadd.f32 %v730_v10, %v682_v35 }
  0xd6   :  { %v779_v36 = vpop.f32.mrf.mxu3  ;;  %v683_v37 = vpop.f32.mrf.mxu1 }
  0xd7   :  { %v780_v38 = vadd.f32 %v779_v36, %v731_v11  ;;  %v684_v43 = vadd.f32 %v683_v37, %v634_v15 }
  0xd8   :  { %v830_v6 = vpop.f32.mrf.mxu0 }
  0xd9   :  { %v829_v7 = vadd.f32 %v828_v32, %v780_v38 }
  0xdb   :  { %v920_v42 = vadd.f32 %v1569_v24, %v829_v7 }
  0xdc   :  { %v732_v52 = vpop.f32.mrf.mxu2 }
  0xdd   :  { %936 = vst [vmem:[%s1650_s3 + $0x10] sm:$0xff] %v920_v42  ;;  %v733_v12 = vadd.f32 %v732_v52, %v684_v43 }
  0xde   :  { %v781_v8 = vpop.f32.mrf.mxu3  ;;  %v686_v9 = vpop.f32.mrf.mxu1 }
  0xdf   :  { %v782_v54 = vadd.f32 %v781_v8, %v733_v12  ;;  %v687_v58 = vadd.f32 %v686_v9, %v1528_v50 }
  0xe0   :  { %v833_v56 = vpop.f32.mrf.mxu0 }
  0xe1   :  { %v831_v57 = vadd.f32 %v830_v6, %v782_v54 }
  0xe3   :  { %v921_v13 = vadd.f32 %v1569_v24, %v831_v57 }
  0xe4   :  { %v735_v59 = vpop.f32.mrf.mxu2 }
  0xe5   :  { %937 = vst [vmem:[%s1650_s3 + $0x18] sm:$0xff] %v921_v13  ;;  %v736_v60 = vadd.f32 %v735_v59, %v687_v58 }
  0xe6   :  { %v784_v61 = vpop.f32.mrf.mxu3  ;;  %v688_v62 = vpop.f32.mrf.mxu1 }
  0xe7   :  { %v785_v63 = vadd.f32 %v784_v61, %v736_v60  ;;  %v689_v4 = vadd.f32 %v688_v62, %v1548_v53 }
  0xe8   :  { %v835_v0 = vpop.f32.mrf.mxu0 }
  0xe9   :  { %v834_v1 = vadd.f32 %v833_v56, %v785_v63 }
  0xeb   :  { %v922_v2 = vadd.f32 %v1569_v24, %v834_v1 }
  0xec   :  { %v737_v5 = vpop.f32.mrf.mxu2 }
  0xed   :  { %938 = vst [vmem:[%s1650_s3 + $0x20] sm:$0xff] %v922_v2  ;;  %v738_v50 = vadd.f32 %v737_v5, %v689_v4 }
  0xee   :  { %v786_v14 = vpop.f32.mrf.mxu3  ;;  %v691_v15 = vpop.f32.mrf.mxu1 }
  0xef   :  { %v787_v47 = vadd.f32 %v786_v14, %v738_v50  ;;  %v692_v20 = vadd.f32 %v691_v15, %v1554_v3 }
  0xf0   :  { %v838_v17 = vpop.f32.mrf.mxu0 }
  0xf1   :  { %v836_v18 = vadd.f32 %v835_v0, %v787_v47 }
  0xf3   :  { %v923_v19 = vadd.f32 %v1569_v24, %v836_v18 }
  0xf4   :  { %v740_v21 = vpop.f32.mrf.mxu2 }
  0xf5   :  { %939 = vst [vmem:[%s1650_s3 + $0x28] sm:$0xff] %v923_v19  ;;  %v741_v53 = vadd.f32 %v740_v21, %v692_v20 }
  0xf6   :  { %v789_v22 = vpop.f32.mrf.mxu3  ;;  %v693_v23 = vpop.f32.mrf.mxu1 }
  0xf7   :  { %v790_v25 = vadd.f32 %v789_v22, %v741_v53  ;;  %v694_v28 = vadd.f32 %v693_v23, %v1560_v55 }
  0xf8   :  { %v840_v26 = vpop.f32.mrf.mxu0 }
  0xf9   :  { %v839_v27 = vadd.f32 %v838_v17, %v790_v25 }
  0xfb   :  { %v924_v44 = vadd.f32 %v1569_v24, %v839_v27 }
  0xfc   :  { %v742_v45 = vpop.f32.mrf.mxu2 }
  0xfd   :  { %940 = vst [vmem:[%s1650_s3 + $0x30] sm:$0xff] %v924_v44  ;;  %v743_v3 = vadd.f32 %v742_v45, %v694_v28 }
  0xfe   :  { %v791_v29 = vpop.f32.mrf.mxu3  ;;  %v696_v30 = vpop.f32.mrf.mxu1 }
  0xff   :  { %v792_v31 = vadd.f32 %v791_v29, %v743_v3  ;;  %v697_v35 = vadd.f32 %v696_v30, %v1542_v51 }
 0x100   :  { %v843_v32 = vpop.f32.mrf.mxu0 }
 0x101   :  { %v841_v33 = vadd.f32 %v840_v26, %v792_v31 }
 0x103   :  { %v925_v34 = vadd.f32 %v1569_v24, %v841_v33 }
 0x104   :  { %v745_v10 = vpop.f32.mrf.mxu2 }
 0x105   :  { %941 = vst [vmem:[%s1650_s3 + $0x38] sm:$0xff] %v925_v34  ;;  %v746_v55 = vadd.f32 %v745_v10, %v697_v35 }
 0x106   :  { %v794_v11 = vpop.f32.mrf.mxu3  ;;  %v698_v36 = vpop.f32.mrf.mxu1 }
 0x107   :  { %v795_v37 = vadd.f32 %v794_v11, %v746_v55  ;;  %v699_v42 = vadd.f32 %v698_v36, %v1550_v48 }
 0x108   :  { %v845_v38 = vpop.f32.mrf.mxu0 }
 0x109   :  { %v844_v6 = vadd.f32 %v843_v32, %v795_v37 }
 0x10b   :  { %v926_v7 = vadd.f32 %v1569_v24, %v844_v6 }
 0x10c   :  { %v747_v43 = vpop.f32.mrf.mxu2 }
 0x10d   :  { %942 = vst [vmem:[%s1650_s3 + $0x40] sm:$0xff] %v926_v7  ;;  %v748_v51 = vadd.f32 %v747_v43, %v699_v42 }
 0x10e   :  { %v796_v52 = vpop.f32.mrf.mxu3  ;;  %v701_v12 = vpop.f32.mrf.mxu1 }
 0x10f   :  { %v797_v8 = vadd.f32 %v796_v52, %v748_v51  ;;  %v702_v57 = vadd.f32 %v701_v12, %v1556_v39 }
 0x110   :  { %v848_v9 = vpop.f32.mrf.mxu0 }
 0x111   :  { %v846_v54 = vadd.f32 %v845_v38, %v797_v8 }
 0x113   :  { %v927_v56 = vadd.f32 %v1569_v24, %v846_v54 }
 0x114   :  { %v750_v13 = vpop.f32.mrf.mxu2 }
 0x115   :  { %943 = vst [vmem:[%s1650_s3 + $0x48] sm:$0xff] %v927_v56  ;;  %v751_v48 = vadd.f32 %v750_v13, %v702_v57 }
 0x116   :  { %v799_v58 = vpop.f32.mrf.mxu3  ;;  %v703_v59 = vpop.f32.mrf.mxu1 }
 0x117   :  { %v800_v60 = vadd.f32 %v799_v58, %v751_v48  ;;  %v704_v0 = vadd.f32 %v703_v59, %v1562_v16 }
 0x118   :  { %v850_v61 = vpop.f32.mrf.mxu0 }
 0x119   :  { %v849_v62 = vadd.f32 %v848_v9, %v800_v60 }
 0x11b   :  { %v928_v63 = vadd.f32 %v1569_v24, %v849_v62 }
 0x11c   :  { %v752_v1 = vpop.f32.mrf.mxu2 }
 0x11d   :  { %944 = vst [vmem:[%s1650_s3 + $0x50] sm:$0xff] %v928_v63  ;;  %v753_v39 = vadd.f32 %v752_v1, %v704_v0 }
 0x11e   :  { %v801_v2 = vpop.f32.mrf.mxu3  ;;  %v706_v4 = vpop.f32.mrf.mxu1 }
 0x11f   :  { %v802_v5 = vadd.f32 %v801_v2, %v753_v39  ;;  %v707_v47 = vadd.f32 %v706_v4, %v1544_v41 }
 0x120   :  { %v853_v14 = vpop.f32.mrf.mxu0 }
 0x121   :  { %v851_v50 = vadd.f32 %v850_v61, %v802_v5 }
 0x123   :  { %v929_v15 = vadd.f32 %v1569_v24, %v851_v50 }
 0x124   :  { %v755_v17 = vpop.f32.mrf.mxu2 }
 0x125   :  { %945 = vst [vmem:[%s1650_s3 + $0x58] sm:$0xff] %v929_v15  ;;  %v756_v16 = vadd.f32 %v755_v17, %v707_v47 }
 0x126   :  { %v804_v18 = vpop.f32.mrf.mxu3  ;;  %v708_v19 = vpop.f32.mrf.mxu1 }
 0x127   :  { %v805_v20 = vadd.f32 %v804_v18, %v756_v16  ;;  %v709_v22 = vadd.f32 %v708_v19, %v1552_v49 }
 0x128   :  { %v855_v23 = vpop.f32.mrf.mxu0 }
 0x129   :  { %v854_v21 = vadd.f32 %v853_v14, %v805_v20 }
 0x12b   :  { %v930_v53 = vadd.f32 %v1569_v24, %v854_v21 }
 0x12c   :  { %v757_v25 = vpop.f32.mrf.mxu2 }
 0x12d   :  { %946 = vst [vmem:[%s1650_s3 + $0x60] sm:$0xff] %v930_v53  ;;  %v758_v41 = vadd.f32 %v757_v25, %v709_v22 }
 0x12e   :  { %v806_v26 = vpop.f32.mrf.mxu3  ;;  %v711_v27 = vpop.f32.mrf.mxu1 }
 0x12f   :  { %v807_v44 = vadd.f32 %v806_v26, %v758_v41  ;;  %v712_v3 = vadd.f32 %v711_v27, %v1558_v40 }
 0x130   :  { %v858_v31 = vpop.f32.mrf.mxu0 }
 0x131   :  { %v856_v28 = vadd.f32 %v855_v23, %v807_v44 }
 0x133   :  { %v931_v45 = vadd.f32 %v1569_v24, %v856_v28 }
 0x134   :  { %v760_v29 = vpop.f32.mrf.mxu2 }
 0x135   :  { %947 = vst [vmem:[%s1650_s3 + $0x68] sm:$0xff] %v931_v45  ;;  %v761_v49 = vadd.f32 %v760_v29, %v712_v3 }
 0x136   :  { %v809_v30 = vpop.f32.mrf.mxu3  ;;  %v713_v33 = vpop.f32.mrf.mxu1 }
 0x137   :  { %v810_v32 = vadd.f32 %v809_v30, %v761_v49  ;;  %v714_v10 = vadd.f32 %v713_v33, %v1564_v46 }
 0x138   :  { %v860_v37 = vpop.f32.mrf.mxu0 }
 0x139   :  { %v859_v34 = vadd.f32 %v858_v31, %v810_v32 }
 0x13b   :  { %v932_v35 = vadd.f32 %v1569_v24, %v859_v34 }
 0x13c   :  { %v762_v55 = vpop.f32.mrf.mxu2 }
 0x13d   :  { %948 = vst [vmem:[%s1650_s3 + $0x70] sm:$0xff] %v932_v35  ;;  %v763_v40 = vadd.f32 %v762_v55, %v714_v10 }
 0x13e   :  { %v811_v11 = vpop.f32.mrf.mxu3 }
 0x13f   :  { %v812_v36 = vadd.f32 %v811_v11, %v763_v40 }
 0x141   :  { %v861_v38 = vadd.f32 %v860_v37, %v812_v36 }
 0x143   :  { %v933_v6 = vadd.f32 %v1569_v24, %v861_v38 }
 0x145   :  { %949 = vst [vmem:[%s1650_s3 + $0x78] sm:$0xff] %v933_v6 }

// kernel: unet_forward.22
= control target key start
LH: loop header
LB: loop body
LE: loop exit
PB: predicated region body
PF: predicated region fallthrough
CT: control target
= control target key end

     0   :  { %vm70_vm0 = vcmask 130048   ;;  %s231_s0 = inlined_call_operand.vmem [shape: f32[128,16], index: 0, kind: input, shape index: {}]   ;;  %s232_s1 = inlined_call_operand.vmem [shape: f32[1,16], index: 1, kind: input, shape index: {}]   ;;  %s233_s2 = inlined_call_operand.vmem [shape: f32[1,16], index: 2, kind: input, shape index: {}]   ;;  %s234_s3 = inlined_call_operand.vmem [shape: f32[128,16], index: 3, kind: output, shape index: {}]  }
   0x1   :  { %v14_v0 = vld [vmem:[%s231_s0] sm:$0xff]  ;;  %v15_v3 = vld [vmem:[%s231_s0 + $0x8] sm:$0xff]  ;;  %v16_v6 = vld [vmem:[%s231_s0 + $0x10] sm:$0xff] }
   0x2   :  { %v91_v1 = vld [vmem:[%s232_s1] ss:$0 sm:$0xff]  ;;  %v17_v7 = vld [vmem:[%s231_s0 + $0x18] sm:$0xff]  ;;  %v19_v12 = vld [vmem:[%s231_s0 + $0x28] sm:$0xff] }
   0x3   :  { %v92_v2 = vld [vmem:[%s233_s2] ss:$0 sm:$0xff]  ;;  %v34_v4 = vmul.f32 %v91_v1, %v14_v0  ;;  %v35_v5 = vmul.f32 %v91_v1, %v15_v3  ;;  %v36_v9 = vmul.f32 %v91_v1, %v16_v6  ;;  %v37_v10 = vmul.f32 %v91_v1, %v17_v7  ;;  %v20_v13 = vld [vmem:[%s231_s0 + $0x30] sm:$0xff]  ;;  %v21_v14 = vld [vmem:[%s231_s0 + $0x38] sm:$0xff] }
   0x4   :  { %v18_v8 = vld [vmem:[%s231_s0 + $0x20] sm:$0xff]  ;;  %v39_v17 = vmul.f32 %v91_v1, %v19_v12  ;;  %v40_v18 = vmul.f32 %v91_v1, %v20_v13  ;;  %v23_v20 = vld [vmem:[%s231_s0 + $0x48] sm:$0xff]  ;;  %v41_v23 = vmul.f32 %v91_v1, %v21_v14  ;;  %v24_v24 = vld [vmem:[%s231_s0 + $0x50] sm:$0xff] }
   0x5   :  { %v38_v11 = vmul.f32 %v91_v1, %v18_v8  ;;  %v54_v15 = vadd.f32 %v92_v2, %v34_v4  ;;  %v55_v16 = vadd.f32 %v92_v2, %v35_v5  ;;  %v22_v19 = vld [vmem:[%s231_s0 + $0x40] sm:$0xff]  ;;  %v56_v21 = vadd.f32 %v92_v2, %v36_v9  ;;  %v25_v27 = vld [vmem:[%s231_s0 + $0x58] sm:$0xff]  ;;  %v27_v33 = vld [vmem:[%s231_s0 + $0x68] sm:$0xff] }
   0x6   :  { %v57_v22 = vadd.f32 %v92_v2, %v37_v10  ;;  %v42_v26 = vmul.f32 %v91_v1, %v22_v19  ;;  %v59_v28 = vadd.f32 %v92_v2, %v39_v17  ;;  %v43_v29 = vmul.f32 %v91_v1, %v23_v20  ;;  %v26_v30 = vld [vmem:[%s231_s0 + $0x60] sm:$0xff]  ;;  %v28_v36 = vld [vmem:[%s231_s0 + $0x70] sm:$0xff]  ;;  %v29_v39 = vld [vmem:[%s231_s0 + $0x78] sm:$0xff] }
   0x7   :  { %71 = vst.msk [vmem:[%s234_s3] sm:$0xff] %vm70_vm0, %v54_v15  ;;  %v58_v25 = vadd.f32 %v92_v2, %v38_v11  ;;  %v60_v31 = vadd.f32 %v92_v2, %v40_v18  ;;  %v44_v32 = vmul.f32 %v91_v1, %v24_v24  ;;  %v61_v34 = vadd.f32 %v92_v2, %v41_v23 }
   0x8   :  { %72 = vst.msk [vmem:[%s234_s3 + $0x8] sm:$0xff] %vm70_vm0, %v55_v16  ;;  %v45_v35 = vmul.f32 %v91_v1, %v25_v27  ;;  %v62_v37 = vadd.f32 %v92_v2, %v42_v26  ;;  %v46_v38 = vmul.f32 %v91_v1, %v26_v30  ;;  %v63_v40 = vadd.f32 %v92_v2, %v43_v29 }
   0x9   :  { %73 = vst.msk [vmem:[%s234_s3 + $0x10] sm:$0xff] %vm70_vm0, %v56_v21  ;;  %v47_v41 = vmul.f32 %v91_v1, %v27_v33  ;;  %v64_v42 = vadd.f32 %v92_v2, %v44_v32  ;;  %v48_v43 = vmul.f32 %v91_v1, %v28_v36  ;;  %v49_v45 = vmul.f32 %v91_v1, %v29_v39 }
   0xa   :  { %74 = vst.msk [vmem:[%s234_s3 + $0x18] sm:$0xff] %vm70_vm0, %v57_v22  ;;  %v65_v44 = vadd.f32 %v92_v2, %v45_v35  ;;  %v66_v46 = vadd.f32 %v92_v2, %v46_v38 }
   0xb   :  { %75 = vst.msk [vmem:[%s234_s3 + $0x20] sm:$0xff] %vm70_vm0, %v58_v25  ;;  %v67_v47 = vadd.f32 %v92_v2, %v47_v41  ;;  %v68_v48 = vadd.f32 %v92_v2, %v48_v43  ;;  %v69_v49 = vadd.f32 %v92_v2, %v49_v45 }
   0xc   :  { %76 = vst.msk [vmem:[%s234_s3 + $0x28] sm:$0xff] %vm70_vm0, %v59_v28 }
   0xd   :  { %77 = vst.msk [vmem:[%s234_s3 + $0x30] sm:$0xff] %vm70_vm0, %v60_v31 }
   0xe   :  { %78 = vst.msk [vmem:[%s234_s3 + $0x38] sm:$0xff] %vm70_vm0, %v61_v34 }
   0xf   :  { %79 = vst.msk [vmem:[%s234_s3 + $0x40] sm:$0xff] %vm70_vm0, %v62_v37 }
  0x10   :  { %80 = vst.msk [vmem:[%s234_s3 + $0x48] sm:$0xff] %vm70_vm0, %v63_v40 }
  0x11   :  { %81 = vst.msk [vmem:[%s234_s3 + $0x50] sm:$0xff] %vm70_vm0, %v64_v42 }
  0x12   :  { %82 = vst.msk [vmem:[%s234_s3 + $0x58] sm:$0xff] %vm70_vm0, %v65_v44 }
  0x13   :  { %83 = vst.msk [vmem:[%s234_s3 + $0x60] sm:$0xff] %vm70_vm0, %v66_v46 }
  0x14   :  { %84 = vst.msk [vmem:[%s234_s3 + $0x68] sm:$0xff] %vm70_vm0, %v67_v47 }
  0x15   :  { %85 = vst.msk [vmem:[%s234_s3 + $0x70] sm:$0xff] %vm70_vm0, %v68_v48 }
  0x16   :  { %86 = vst.msk [vmem:[%s234_s3 + $0x78] sm:$0xff] %vm70_vm0, %v69_v49 }

// kernel: unet_forward.21
= control target key start
LH: loop header
LB: loop body
LE: loop exit
PB: predicated region body
PF: predicated region fallthrough
CT: control target
= control target key end

     0   :  { %vm14_vm0 = vcmask 122880   ;;  %vm34_vm1 = vcmask 130048   ;;  %v140_v0 = vmov 0.0   ;;  %s258_s0 = inlined_call_operand.vmem [shape: f32[128,16], index: 0, kind: input, shape index: {}]   ;;  %s259_s1 = inlined_call_operand.vmem [shape: f32[1,16], index: 1, kind: output, shape index: {0}]   ;;  %s260_s2 = inlined_call_operand.vmem [shape: f32[1,16], index: 2, kind: output, shape index: {1}]  }
   0x1   :  { %15 = vst.msk [vmem:[%s259_s1] sm:$0x1] %vm14_vm0, %v140_v0  ;;  %v17_v1 = vld [vmem:[%s258_s0] sm:$0xff]  ;;  %v18_v2 = vld [vmem:[%s258_s0 + $0x8] sm:$0xff]  ;;  %v19_v3 = vld [vmem:[%s258_s0 + $0x10] sm:$0xff] }
   0x2   :  { %v35_v4 = vsel %vm34_vm1, %v17_v1, 0.0  ;;  %v36_v5 = vsel %vm34_vm1, %v18_v2, 0.0  ;;  %v38_v6 = vsel %vm34_vm1, %v19_v3, 0.0  ;;  %v20_v7 = vld [vmem:[%s258_s0 + $0x18] sm:$0xff]  ;;  %v21_v10 = vld [vmem:[%s258_s0 + $0x20] sm:$0xff]  ;;  %v22_v13 = vld [vmem:[%s258_s0 + $0x28] sm:$0xff]  ;;  %v76_v15 = vmul.f32 %v17_v1, %v17_v1 }
   0x3   :  { %v37_v8 = vadd.f32 %v36_v5, %v35_v4  ;;  %v40_v9 = vsel %vm34_vm1, %v20_v7, 0.0  ;;  %v42_v12 = vsel %vm34_vm1, %v21_v10, 0.0  ;;  %16 = vst.msk [vmem:[%s260_s2] sm:$0x1] %vm14_vm0, %v140_v0  ;;  %v77_v16 = vmul.f32 %v18_v2, %v18_v2  ;;  %v23_v19 = vld [vmem:[%s258_s0 + $0x30] sm:$0xff]  ;;  %v24_v24 = vld [vmem:[%s258_s0 + $0x38] sm:$0xff] }
   0x4   :  { %v78_v17 = vmul.f32 %v19_v3, %v19_v3  ;;  %v44_v18 = vsel %vm34_vm1, %v22_v13, 0.0  ;;  %v79_v21 = vmul.f32 %v20_v7, %v20_v7  ;;  %v46_v22 = vsel %vm34_vm1, %v23_v19, 0.0  ;;  %v25_v31 = vld [vmem:[%s258_s0 + $0x40] sm:$0xff]  ;;  %v26_v37 = vld [vmem:[%s258_s0 + $0x48] sm:$0xff]  ;;  %v27_v43 = vld [vmem:[%s258_s0 + $0x50] sm:$0xff] }
   0x5   :  { %v39_v11 = vadd.f32 %v38_v6, %v37_v8  ;;  %v80_v23 = vmul.f32 %v21_v10, %v21_v10  ;;  %v92_v26 = vsel %vm34_vm1, %v76_v15, 0.0  ;;  %v93_v27 = vsel %vm34_vm1, %v77_v16, 0.0  ;;  %v28_v49 = vld [vmem:[%s258_s0 + $0x58] sm:$0xff]  ;;  %v29_v55 = vld [vmem:[%s258_s0 + $0x60] sm:$0xff]  ;;  %v30_v61 = vld [vmem:[%s258_s0 + $0x68] sm:$0xff] }
   0x6   :  { %v95_v28 = vsel %vm34_vm1, %v78_v17, 0.0  ;;  %v48_v29 = vsel %vm34_vm1, %v24_v24, 0.0  ;;  %v94_v30 = vadd.f32 %v93_v27, %v92_v26  ;;  %v81_v33 = vmul.f32 %v22_v13, %v22_v13  ;;  %v31_v3 = vld [vmem:[%s258_s0 + $0x70] sm:$0xff] }
   0x7   :  { %v41_v14 = vadd.f32 %v40_v9, %v39_v11  ;;  %v97_v34 = vsel %vm34_vm1, %v79_v21, 0.0  ;;  %v50_v35 = vsel %vm34_vm1, %v25_v31, 0.0  ;;  %v82_v39 = vmul.f32 %v23_v19, %v23_v19  ;;  %v32_v9 = vld [vmem:[%s258_s0 + $0x78] sm:$0xff] }
   0x8   :  { %v96_v36 = vadd.f32 %v95_v28, %v94_v30  ;;  %v99_v40 = vsel %vm34_vm1, %v80_v23, 0.0  ;;  %v52_v41 = vsel %vm34_vm1, %v26_v37, 0.0  ;;  %v83_v45 = vmul.f32 %v24_v24, %v24_v24 }
   0x9   :  { %v43_v20 = vadd.f32 %v42_v12, %v41_v14  ;;  %v101_v46 = vsel %vm34_vm1, %v81_v33, 0.0  ;;  %v54_v47 = vsel %vm34_vm1, %v27_v43, 0.0  ;;  %v84_v51 = vmul.f32 %v25_v31, %v25_v31 }
   0xa   :  { %v98_v42 = vadd.f32 %v97_v34, %v96_v36  ;;  %v103_v52 = vsel %vm34_vm1, %v82_v39, 0.0  ;;  %v56_v53 = vsel %vm34_vm1, %v28_v49, 0.0  ;;  %v85_v57 = vmul.f32 %v26_v37, %v26_v37  ;;  %v33_v36 = vld [vmem:[%s259_s1] sm:$0x1] }
   0xb   :  { %v45_v25 = vadd.f32 %v44_v18, %v43_v20  ;;  %v105_v58 = vsel %vm34_vm1, %v83_v45, 0.0  ;;  %v58_v59 = vsel %vm34_vm1, %v29_v55, 0.0  ;;  %v86_v63 = vmul.f32 %v27_v43, %v27_v43 }
   0xc   :  { %v100_v48 = vadd.f32 %v99_v40, %v98_v42  ;;  %v107_v0 = vsel %vm34_vm1, %v84_v51, 0.0  ;;  %v60_v1 = vsel %vm34_vm1, %v30_v61, 0.0  ;;  %v87_v5 = vmul.f32 %v28_v49, %v28_v49 }
   0xd   :  { %v47_v32 = vadd.f32 %v46_v22, %v45_v25  ;;  %v109_v6 = vsel %vm34_vm1, %v85_v57, 0.0  ;;  %v62_v7 = vsel %vm34_vm1, %v31_v3, 0.0  ;;  %v88_v11 = vmul.f32 %v29_v55, %v29_v55 }
   0xe   :  { %v102_v54 = vadd.f32 %v101_v46, %v100_v48  ;;  %v111_v12 = vsel %vm34_vm1, %v86_v63, 0.0  ;;  %v64_v13 = vsel %vm34_vm1, %v32_v9, 0.0  ;;  %v89_v16 = vmul.f32 %v30_v61, %v30_v61 }
   0xf   :  { %v49_v38 = vadd.f32 %v48_v29, %v47_v32  ;;  %v113_v17 = vsel %vm34_vm1, %v87_v5, 0.0  ;;  %v90_v20 = vmul.f32 %v31_v3, %v31_v3  ;;  %v115_v21 = vsel %vm34_vm1, %v88_v11, 0.0 }
  0x10   :  { %v104_v60 = vadd.f32 %v103_v52, %v102_v54  ;;  %v91_v24 = vmul.f32 %v32_v9, %v32_v9  ;;  %v117_v25 = vsel %vm34_vm1, %v89_v16, 0.0 }
  0x11   :  { %v51_v44 = vadd.f32 %v50_v35, %v49_v38  ;;  %v119_v28 = vsel %vm34_vm1, %v90_v20, 0.0 }
  0x12   :  { %v106_v2 = vadd.f32 %v105_v58, %v104_v60  ;;  %v121_v31 = vsel %vm34_vm1, %v91_v24, 0.0 }
  0x13   :  { %v53_v50 = vadd.f32 %v52_v41, %v51_v44  ;;  %v75_v44 = vld [vmem:[%s260_s2] sm:$0x1] }
  0x14   :  { %v108_v8 = vadd.f32 %v107_v0, %v106_v2 }
  0x15   :  { %v55_v56 = vadd.f32 %v54_v47, %v53_v50 }
  0x16   :  { %v110_v14 = vadd.f32 %v109_v6, %v108_v8 }
  0x17   :  { %v57_v62 = vadd.f32 %v56_v53, %v55_v56 }
  0x18   :  { %v112_v18 = vadd.f32 %v111_v12, %v110_v14 }
  0x19   :  { %v59_v4 = vadd.f32 %v58_v59, %v57_v62 }
  0x1a   :  { %v114_v22 = vadd.f32 %v113_v17, %v112_v18 }
  0x1b   :  { %v61_v10 = vadd.f32 %v60_v1, %v59_v4 }
  0x1c   :  { %v116_v26 = vadd.f32 %v115_v21, %v114_v22 }
  0x1d   :  { %v63_v15 = vadd.f32 %v62_v7, %v61_v10 }
  0x1e   :  { %v118_v29 = vadd.f32 %v117_v25, %v116_v26 }
  0x1f   :  { %v65_v19 = vadd.f32 %v64_v13, %v63_v15 }
  0x20   :  { %v120_v32 = vadd.f32 %v119_v28, %v118_v29 }
  0x21   :  { %v66_v23 = vrot.slane %v65_v19, 4 }
  0x22   :  { %v122_v34 = vadd.f32 %v121_v31, %v120_v32 }
  0x23   :  { %v67_v27 = vadd.f32 %v66_v23, %v65_v19 }
  0x24   :  { %v123_v37 = vrot.slane %v122_v34, 4 }
  0x25   :  { %v68_v30 = vrot.slane %v67_v27, 2 }
  0x26   :  { %v124_v39 = vadd.f32 %v123_v37, %v122_v34 }
  0x27   :  { %v69_v33 = vadd.f32 %v68_v30, %v67_v27 }
  0x28   :  { %v125_v41 = vrot.slane %v124_v39, 2 }
  0x29   :  { %v70_v35 = vrot.slane %v69_v33, 1 }
  0x2a   :  { %v126_v42 = vadd.f32 %v125_v41, %v124_v39 }
  0x2b   :  { %v71_v38 = vadd.f32 %v70_v35, %v69_v33 }
  0x2c   :  { %v127_v43 = vrot.slane %v126_v42, 1 }
  0x2d   :  { %v72_v40 = vadd.f32 %v71_v38, %v33_v36 }
  0x2e   :  { %v128_v45 = vadd.f32 %v127_v43, %v126_v42 }
  0x2f   :  { %74 = vst.msk [vmem:[%s259_s1] sm:$0x1] %vm14_vm0, %v72_v40 }
  0x30   :  { %v129_v46 = vadd.f32 %v128_v45, %v75_v44 }
  0x32   :  { %130 = vst.msk [vmem:[%s260_s2] sm:$0x1] %vm14_vm0, %v129_v46 }

// kernel: unet_forward.23
= control target key start
LH: loop header
LB: loop body
LE: loop exit
PB: predicated region body
PF: predicated region fallthrough
CT: control target
= control target key end

     0   :  { %s1174_s1 = inlined_call_operand.vmem [shape: bf16[384,128], index: 1, kind: input, shape index: {}]   ;;  %s1175_s0 = inlined_call_operand.vmem [shape: bf16[128,384], index: 0, kind: input, shape index: {}]   ;;  %s1176_s2 = inlined_call_operand.vmem [shape: f32[1,128], index: 2, kind: input, shape index: {}]   ;;  %s1177_s3 = inlined_call_operand.vmem [shape: f32[128,128], index: 3, kind: output, shape index: {}]  }
   0x1   :  { %v751_v0 = vld [vmem:[%s1174_s1 + $0x38] sm:$0xff]  ;;  %v750_v3 = vld [vmem:[%s1174_s1 + $0x30] sm:$0xff]  ;;  %v749_v6 = vld [vmem:[%s1174_s1 + $0x28] sm:$0xff] }
   0x2   :  { %v851_v1 = vld [vmem:[%s1174_s1 + $0x78] sm:$0xff]  ;;  %394 = vmatpush.bf16.msra.mxu0 %v751_v0  ;;  %768 = vmatpush.bf16.msra.mxu3 %v751_v0  ;;  %v866_v4 = vld [vmem:[%s1174_s1 + $0x70] sm:$0xff]  ;;  %v881_v7 = vld [vmem:[%s1174_s1 + $0x68] sm:$0xff] }
   0x3   :  { %v856_v2 = vld [vmem:[%s1174_s1 + $0xb8] sm:$0xff]  ;;  %443 = vmatpush.bf16.msra.mxu1 %v851_v1  ;;  %v871_v5 = vld [vmem:[%s1174_s1 + $0xb0] sm:$0xff]  ;;  %v886_v8 = vld [vmem:[%s1174_s1 + $0xa8] sm:$0xff] }
   0x4   :  { %492 = vmatpush.bf16.msra.mxu2 %v856_v2  ;;  %v748_v9 = vld [vmem:[%s1174_s1 + $0x20] sm:$0xff]  ;;  %v747_v12 = vld [vmem:[%s1174_s1 + $0x18] sm:$0xff]  ;;  %v746_v15 = vld [vmem:[%s1174_s1 + $0x10] sm:$0xff] }
   0x5   :  { %v896_v10 = vld [vmem:[%s1174_s1 + $0x60] sm:$0xff]  ;;  %v911_v13 = vld [vmem:[%s1174_s1 + $0x58] sm:$0xff]  ;;  %v924_v16 = vld [vmem:[%s1174_s1 + $0x50] sm:$0xff] }
   0x6   :  { %395 = vmatpush.bf16.msra.mxu0 %v750_v3  ;;  %769 = vmatpush.bf16.msra.mxu3 %v750_v3  ;;  %v901_v11 = vld [vmem:[%s1174_s1 + $0xa0] sm:$0xff]  ;;  %v916_v14 = vld [vmem:[%s1174_s1 + $0x98] sm:$0xff]  ;;  %v36_v18 = vld [vmem:[%s1175_s0 + $0xc] sm:$0xff] }
   0x7   :  { %444 = vmatpush.bf16.msra.mxu1 %v866_v4  ;;  %v34_v17 = vld [vmem:[%s1175_s0] sm:$0xff]  ;;  %v935_v19 = vld [vmem:[%s1175_s0 + $0x90] sm:$0xff]  ;;  %v35_v22 = vld [vmem:[%s1175_s0 + $0x8] sm:$0xf]  ;;  %v69_v25 = vunpack.c.l.bf16 %v36_v18  ;;  %v70_v30 = vunpack.c.h.bf16 %v36_v18 }
   0x8   :  { %493 = vmatpush.bf16.msra.mxu2 %v871_v5  ;;  %v940_v20 = vld [vmem:[%s1175_s0 + $0x9c] sm:$0xff]  ;;  %v947_v21 = vld [vmem:[%s1174_s1 + $0x90] sm:$0xff]  ;;  %v66_v24 = vunpack.c.l.bf16 %v34_v17  ;;  %v102_v26 = vunpack.c.l.bf16 %v935_v19  ;;  %v745_v28 = vld [vmem:[%s1174_s1 + $0x8] sm:$0xff]  ;;  %v67_v29 = vunpack.c.h.bf16 %v34_v17  ;;  %v68_v31 = vunpack.c.l.bf16 %v35_v22 }
   0x9   :  { %v37_v23 = vld [vmem:[%s1175_s0 + $0x14] sm:$0xf]  ;;  %v105_v27 = vunpack.c.l.bf16 %v940_v20  ;;  %v965_v33 = vld [vmem:[%s1174_s1 + $0x48] sm:$0xff]  ;;  %v117_v36 = vmax.f32 %v69_v25, 0.0  ;;  %v744_v39 = vld [vmem:[%s1174_s1] sm:$0xff]  ;;  %v118_v41 = vmax.f32 %v70_v30, 0.0  ;;  %v103_v25 = vunpack.c.h.bf16 %v935_v19 }
   0xa   :  { %396 = vmatpush.bf16.msra.mxu0 %v749_v6  ;;  %770 = vmatpush.bf16.msra.mxu3 %v749_v6  ;;  %v71_v32 = vunpack.c.l.bf16 %v37_v23  ;;  %v970_v34 = vld [vmem:[%s1174_s1 + $0x88] sm:$0xff]  ;;  %v114_v35 = vmax.f32 %v66_v24, 0.0  ;;  %v150_v37 = vmax.f32 %v102_v26, 0.0  ;;  %v115_v40 = vmax.f32 %v67_v29, 0.0  ;;  %v980_v44 = vld [vmem:[%s1174_s1 + $0x40] sm:$0xff]  ;;  %v38_v50 = vld [vmem:[%s1175_s0 + $0x18] sm:$0xff] }
   0xb   :  { %445 = vmatpush.bf16.msra.mxu1 %v881_v7  ;;  %v153_v38 = vmax.f32 %v105_v27, 0.0  ;;  %v116_v42 = vmax.f32 %v68_v31, 0.0  ;;  %v985_v45 = vld [vmem:[%s1174_s1 + $0x80] sm:$0xff]  ;;  %v999_v52 = vld [vmem:[%s1175_s0 + $0xa8] sm:$0xff]  ;;  %v1004_v53 = vld [vmem:[%s1175_s0 + $0xb4] sm:$0xff]  ;;  %v72_v56 = vunpack.c.l.bf16 %v38_v50  ;;  %v73_v60 = vunpack.c.h.bf16 %v38_v50 }
   0xc   :  { %494 = vmatpush.bf16.msra.mxu2 %v886_v8  ;;  %v119_v43 = vmax.f32 %v71_v32, 0.0  ;;  %v162_v46 = vpack.c.bf16 %v117_v36, %v114_v35  ;;  %v163_v48 = vpack.c.bf16 %v118_v41, %v115_v40  ;;  %v40_v51 = vld [vmem:[%s1175_s0 + $0x24] sm:$0xff]  ;;  %v39_v54 = vld [vmem:[%s1175_s0 + $0x20] sm:$0xf]  ;;  %v41_v55 = vld [vmem:[%s1175_s0 + $0x2c] sm:$0xf]  ;;  %v108_v58 = vunpack.c.l.bf16 %v999_v52 }
   0xd   :  { %v180_v47 = vpack.c.bf16 %v153_v38, %v150_v37  ;;  %v75_v57 = vunpack.c.l.bf16 %v40_v51  ;;  %v111_v59 = vunpack.c.l.bf16 %v1004_v53  ;;  %v76_v61 = vunpack.c.h.bf16 %v40_v51  ;;  %v44_v24 = vld [vmem:[%s1175_s0 + $0x3c] sm:$0xff] }
   0xe   :  { %397 = vmatpush.bf16.msra.mxu0 %v748_v9  ;;  %771 = vmatpush.bf16.msra.mxu3 %v748_v9  ;;  %v164_v49 = vpack.c.bf16 %v119_v43, %v116_v42  ;;  %v74_v62 = vunpack.c.l.bf16 %v39_v54  ;;  %v77_v63 = vunpack.c.l.bf16 %v41_v55  ;;  %v120_v0 = vmax.f32 %v72_v56, 0.0 }
   0xf   :  { %446 = vmatpush.bf16.msra.mxu1 %v896_v10  ;;  %v156_v3 = vmax.f32 %v108_v58, 0.0  ;;  %v159_v6 = vmax.f32 %v111_v59, 0.0  ;;  %v121_v9 = vmax.f32 %v73_v60, 0.0  ;;  %v106_v26 = vunpack.c.h.bf16 %v940_v20 }
  0x10   :  { %495 = vmatpush.bf16.msra.mxu2 %v901_v11  ;;  %v82_v30 = vunpack.c.h.bf16 %v44_v24  ;;  %v151_v37 = vmax.f32 %v103_v25, 0.0  ;;  %v112_v50 = vunpack.c.h.bf16 %v1004_v53 }
  0x11   :  { %v183_v18 = vpack.c.bf16 %v159_v6, %v156_v3  ;;  %v154_v38 = vmax.f32 %v106_v26, 0.0  ;;  %v52_v3 = vld [vmem:[%s1175_s0 + $0x6c] sm:$0xff]  ;;  %v51_v6 = vld [vmem:[%s1175_s0 + $0x68] sm:$0xf] }
  0x12   :  { %398 = vmatpush.bf16.msra.mxu0 %v747_v12  ;;  %772 = vmatpush.bf16.msra.mxu3 %v747_v12  ;;  %v124_v12 = vmax.f32 %v76_v61, 0.0  ;;  %v130_v40 = vmax.f32 %v82_v30, 0.0  ;;  %v160_v59 = vmax.f32 %v112_v50, 0.0 }
  0x13   :  { %447 = vmatpush.bf16.msra.mxu1 %v911_v13  ;;  %v181_v20 = vpack.c.bf16 %v154_v38, %v151_v37  ;;  %v55_v37 = vld [vmem:[%s1175_s0 + $0x80] sm:$0xf]  ;;  %v57_v38 = vld [vmem:[%s1175_s0 + $0x8c] sm:$0xf] }
  0x14   :  { %496 = vmatpush.bf16.msra.mxu2 %v916_v14  ;;  %v166_v22 = vpack.c.bf16 %v124_v12, %v121_v9  ;;  %v53_v9 = vld [vmem:[%s1175_s0 + $0x74] sm:$0xf] }
  0x16   :  { %399 = vmatpush.bf16.msra.mxu0 %v746_v15  ;;  %773 = vmatpush.bf16.msra.mxu3 %v746_v15  ;;  %v122_v15 = vmax.f32 %v74_v62, 0.0 }
  0x17   :  { %448 = vmatpush.bf16.msra.mxu1 %v924_v16 }
  0x18   :  { %497 = vmatpush.bf16.msra.mxu2 %v947_v21 }
  0x1a   :  { %400 = vmatpush.bf16.msra.mxu0 %v745_v28  ;;  %774 = vmatpush.bf16.msra.mxu3 %v745_v28  ;;  %v81_v28 = vunpack.c.l.bf16 %v44_v24 }
  0x1b   :  { %449 = vmatpush.bf16.msra.mxu1 %v965_v33 }
  0x1c   :  { %498 = vmatpush.bf16.msra.mxu2 %v970_v34  ;;  %v129_v36 = vmax.f32 %v81_v28, 0.0 }
  0x1e   :  { %401 = vmatpush.bf16.msra.mxu0 %v744_v39  ;;  %775 = vmatpush.bf16.msra.mxu3 %v744_v39 }
  0x1f   :  { %450 = vmatpush.bf16.msra.mxu1 %v980_v44 }
  0x20   :  { %499 = vmatpush.bf16.msra.mxu2 %v985_v45 }
  0x21   :  { %402 = vmatmul.bf16.vlgmr.msra.gmra.mxu0 %v162_v46  ;;  %432 = vmatmul.bf16.vlgmr.msra.gmra.mxu3 %v180_v47  ;;  %v48_v46 = vld [vmem:[%s1175_s0 + $0x54] sm:$0xff] }
  0x22   :  { %776 = vmatpush.bf16.msrb.mxu3 %v851_v1  ;;  %451 = vmatmul.bf16.vlgmr.msra.gmra.mxu1 %v163_v48  ;;  %v123_v1 = vmax.f32 %v75_v57, 0.0  ;;  %v87_v48 = vunpack.c.l.bf16 %v48_v46  ;;  %v88_v54 = vunpack.c.h.bf16 %v48_v46 }
  0x23   :  { %500 = vmatmul.bf16.vlgmr.msra.gmra.mxu2 %v164_v49  ;;  %v109_v49 = vunpack.c.h.bf16 %v999_v52 }
  0x24   :  { %v165_v17 = vpack.c.bf16 %v123_v1, %v120_v0  ;;  %v135_v57 = vmax.f32 %v87_v48, 0.0  ;;  %v136_v61 = vmax.f32 %v88_v54, 0.0 }
  0x25   :  { %v157_v58 = vmax.f32 %v109_v49, 0.0 }
  0x26   :  { %777 = vmatpush.bf16.msrb.mxu3 %v866_v4  ;;  %v125_v4 = vmax.f32 %v77_v63, 0.0 }
  0x27   :  { %v184_v52 = vpack.c.bf16 %v160_v59, %v157_v58 }
  0x28   :  { %v167_v23 = vpack.c.bf16 %v125_v4, %v122_v15  ;;  %v93_v15 = vunpack.c.l.bf16 %v52_v3 }
  0x2a   :  { %778 = vmatpush.bf16.msrb.mxu3 %v881_v7  ;;  %v42_v7 = vld [vmem:[%s1175_s0 + $0x30] sm:$0xff] }
  0x2b   :  { %v78_v27 = vunpack.c.l.bf16 %v42_v7  ;;  %v79_v29 = vunpack.c.h.bf16 %v42_v7  ;;  %v95_v7 = vunpack.c.l.bf16 %v53_v9 }
  0x2d   :  { %v126_v35 = vmax.f32 %v78_v27, 0.0  ;;  %v127_v39 = vmax.f32 %v79_v29, 0.0  ;;  %v143_v28 = vmax.f32 %v95_v7, 0.0 }
  0x2e   :  { %779 = vmatpush.bf16.msrb.mxu3 %v896_v10  ;;  %v43_v10 = vld [vmem:[%s1175_s0 + $0x38] sm:$0xf] }
  0x2f   :  { %v80_v31 = vunpack.c.l.bf16 %v43_v10  ;;  %v168_v19 = vpack.c.bf16 %v129_v36, %v126_v35  ;;  %v169_v42 = vpack.c.bf16 %v130_v40, %v127_v39  ;;  %v56_v35 = vld [vmem:[%s1175_s0 + $0x84] sm:$0xff]  ;;  %v65_v36 = vld [vmem:[%s1175_s0 + $0xbc] sm:$0xf] }
  0x30   :  { %v99_v40 = vunpack.c.l.bf16 %v56_v35 }
  0x31   :  { %407 = vmatmul.bf16.gmra.mxu0 %v165_v17  ;;  %437 = vmatmul.bf16.gmra.mxu3 %v183_v18  ;;  %v128_v41 = vmax.f32 %v80_v31, 0.0 }
  0x32   :  { %780 = vmatpush.bf16.msrb.mxu3 %v911_v13  ;;  %456 = vmatmul.bf16.gmra.mxu1 %v166_v22  ;;  %v45_v13 = vld [vmem:[%s1175_s0 + $0x44] sm:$0xf]  ;;  %v94_v22 = vunpack.c.h.bf16 %v52_v3  ;;  %v147_v46 = vmax.f32 %v99_v40, 0.0 }
  0x33   :  { %505 = vmatmul.bf16.gmra.mxu2 %v167_v23  ;;  %v83_v32 = vunpack.c.l.bf16 %v45_v13  ;;  %v92_v23 = vunpack.c.l.bf16 %v51_v6 }
  0x34   :  { %v142_v26 = vmax.f32 %v94_v22, 0.0 }
  0x35   :  { %v140_v27 = vmax.f32 %v92_v23, 0.0 }
  0x36   :  { %781 = vmatpush.bf16.msrb.mxu3 %v924_v16  ;;  %v131_v16 = vmax.f32 %v83_v32, 0.0 }
  0x37   :  { %v176_v32 = vpack.c.bf16 %v143_v28, %v140_v27 }
  0x38   :  { %v170_v43 = vpack.c.bf16 %v131_v16, %v128_v41  ;;  %v113_v16 = vunpack.c.l.bf16 %v65_v36 }
  0x3a   :  { %782 = vmatpush.bf16.msrb.mxu3 %v965_v33  ;;  %v46_v33 = vld [vmem:[%s1175_s0 + $0x48] sm:$0xff] }
  0x3b   :  { %v84_v47 = vunpack.c.l.bf16 %v46_v33  ;;  %v85_v51 = vunpack.c.h.bf16 %v46_v33 }
  0x3d   :  { %v133_v60 = vmax.f32 %v85_v51, 0.0 }
  0x3e   :  { %783 = vmatpush.bf16.msrb.mxu3 %v980_v44  ;;  %v49_v44 = vld [vmem:[%s1175_s0 + $0x5c] sm:$0xf] }
  0x3f   :  { %v89_v56 = vunpack.c.l.bf16 %v49_v44  ;;  %v172_v1 = vpack.c.bf16 %v136_v61, %v133_v60  ;;  %v161_v44 = vmax.f32 %v113_v16, 0.0  ;;  %v1098_v60 = vld [vmem:[%s1176_s2] ss:$0 sm:$0xff] }
  0x41   :  { %412 = vmatmul.bf16.gmra.mxu0 %v168_v19  ;;  %481 = vmatmul.bf16.vlgmr.msrb.gmra.mxu3 %v181_v20  ;;  %v137_v63 = vmax.f32 %v89_v56, 0.0  ;;  %v100_v20 = vunpack.c.h.bf16 %v56_v35 }
  0x42   :  { %784 = vmatpush.bf16.msra.mxu3 %v856_v2  ;;  %461 = vmatmul.bf16.gmra.mxu1 %v169_v42  ;;  %v47_v2 = vld [vmem:[%s1175_s0 + $0x50] sm:$0xf]  ;;  %v98_v42 = vunpack.c.l.bf16 %v55_v37 }
  0x43   :  { %510 = vmatmul.bf16.gmra.mxu2 %v170_v43  ;;  %v86_v55 = vunpack.c.l.bf16 %v47_v2  ;;  %v101_v43 = vunpack.c.l.bf16 %v57_v38  ;;  %v148_v48 = vmax.f32 %v100_v20, 0.0 }
  0x44   :  { %v146_v49 = vmax.f32 %v98_v42, 0.0 }
  0x45   :  { %v134_v62 = vmax.f32 %v86_v55, 0.0  ;;  %v149_v50 = vmax.f32 %v101_v43, 0.0 }
  0x46   :  { %785 = vmatpush.bf16.msra.mxu3 %v871_v5  ;;  %v132_v5 = vmax.f32 %v84_v47, 0.0 }
  0x47   :  { %v173_v53 = vpack.c.bf16 %v137_v63, %v134_v62  ;;  %v179_v56 = vpack.c.bf16 %v149_v50, %v146_v49 }
  0x48   :  { %v171_v0 = vpack.c.bf16 %v135_v57, %v132_v5 }
  0x4a   :  { %786 = vmatpush.bf16.msra.mxu3 %v886_v8  ;;  %v50_v8 = vld [vmem:[%s1175_s0 + $0x60] sm:$0xff] }
  0x4b   :  { %v90_v12 = vunpack.c.l.bf16 %v50_v8  ;;  %v91_v18 = vunpack.c.h.bf16 %v50_v8 }
  0x4d   :  { %v138_v24 = vmax.f32 %v90_v12, 0.0  ;;  %v139_v25 = vmax.f32 %v91_v18, 0.0 }
  0x4e   :  { %787 = vmatpush.bf16.msra.mxu3 %v901_v11  ;;  %v59_v11 = vld [vmem:[%s1175_s0 + $0x98] sm:$0xf] }
  0x4f   :  { %v104_v4 = vunpack.c.l.bf16 %v59_v11  ;;  %v175_v31 = vpack.c.bf16 %v142_v26, %v139_v25 }
  0x51   :  { %417 = vmatmul.bf16.gmra.mxu0 %v171_v0  ;;  %486 = vmatmul.bf16.gmra.mxu3 %v184_v52  ;;  %v152_v10 = vmax.f32 %v104_v4, 0.0 }
  0x52   :  { %788 = vmatpush.bf16.msra.mxu3 %v916_v14  ;;  %466 = vmatmul.bf16.gmra.mxu1 %v172_v1  ;;  %v61_v14 = vld [vmem:[%s1175_s0 + $0xa4] sm:$0xf] }
  0x53   :  { %515 = vmatmul.bf16.gmra.mxu2 %v173_v53  ;;  %v107_v17 = vunpack.c.l.bf16 %v61_v14 }
  0x55   :  { %v155_v13 = vmax.f32 %v107_v17, 0.0 }
  0x56   :  { %789 = vmatpush.bf16.msra.mxu3 %v947_v21  ;;  %v141_v21 = vmax.f32 %v93_v15, 0.0 }
  0x57   :  { %v182_v30 = vpack.c.bf16 %v155_v13, %v152_v10 }
  0x58   :  { %v174_v29 = vpack.c.bf16 %v141_v21, %v138_v24 }
  0x5a   :  { %790 = vmatpush.bf16.msra.mxu3 %v970_v34  ;;  %v54_v34 = vld [vmem:[%s1175_s0 + $0x78] sm:$0xff] }
  0x5b   :  { %v96_v39 = vunpack.c.l.bf16 %v54_v34  ;;  %v97_v19 = vunpack.c.h.bf16 %v54_v34 }
  0x5d   :  { %v144_v33 = vmax.f32 %v96_v39, 0.0  ;;  %v145_v47 = vmax.f32 %v97_v19, 0.0 }
  0x5e   :  { %791 = vmatpush.bf16.msra.mxu3 %v985_v45  ;;  %v63_v45 = vld [vmem:[%s1175_s0 + $0xb0] sm:$0xf] }
  0x5f   :  { %v110_v41 = vunpack.c.l.bf16 %v63_v45  ;;  %v177_v51 = vpack.c.bf16 %v147_v46, %v144_v33  ;;  %v178_v55 = vpack.c.bf16 %v148_v48, %v145_v47 }
  0x61   :  { %422 = vmatmul.bf16.gmra.mxu0 %v174_v29  ;;  %530 = vmatmul.bf16.vlgmr.msra.gmra.mxu3 %v182_v30  ;;  %v158_v2 = vmax.f32 %v110_v41, 0.0 }
  0x62   :  { %471 = vmatmul.bf16.gmra.mxu1 %v175_v31 }
  0x63   :  { %520 = vmatmul.bf16.gmra.mxu2 %v176_v32  ;;  %v185_v54 = vpack.c.bf16 %v161_v44, %v158_v2 }
  0x71   :  { %427 = vmatmul.bf16.gmra.mxu0 %v177_v51  ;;  %535 = vmatmul.bf16.gmra.mxu3 %v185_v54 }
  0x72   :  { %476 = vmatmul.bf16.gmra.mxu1 %v178_v55 }
  0x73   :  { %525 = vmatmul.bf16.gmra.mxu2 %v179_v56 }
  0x9e   :  { %v403_v5 = vpop.f32.mrf.mxu0 }
  0x9f   :  { %v452_v57 = vpop.f32.mrf.mxu1 }
  0xa0   :  { %v453_v58 = vadd.f32 %v452_v57, %v403_v5 }
  0xa4   :  { %v1093_v59 = vpop.f32.mrf.mxu3 }
  0xa6   :  { %v501_v61 = vpop.f32.mrf.mxu2  ;;  %v405_v63 = vpop.f32.mrf.mxu0 }
  0xa7   :  { %v502_v62 = vadd.f32 %v501_v61, %v453_v58  ;;  %v454_v0 = vpop.f32.mrf.mxu1 }
  0xa8   :  { %v455_v1 = vadd.f32 %v454_v0, %v405_v63 }
  0xa9   :  { %v596_v52 = vadd.f32 %v1098_v60, %v502_v62 }
  0xab   :  { %793 = vtanh.f32 %v596_v52 }
  0xac   :  { %v1101_v53 = vpop.f32.mrf.mxu3 }
  0xae   :  { %v503_v8 = vpop.f32.mrf.mxu2  ;;  %v408_v11 = vpop.f32.mrf.mxu0 }
  0xaf   :  { %v504_v3 = vadd.f32 %v503_v8, %v455_v1  ;;  %v457_v14 = vpop.f32.mrf.mxu1 }
  0xb0   :  { %v458_v12 = vadd.f32 %v457_v14, %v408_v11 }
  0xb1   :  { %v794_v6 = vpop.eup %793  ;;  %v597_v9 = vadd.f32 %v1098_v60, %v504_v3 }
  0xb2   :  { %628 = vst [vmem:[%s1177_s3] sm:$0xff] %v794_v6 }
  0xb3   :  { %795 = vtanh.f32 %v597_v9 }
  0xb4   :  { %v1107_v15 = vpop.f32.mrf.mxu3 }
  0xb6   :  { %v506_v4 = vpop.f32.mrf.mxu2  ;;  %v410_v18 = vpop.f32.mrf.mxu0 }
  0xb7   :  { %v507_v17 = vadd.f32 %v506_v4, %v458_v12  ;;  %v459_v22 = vpop.f32.mrf.mxu1 }
  0xb8   :  { %v460_v24 = vadd.f32 %v459_v22, %v410_v18 }
  0xb9   :  { %v796_v23 = vpop.eup %795  ;;  %v598_v7 = vadd.f32 %v1098_v60, %v507_v17 }
  0xba   :  { %629 = vst [vmem:[%s1177_s3 + $0x8] sm:$0xff] %v796_v23 }
  0xbb   :  { %797 = vtanh.f32 %v598_v7 }
  0xbc   :  { %v1113_v21 = vpop.f32.mrf.mxu3 }
  0xbe   :  { %v508_v10 = vpop.f32.mrf.mxu2  ;;  %v413_v25 = vpop.f32.mrf.mxu0 }
  0xbf   :  { %v509_v13 = vadd.f32 %v508_v10, %v460_v24  ;;  %v462_v26 = vpop.f32.mrf.mxu1 }
  0xc0   :  { %v463_v29 = vadd.f32 %v462_v26, %v413_v25 }
  0xc1   :  { %v798_v27 = vpop.eup %797  ;;  %v599_v28 = vadd.f32 %v1098_v60, %v509_v13 }
  0xc2   :  { %630 = vst [vmem:[%s1177_s3 + $0x10] sm:$0xff] %v798_v27 }
  0xc3   :  { %799 = vtanh.f32 %v599_v28 }
  0xc4   :  { %v482_v30 = vpop.f32.mrf.mxu3 }
  0xc5   :  { %v483_v61 = vadd.f32 %v482_v30, %v1093_v59 }
  0xc6   :  { %v511_v31 = vpop.f32.mrf.mxu2  ;;  %v415_v34 = vpop.f32.mrf.mxu0 }
  0xc7   :  { %v512_v32 = vadd.f32 %v511_v31, %v463_v29  ;;  %v464_v35 = vpop.f32.mrf.mxu1 }
  0xc8   :  { %v465_v37 = vadd.f32 %v464_v35, %v415_v34 }
  0xc9   :  { %v800_v45 = vpop.eup %799  ;;  %v600_v36 = vadd.f32 %v1098_v60, %v512_v32 }
  0xca   :  { %631 = vst [vmem:[%s1177_s3 + $0x18] sm:$0xff] %v800_v45 }
  0xcb   :  { %801 = vtanh.f32 %v600_v36 }
  0xcc   :  { %v484_v38 = vpop.f32.mrf.mxu3 }
  0xcd   :  { %v485_v6 = vadd.f32 %v484_v38, %v1101_v53 }
  0xce   :  { %v513_v39 = vpop.f32.mrf.mxu2  ;;  %v418_v41 = vpop.f32.mrf.mxu0 }
  0xcf   :  { %v514_v40 = vadd.f32 %v513_v39, %v465_v37  ;;  %v467_v16 = vpop.f32.mrf.mxu1 }
  0xd0   :  { %v468_v42 = vadd.f32 %v467_v16, %v418_v41 }
  0xd1   :  { %v802_v19 = vpop.eup %801  ;;  %v601_v20 = vadd.f32 %v1098_v60, %v514_v40 }
  0xd2   :  { %632 = vst [vmem:[%s1177_s3 + $0x20] sm:$0xff] %v802_v19 }
  0xd3   :  { %803 = vtanh.f32 %v601_v20 }
  0xd4   :  { %v487_v43 = vpop.f32.mrf.mxu3 }
  0xd5   :  { %v488_v13 = vadd.f32 %v487_v43, %v1107_v15 }
  0xd6   :  { %v516_v33 = vpop.f32.mrf.mxu2  ;;  %v420_v2 = vpop.f32.mrf.mxu0 }
  0xd7   :  { %v517_v46 = vadd.f32 %v516_v33, %v468_v42  ;;  %v469_v44 = vpop.f32.mrf.mxu1 }
  0xd8   :  { %v470_v49 = vadd.f32 %v469_v44, %v420_v2 }
  0xd9   :  { %v804_v47 = vpop.eup %803  ;;  %v602_v48 = vadd.f32 %v1098_v60, %v517_v46 }
  0xda   :  { %633 = vst [vmem:[%s1177_s3 + $0x28] sm:$0xff] %v804_v47 }
  0xdb   :  { %805 = vtanh.f32 %v602_v48 }
  0xdc   :  { %v489_v50 = vpop.f32.mrf.mxu3 }
  0xdd   :  { %v490_v35 = vadd.f32 %v489_v50, %v1113_v21 }
  0xde   :  { %v518_v51 = vpop.f32.mrf.mxu2  ;;  %v423_v55 = vpop.f32.mrf.mxu0 }
  0xdf   :  { %v519_v54 = vadd.f32 %v518_v51, %v470_v49  ;;  %v472_v56 = vpop.f32.mrf.mxu1 }
  0xe0   :  { %v473_v58 = vadd.f32 %v472_v56, %v423_v55 }
  0xe1   :  { %v806_v5 = vpop.eup %805  ;;  %v603_v57 = vadd.f32 %v1098_v60, %v519_v54 }
  0xe2   :  { %634 = vst [vmem:[%s1177_s3 + $0x30] sm:$0xff] %v806_v5 }
  0xe3   :  { %807 = vtanh.f32 %v603_v57 }
  0xe4   :  { %v531_v62 = vpop.f32.mrf.mxu3 }
  0xe5   :  { %v532_v0 = vadd.f32 %v531_v62, %v483_v61 }
  0xe6   :  { %v521_v63 = vpop.f32.mrf.mxu2  ;;  %v425_v1 = vpop.f32.mrf.mxu0 }
  0xe7   :  { %v522_v52 = vadd.f32 %v521_v63, %v473_v58  ;;  %v608_v8 = vadd.f32 %v1098_v60, %v532_v0  ;;  %v474_v3 = vpop.f32.mrf.mxu1 }
  0xe8   :  { %v475_v59 = vadd.f32 %v474_v3, %v425_v1 }
  0xe9   :  { %v808_v11 = vpop.eup %807  ;;  %v604_v14 = vadd.f32 %v1098_v60, %v522_v52  ;;  %809 = vtanh.f32 %v608_v8 }
  0xea   :  { %635 = vst [vmem:[%s1177_s3 + $0x38] sm:$0xff] %v808_v11 }
  0xeb   :  { %811 = vtanh.f32 %v604_v14 }
  0xec   :  { %v533_v9 = vpop.f32.mrf.mxu3 }
  0xed   :  { %v534_v4 = vadd.f32 %v533_v9, %v485_v6 }
  0xee   :  { %v523_v12 = vpop.f32.mrf.mxu2  ;;  %v428_v23 = vpop.f32.mrf.mxu0 }
  0xef   :  { %v524_v17 = vadd.f32 %v523_v12, %v475_v59  ;;  %v810_v18 = vpop.eup %809  ;;  %v609_v22 = vadd.f32 %v1098_v60, %v534_v4  ;;  %v477_v7 = vpop.f32.mrf.mxu1 }
  0xf0   :  { %640 = vst [vmem:[%s1177_s3 + $0x60] sm:$0xff] %v810_v18  ;;  %v478_v53 = vadd.f32 %v477_v7, %v428_v23 }
  0xf1   :  { %v812_v24 = vpop.eup %811  ;;  %v605_v10 = vadd.f32 %v1098_v60, %v524_v17  ;;  %813 = vtanh.f32 %v609_v22 }
  0xf2   :  { %636 = vst [vmem:[%s1177_s3 + $0x40] sm:$0xff] %v812_v24 }
  0xf3   :  { %815 = vtanh.f32 %v605_v10 }
  0xf4   :  { %v536_v25 = vpop.f32.mrf.mxu3 }
  0xf5   :  { %v537_v27 = vadd.f32 %v536_v25, %v488_v13 }
  0xf6   :  { %v526_v26 = vpop.f32.mrf.mxu2  ;;  %v430_v15 = vpop.f32.mrf.mxu0 }
  0xf7   :  { %v527_v28 = vadd.f32 %v526_v26, %v478_v53  ;;  %v814_v29 = vpop.eup %813  ;;  %v610_v30 = vadd.f32 %v1098_v60, %v537_v27  ;;  %v479_v34 = vpop.f32.mrf.mxu1 }
  0xf8   :  { %641 = vst [vmem:[%s1177_s3 + $0x68] sm:$0xff] %v814_v29  ;;  %v480_v45 = vadd.f32 %v479_v34, %v430_v15 }
  0xf9   :  { %v816_v31 = vpop.eup %815  ;;  %v606_v32 = vadd.f32 %v1098_v60, %v527_v28  ;;  %817 = vtanh.f32 %v610_v30 }
  0xfa   :  { %637 = vst [vmem:[%s1177_s3 + $0x48] sm:$0xff] %v816_v31 }
  0xfb   :  { %819 = vtanh.f32 %v606_v32 }
  0xfc   :  { %v538_v36 = vpop.f32.mrf.mxu3 }
  0xfd   :  { %v539_v38 = vadd.f32 %v538_v36, %v490_v35 }
  0xfe   :  { %v528_v37 = vpop.f32.mrf.mxu2 }
  0xff   :  { %v529_v39 = vadd.f32 %v528_v37, %v480_v45  ;;  %v818_v40 = vpop.eup %817  ;;  %v611_v41 = vadd.f32 %v1098_v60, %v539_v38 }
 0x100   :  { %642 = vst [vmem:[%s1177_s3 + $0x70] sm:$0xff] %v818_v40 }
 0x101   :  { %v820_v16 = vpop.eup %819  ;;  %v607_v19 = vadd.f32 %v1098_v60, %v529_v39  ;;  %821 = vtanh.f32 %v611_v41 }
 0x102   :  { %638 = vst [vmem:[%s1177_s3 + $0x50] sm:$0xff] %v820_v16 }
 0x103   :  { %823 = vtanh.f32 %v607_v19 }
 0x107   :  { %v822_v21 = vpop.eup %821 }
 0x108   :  { %643 = vst [vmem:[%s1177_s3 + $0x78] sm:$0xff] %v822_v21 }
 0x109   :  { %v824_v20 = vpop.eup %823 }
 0x10a   :  { %639 = vst [vmem:[%s1177_s3 + $0x58] sm:$0xff] %v824_v20 }

</bundles_post_ra>
